<compile_context>
chip_gen: v5e
topology: v5e:2x2
jax: 0.10.0
libtpu: 0.0.40
codegen_flags: <defaults>
</compile_context>

<pallas_src>
import functools

import jax
import jax.numpy as jnp
from jax.experimental import pallas as pl
from jax.experimental.pallas import tpu as pltpu


_LANES = 128


# -----------------------------------------------------------------------------
# Kernel 1: fused  conv3x3 (9 accumulating matmuls) -> ReLU -> fused mu|logvar
#           head (one matmul) -> reparameterize(mu, logvar) with supplied eps.
# One grid step == one image.  Output is a packed slab [h | z | mu | logvar].
# -----------------------------------------------------------------------------
def _make_forward_kernel(H, W, C, Hd, Z):
    Wp = W + 2            # padded width
    Rp = H * Wp           # output rows per image (incl. 2 discarded cols / row)

    def kernel(x_ref, wt_ref, b1_ref, wh_ref, bh_ref, eps_ref, out_ref):
        # 3x3 conv with padding=1 as 9 accumulating matmuls over row-shifted
        # windows of the flattened padded image.  For output row
        # r = h*(W+2)+w, tap (dh,dw) lives at flat row r + dh*(W+2) + dw.
        acc = jnp.zeros((Rp, Hd), jnp.float32)
        for dh in range(3):
            for dw in range(3):
                off = dh * Wp + dw
                lhs = x_ref[0, off:off + Rp, :]                 # (Rp, C) bf16
                acc = acc + jnp.dot(lhs, wt_ref[dh * 3 + dw],
                                    preferred_element_type=jnp.float32)

        # activation (ReLU), bias in f32
        h = jnp.maximum(acc + b1_ref[...], 0.0)                 # (Rp, Hd) f32

        # fused mu|logvar heads: one (Hd, 2Z) matmul
        heads = jnp.dot(h.astype(jnp.bfloat16), wh_ref[...],
                        preferred_element_type=jnp.float32) + bh_ref[...]
        mu = heads[:, :Z]
        lv = heads[:, Z:]

        # reparameterization trick (f32 elementwise, v5e-safe)
        z = mu + eps_ref[0] * jnp.exp(0.5 * lv)

        # packed output slab -> single dense HBM writeback stream
        out_ref[0, :, 0:Hd] = h
        out_ref[0, :, Hd:Hd + Z] = z
        out_ref[0, :, Hd + Z:Hd + 2 * Z] = mu
        out_ref[0, :, Hd + 2 * Z:Hd + 3 * Z] = lv

    return kernel


@jax.jit
def _latent_forward(x_nchw, w_taps, b1, w_heads, b_heads, eps):
    """Returns NHWC (hidden, z, mu, logvar)."""
    N, C, H, W = x_nchw.shape
    Hd = b1.shape[-1]
    Z = eps.shape[-1]
    Wp = W + 2
    Rp = H * Wp
    Rin = (H + 3) * Wp    # H padded by (1, 2) so the last tap windows stay in range

    # NCHW -> NHWC, zero-pad, flatten spatial dims, bf16 for the MXU operands.
    x = jnp.transpose(x_nchw, (0, 2, 3, 1))
    x = jnp.pad(x, ((0, 0), (1, 2), (1, 1), (0, 0)))
    x = x.reshape(N, Rin, C).astype(jnp.bfloat16)

    kernel = _make_forward_kernel(H, W, C, Hd, Z)
    slab = pl.pallas_call(
        kernel,
        grid=(N,),
        in_specs=[
            pl.BlockSpec((1, Rin, C), lambda n: (n, 0, 0)),       # padded image
            pl.BlockSpec((9, C, Hd), lambda n: (0, 0, 0)),        # conv taps (resident)
            pl.BlockSpec((1, Hd), lambda n: (0, 0)),              # conv bias
            pl.BlockSpec((Hd, 2 * Z), lambda n: (0, 0)),          # fused head weight
            pl.BlockSpec((1, 2 * Z), lambda n: (0, 0)),           # fused head bias
            pl.BlockSpec((1, Rp, Z), lambda n: (n, 0, 0)),        # eps
        ],
        out_specs=pl.BlockSpec((1, Rp, Hd + 3 * Z), lambda n: (n, 0, 0)),
        out_shape=jax.ShapeDtypeStruct((N, Rp, Hd + 3 * Z), jnp.float32),
        compiler_params=pltpu.CompilerParams(
            dimension_semantics=("parallel",),
            vmem_limit_bytes=32 * 1024 * 1024,
        ),
    )(x, w_taps, b1, w_heads, b_heads, eps)

    # drop the 2 garbage columns per row, split the slab
    slab = slab.reshape(N, H, Wp, Hd + 3 * Z)[:, :, :W, :]
    h_nhwc = slab[..., :Hd]
    z_nhwc = slab[..., Hd:Hd + Z]
    mu_nhwc = slab[..., Hd + Z:Hd + 2 * Z]
    lv_nhwc = slab[..., Hd + 2 * Z:]
    return h_nhwc, z_nhwc, mu_nhwc, lv_nhwc


# -----------------------------------------------------------------------------
# Kernel 2: ladder combination of encoder (shared store) and decoder
#           distributions.  Runs on a flattened lane-dense (rows, 128) view.
# -----------------------------------------------------------------------------
def _ladder_combine_kernel(enc_mu_ref, enc_lv_ref, dec_mu_ref, dec_lv_ref,
                           cmu_ref, clv_ref):
    enc_lv = enc_lv_ref[...]
    dec_lv = dec_lv_ref[...]
    enc_var = jnp.exp(enc_lv)
    dec_var = jnp.exp(dec_lv)
    sum_var = enc_var + dec_var
    common_sigma = pl.reciprocal(sum_var, approx=True)          # EUP, ~free
    # mu/var == mu * exp(-logvar): EUP exp instead of VALU divide
    cmu_ref[...] = (enc_mu_ref[...] * jnp.exp(-enc_lv) +
                    dec_mu_ref[...] * jnp.exp(-dec_lv)) * common_sigma
    # log(common_sigma**2) == -2*log(enc_var + dec_var)
    clv_ref[...] = -2.0 * jnp.log(sum_var)


@jax.jit
def _ladder_combine(enc_mu, enc_lv, dec_mu, dec_lv):
    shape = enc_mu.shape
    total = enc_mu.size
    rows_needed = -(-total // _LANES)
    tile_rows = min(512, ((rows_needed + 7) // 8) * 8)
    n_tiles = -(-rows_needed // tile_rows)
    padded_rows = n_tiles * tile_rows
    padded_total = padded_rows * _LANES

    def prep(a):
        a = a.astype(jnp.float32).reshape(-1)
        if padded_total != total:
            a = jnp.pad(a, (0, padded_total - total))
        return a.reshape(padded_rows, _LANES)

    args = [prep(a) for a in (enc_mu, enc_lv, dec_mu, dec_lv)]
    spec = pl.BlockSpec((tile_rows, _LANES), lambda i: (i, 0))
    out_sd = jax.ShapeDtypeStruct((padded_rows, _LANES), jnp.float32)

    cmu, clv = pl.pallas_call(
        _ladder_combine_kernel,
        grid=(n_tiles,),
        in_specs=[spec] * 4,
        out_specs=(spec, spec),
        out_shape=(out_sd, out_sd),
        compiler_params=pltpu.CompilerParams(
            dimension_semantics=("parallel",),
            vmem_limit_bytes=32 * 1024 * 1024,
        ),
    )(*args)

    unpack = lambda a: a.reshape(-1)[:total].reshape(shape)
    return unpack(cmu), unpack(clv)


# -----------------------------------------------------------------------------
# Glue: weight init (PyTorch conv layouts -> matmul layouts), LatentLayer logic
# -----------------------------------------------------------------------------
def _to_nchw(a_nhwc):
    return jnp.transpose(a_nhwc, (0, 3, 1, 2))


class LatentLayerPallas:
    """JAX/Pallas re-implementation of LatentLayer with concrete sub-networks:
        network        = Conv2d(C_in, Hd, 3, padding=1)
        activation     = ReLU
        mu_network     = Conv2d(Hd, Z, 1)
        logvar_network = Conv2d(Hd, Z, 1)
    External interface keeps NCHW tensors (PyTorch convention).
    """

    def __init__(self, c_in, hidden, z_dim, key, latent=None, is_ladder=True):
        k1, k2, k3, k4, k5, k6 = jax.random.split(key, 6)
        # conv3x3: torch layout (Hd, C, 3, 3) -> 9 taps of (C, Hd), bf16 for MXU
        w_conv = 0.1 * jax.random.normal(k1, (hidden, c_in, 3, 3), jnp.float32)
        self.w_taps = jnp.transpose(w_conv, (2, 3, 1, 0)).reshape(
            9, c_in, hidden).astype(jnp.bfloat16)
        self.b1 = 0.1 * jax.random.normal(k2, (1, hidden), jnp.float32)
        # fused 1x1 heads: torch (Z, Hd, 1, 1) -> (Hd, Z), concatenated to (Hd, 2Z)
        w_mu = 0.1 * jax.random.normal(k3, (z_dim, hidden, 1, 1), jnp.float32)
        w_lv = 0.1 * jax.random.normal(k5, (z_dim, hidden, 1, 1), jnp.float32)
        wmu = jnp.transpose(w_mu.reshape(z_dim, hidden), (1, 0))
        wlv = jnp.transpose(w_lv.reshape(z_dim, hidden), (1, 0))
        self.w_heads = jnp.concatenate([wmu, wlv], axis=1).astype(jnp.bfloat16)
        bmu = 0.1 * jax.random.normal(k4, (1, z_dim), jnp.float32)
        blv = 0.1 * jax.random.normal(k6, (1, z_dim), jnp.float32)
        self.b_heads = jnp.concatenate([bmu, blv], axis=1)

        self.z_dim = z_dim
        self.hidden = hidden
        self.is_ladder = is_ladder
        self.zs = latent if latent is not None else [None, None]
        self.mu = None
        self.logvar = None
        self.training = True

    # --- torch-like bookkeeping ---------------------------------------------
    def register(self, mu, logvar):
        self.zs[0] = mu
        self.zs[1] = logvar

    def is_filled(self):
        return self.zs[0] is not None and self.zs[1] is not None

    def flush(self):
        self.zs[0] = None
        self.zs[1] = None

    # --- forward --------------------------------------------------------------
    def _heads(self, x_nchw, rng_key):
        N, _, H, W = x_nchw.shape
        # eps is generated host-side; covers the Rp = H*(W+2) row layout
        # (values in the 2 discarded columns per row are never used).
        eps = jax.random.normal(rng_key, (N, H * (W + 2), self.z_dim), jnp.float32)
        return _latent_forward(x_nchw, self.w_taps, self.b1,
                               self.w_heads, self.b_heads, eps)

    def get_latent_distribution(self, x_nchw, rng_key=None):
        if rng_key is None:
            rng_key = jax.random.PRNGKey(0)
        _, _, mu_nhwc, lv_nhwc = self._heads(x_nchw, rng_key)
        return _to_nchw(mu_nhwc), _to_nchw(lv_nhwc)

    def forward(self, x_nchw, rng_key):
        h_nhwc, z_nhwc, mu_nhwc, lv_nhwc = self._heads(x_nchw, rng_key)
        if not self.training:
            return _to_nchw(z_nhwc)
        mu = _to_nchw(mu_nhwc)
        logvar = _to_nchw(lv_nhwc)
        if not self.is_ladder:
            self.mu, self.logvar = mu, logvar
            self.register(mu, logvar)
            return _to_nchw(z_nhwc)
        if self.is_filled():
            common_mu, common_logvar = _ladder_combine(
                self.zs[0], self.zs[1], mu, logvar)
            self.register(common_mu, common_logvar)
            return _to_nchw(z_nhwc)
        else:
            self.mu, self.logvar = mu, logvar
            self.register(mu, logvar)
            return _to_nchw(h_nhwc)   # first (encoder) layer returns hidden


if __name__ == "__main__":
    key = jax.random.PRNGKey(0)
    k_params1, k_params2, k_x, k_e1, k_e2, k_e3 = jax.random.split(key, 6)

    N, C, H, W = 2, 4, 16, 16
    HIDDEN, ZDIM = 32, 8

    shared_latent = [None, None]
    enc_layer = LatentLayerPallas(C, HIDDEN, ZDIM, k_params1,
                                  latent=shared_latent, is_ladder=True)
    dec_layer = LatentLayerPallas(C, HIDDEN, ZDIM, k_params2,
                                  latent=shared_latent, is_ladder=True)

    x = jax.random.normal(k_x, (N, C, H, W), jnp.float32)

    # --- training / ladder pass: encoder fills the store, decoder combines ---
    enc_layer.training = True
    dec_layer.training = True
    hidden_out = enc_layer.forward(x, k_e1)          # (N, HIDDEN, H, W)
    z_train = dec_layer.forward(x, k_e2)             # (N, ZDIM, H, W)
    common_mu, common_logvar = shared_latent[0], shared_latent[1]

    # --- eval pass: plain reparameterized sample ------------------------------
    enc_layer.flush()
    enc_layer.training = False
    z_eval = enc_layer.forward(x, k_e3)              # (N, ZDIM, H, W)

    for arr in (hidden_out, z_train, common_mu, common_logvar, z_eval):
        jax.block_until_ready(arr)

    assert hidden_out.shape == (N, HIDDEN, H, W)
    assert z_train.shape == (N, ZDIM, H, W)
    assert common_mu.shape == (N, ZDIM, H, W)
    assert common_logvar.shape == (N, ZDIM, H, W)
    assert z_eval.shape == (N, ZDIM, H, W)

    print("KERNEL_OK")
</pallas_src>

<mosaic_0001>
module attributes {stable_mosaic.version = 11 : i64} {
  func.func @kernel(%arg0: i32, %arg1: memref<1x342x4xbf16, #tpu.memory_space<vmem>>, %arg2: memref<9x4x32xbf16, #tpu.memory_space<vmem>>, %arg3: memref<1x32xf32, #tpu.memory_space<vmem>>, %arg4: memref<32x16xbf16, #tpu.memory_space<vmem>>, %arg5: memref<1x16xf32, #tpu.memory_space<vmem>>, %arg6: memref<1x288x8xf32, #tpu.memory_space<vmem>>, %arg7: memref<1x288x56xf32, #tpu.memory_space<vmem>>) attributes {dimension_semantics = [#tpu.dimension_semantics<parallel>], iteration_bounds = array<i64: 2>, scalar_prefetch = 0 : i64, scratch_operands = 0 : i64, tpu.core_type = #tpu.core_type<tc>, window_params = [{transform_indices = @transform_0, window_bounds = array<i64: 1, 342, 4>}, {pipeline_mode = #tpu.pipeline_mode<synchronous>, transform_indices = @transform_1, window_bounds = array<i64: 9, 4, 32>}, {pipeline_mode = #tpu.pipeline_mode<synchronous>, transform_indices = @transform_2, window_bounds = array<i64: 1, 32>}, {pipeline_mode = #tpu.pipeline_mode<synchronous>, transform_indices = @transform_3, window_bounds = array<i64: 32, 16>}, {pipeline_mode = #tpu.pipeline_mode<synchronous>, transform_indices = @transform_4, window_bounds = array<i64: 1, 16>}, {transform_indices = @transform_5, window_bounds = array<i64: 1, 288, 8>}, {transform_indices = @transform_6, window_bounds = array<i64: 1, 288, 56>}]} {
    %cst = arith.constant 0.000000e+00 : f32
    %0 = vector.broadcast %cst : f32 to vector<288x32xf32>
    %c0 = arith.constant 0 : index
    %c0_0 = arith.constant 0 : index
    %c0_1 = arith.constant 0 : index
    %1 = vector.load %arg1[%c0, %c0_0, %c0_1] : memref<1x342x4xbf16, #tpu.memory_space<vmem>>, vector<1x288x4xbf16>
    %2 = vector.shape_cast %1 : vector<1x288x4xbf16> to vector<288x4xbf16>
    %c0_2 = arith.constant 0 : index
    %c0_3 = arith.constant 0 : index
    %c0_4 = arith.constant 0 : index
    %3 = vector.load %arg2[%c0_2, %c0_3, %c0_4] : memref<9x4x32xbf16, #tpu.memory_space<vmem>>, vector<1x4x32xbf16>
    %4 = vector.shape_cast %3 : vector<1x4x32xbf16> to vector<4x32xbf16>
    %cst_5 = arith.constant dense<0.000000e+00> : vector<288x32xf32>
    %5 = tpu.matmul %2, %4, %cst_5 {dimension_numbers = #tpu.dot_dimension_numbers<[1], [0], [0], [1], [0, 0, 1, 1], [], []>} : vector<288x4xbf16>, vector<4x32xbf16>, vector<288x32xf32> -> vector<288x32xf32>
    %6 = arith.addf %0, %5 : vector<288x32xf32>
    %c0_6 = arith.constant 0 : index
    %c1 = arith.constant 1 : index
    %c0_7 = arith.constant 0 : index
    %7 = vector.load %arg1[%c0_6, %c1, %c0_7] : memref<1x342x4xbf16, #tpu.memory_space<vmem>>, vector<1x288x4xbf16>
    %8 = vector.shape_cast %7 : vector<1x288x4xbf16> to vector<288x4xbf16>
    %c1_8 = arith.constant 1 : index
    %c0_9 = arith.constant 0 : index
    %c0_10 = arith.constant 0 : index
    %9 = vector.load %arg2[%c1_8, %c0_9, %c0_10] : memref<9x4x32xbf16, #tpu.memory_space<vmem>>, vector<1x4x32xbf16>
    %10 = vector.shape_cast %9 : vector<1x4x32xbf16> to vector<4x32xbf16>
    %cst_11 = arith.constant dense<0.000000e+00> : vector<288x32xf32>
    %11 = tpu.matmul %8, %10, %cst_11 {dimension_numbers = #tpu.dot_dimension_numbers<[1], [0], [0], [1], [0, 0, 1, 1], [], []>} : vector<288x4xbf16>, vector<4x32xbf16>, vector<288x32xf32> -> vector<288x32xf32>
    %12 = arith.addf %6, %11 : vector<288x32xf32>
    %c0_12 = arith.constant 0 : index
    %c2 = arith.constant 2 : index
    %c0_13 = arith.constant 0 : index
    %13 = vector.load %arg1[%c0_12, %c2, %c0_13] : memref<1x342x4xbf16, #tpu.memory_space<vmem>>, vector<1x288x4xbf16>
    %14 = vector.shape_cast %13 : vector<1x288x4xbf16> to vector<288x4xbf16>
    %c2_14 = arith.constant 2 : index
    %c0_15 = arith.constant 0 : index
    %c0_16 = arith.constant 0 : index
    %15 = vector.load %arg2[%c2_14, %c0_15, %c0_16] : memref<9x4x32xbf16, #tpu.memory_space<vmem>>, vector<1x4x32xbf16>
    %16 = vector.shape_cast %15 : vector<1x4x32xbf16> to vector<4x32xbf16>
    %cst_17 = arith.constant dense<0.000000e+00> : vector<288x32xf32>
    %17 = tpu.matmul %14, %16, %cst_17 {dimension_numbers = #tpu.dot_dimension_numbers<[1], [0], [0], [1], [0, 0, 1, 1], [], []>} : vector<288x4xbf16>, vector<4x32xbf16>, vector<288x32xf32> -> vector<288x32xf32>
    %18 = arith.addf %12, %17 : vector<288x32xf32>
    %c0_18 = arith.constant 0 : index
    %c18 = arith.constant 18 : index
    %c0_19 = arith.constant 0 : index
    %19 = vector.load %arg1[%c0_18, %c18, %c0_19] : memref<1x342x4xbf16, #tpu.memory_space<vmem>>, vector<1x288x4xbf16>
    %20 = vector.shape_cast %19 : vector<1x288x4xbf16> to vector<288x4xbf16>
    %c3 = arith.constant 3 : index
    %c0_20 = arith.constant 0 : index
    %c0_21 = arith.constant 0 : index
    %21 = vector.load %arg2[%c3, %c0_20, %c0_21] : memref<9x4x32xbf16, #tpu.memory_space<vmem>>, vector<1x4x32xbf16>
    %22 = vector.shape_cast %21 : vector<1x4x32xbf16> to vector<4x32xbf16>
    %cst_22 = arith.constant dense<0.000000e+00> : vector<288x32xf32>
    %23 = tpu.matmul %20, %22, %cst_22 {dimension_numbers = #tpu.dot_dimension_numbers<[1], [0], [0], [1], [0, 0, 1, 1], [], []>} : vector<288x4xbf16>, vector<4x32xbf16>, vector<288x32xf32> -> vector<288x32xf32>
    %24 = arith.addf %18, %23 : vector<288x32xf32>
    %c0_23 = arith.constant 0 : index
    %c19 = arith.constant 19 : index
    %c0_24 = arith.constant 0 : index
    %25 = vector.load %arg1[%c0_23, %c19, %c0_24] : memref<1x342x4xbf16, #tpu.memory_space<vmem>>, vector<1x288x4xbf16>
    %26 = vector.shape_cast %25 : vector<1x288x4xbf16> to vector<288x4xbf16>
    %c4 = arith.constant 4 : index
    %c0_25 = arith.constant 0 : index
    %c0_26 = arith.constant 0 : index
    %27 = vector.load %arg2[%c4, %c0_25, %c0_26] : memref<9x4x32xbf16, #tpu.memory_space<vmem>>, vector<1x4x32xbf16>
    %28 = vector.shape_cast %27 : vector<1x4x32xbf16> to vector<4x32xbf16>
    %cst_27 = arith.constant dense<0.000000e+00> : vector<288x32xf32>
    %29 = tpu.matmul %26, %28, %cst_27 {dimension_numbers = #tpu.dot_dimension_numbers<[1], [0], [0], [1], [0, 0, 1, 1], [], []>} : vector<288x4xbf16>, vector<4x32xbf16>, vector<288x32xf32> -> vector<288x32xf32>
    %30 = arith.addf %24, %29 : vector<288x32xf32>
    %c0_28 = arith.constant 0 : index
    %c20 = arith.constant 20 : index
    %c0_29 = arith.constant 0 : index
    %31 = vector.load %arg1[%c0_28, %c20, %c0_29] : memref<1x342x4xbf16, #tpu.memory_space<vmem>>, vector<1x288x4xbf16>
    %32 = vector.shape_cast %31 : vector<1x288x4xbf16> to vector<288x4xbf16>
    %c5 = arith.constant 5 : index
    %c0_30 = arith.constant 0 : index
    %c0_31 = arith.constant 0 : index
    %33 = vector.load %arg2[%c5, %c0_30, %c0_31] : memref<9x4x32xbf16, #tpu.memory_space<vmem>>, vector<1x4x32xbf16>
    %34 = vector.shape_cast %33 : vector<1x4x32xbf16> to vector<4x32xbf16>
    %cst_32 = arith.constant dense<0.000000e+00> : vector<288x32xf32>
    %35 = tpu.matmul %32, %34, %cst_32 {dimension_numbers = #tpu.dot_dimension_numbers<[1], [0], [0], [1], [0, 0, 1, 1], [], []>} : vector<288x4xbf16>, vector<4x32xbf16>, vector<288x32xf32> -> vector<288x32xf32>
    %36 = arith.addf %30, %35 : vector<288x32xf32>
    %c0_33 = arith.constant 0 : index
    %c36 = arith.constant 36 : index
    %c0_34 = arith.constant 0 : index
    %37 = vector.load %arg1[%c0_33, %c36, %c0_34] : memref<1x342x4xbf16, #tpu.memory_space<vmem>>, vector<1x288x4xbf16>
    %38 = vector.shape_cast %37 : vector<1x288x4xbf16> to vector<288x4xbf16>
    %c6 = arith.constant 6 : index
    %c0_35 = arith.constant 0 : index
    %c0_36 = arith.constant 0 : index
    %39 = vector.load %arg2[%c6, %c0_35, %c0_36] : memref<9x4x32xbf16, #tpu.memory_space<vmem>>, vector<1x4x32xbf16>
    %40 = vector.shape_cast %39 : vector<1x4x32xbf16> to vector<4x32xbf16>
    %cst_37 = arith.constant dense<0.000000e+00> : vector<288x32xf32>
    %41 = tpu.matmul %38, %40, %cst_37 {dimension_numbers = #tpu.dot_dimension_numbers<[1], [0], [0], [1], [0, 0, 1, 1], [], []>} : vector<288x4xbf16>, vector<4x32xbf16>, vector<288x32xf32> -> vector<288x32xf32>
    %42 = arith.addf %36, %41 : vector<288x32xf32>
    %c0_38 = arith.constant 0 : index
    %c37 = arith.constant 37 : index
    %c0_39 = arith.constant 0 : index
    %43 = vector.load %arg1[%c0_38, %c37, %c0_39] : memref<1x342x4xbf16, #tpu.memory_space<vmem>>, vector<1x288x4xbf16>
    %44 = vector.shape_cast %43 : vector<1x288x4xbf16> to vector<288x4xbf16>
    %c7 = arith.constant 7 : index
    %c0_40 = arith.constant 0 : index
    %c0_41 = arith.constant 0 : index
    %45 = vector.load %arg2[%c7, %c0_40, %c0_41] : memref<9x4x32xbf16, #tpu.memory_space<vmem>>, vector<1x4x32xbf16>
    %46 = vector.shape_cast %45 : vector<1x4x32xbf16> to vector<4x32xbf16>
    %cst_42 = arith.constant dense<0.000000e+00> : vector<288x32xf32>
    %47 = tpu.matmul %44, %46, %cst_42 {dimension_numbers = #tpu.dot_dimension_numbers<[1], [0], [0], [1], [0, 0, 1, 1], [], []>} : vector<288x4xbf16>, vector<4x32xbf16>, vector<288x32xf32> -> vector<288x32xf32>
    %48 = arith.addf %42, %47 : vector<288x32xf32>
    %c0_43 = arith.constant 0 : index
    %c38 = arith.constant 38 : index
    %c0_44 = arith.constant 0 : index
    %49 = vector.load %arg1[%c0_43, %c38, %c0_44] : memref<1x342x4xbf16, #tpu.memory_space<vmem>>, vector<1x288x4xbf16>
    %50 = vector.shape_cast %49 : vector<1x288x4xbf16> to vector<288x4xbf16>
    %c8 = arith.constant 8 : index
    %c0_45 = arith.constant 0 : index
    %c0_46 = arith.constant 0 : index
    %51 = vector.load %arg2[%c8, %c0_45, %c0_46] : memref<9x4x32xbf16, #tpu.memory_space<vmem>>, vector<1x4x32xbf16>
    %52 = vector.shape_cast %51 : vector<1x4x32xbf16> to vector<4x32xbf16>
    %cst_47 = arith.constant dense<0.000000e+00> : vector<288x32xf32>
    %53 = tpu.matmul %50, %52, %cst_47 {dimension_numbers = #tpu.dot_dimension_numbers<[1], [0], [0], [1], [0, 0, 1, 1], [], []>} : vector<288x4xbf16>, vector<4x32xbf16>, vector<288x32xf32> -> vector<288x32xf32>
    %54 = arith.addf %48, %53 : vector<288x32xf32>
    %c0_48 = arith.constant 0 : index
    %c0_49 = arith.constant 0 : index
    %55 = vector.load %arg3[%c0_48, %c0_49] : memref<1x32xf32, #tpu.memory_space<vmem>>, vector<1x32xf32>
    %56 = vector.broadcast %55 : vector<1x32xf32> to vector<288x32xf32>
    %57 = arith.addf %54, %56 : vector<288x32xf32>
    %cst_50 = arith.constant 0.000000e+00 : f32
    %58 = vector.broadcast %cst_50 : f32 to vector<288x32xf32>
    %59 = arith.maximumf %57, %58 : vector<288x32xf32>
    %60 = arith.truncf %59 : vector<288x32xf32> to vector<288x32xbf16>
    %c0_51 = arith.constant 0 : index
    %c0_52 = arith.constant 0 : index
    %61 = vector.load %arg4[%c0_51, %c0_52] : memref<32x16xbf16, #tpu.memory_space<vmem>>, vector<32x16xbf16>
    %cst_53 = arith.constant dense<0.000000e+00> : vector<288x16xf32>
    %62 = tpu.matmul %60, %61, %cst_53 {dimension_numbers = #tpu.dot_dimension_numbers<[1], [0], [0], [1], [0, 0, 1, 1], [], []>} : vector<288x32xbf16>, vector<32x16xbf16>, vector<288x16xf32> -> vector<288x16xf32>
    %c0_54 = arith.constant 0 : index
    %c0_55 = arith.constant 0 : index
    %63 = vector.load %arg5[%c0_54, %c0_55] : memref<1x16xf32, #tpu.memory_space<vmem>>, vector<1x16xf32>
    %64 = vector.broadcast %63 : vector<1x16xf32> to vector<288x16xf32>
    %65 = arith.addf %62, %64 : vector<288x16xf32>
    %66 = vector.extract_strided_slice %65 {offsets = [0, 0], sizes = [288, 8], strides = [1, 1]} : vector<288x16xf32> to vector<288x8xf32>
    %67 = vector.extract_strided_slice %65 {offsets = [0, 8], sizes = [288, 8], strides = [1, 1]} : vector<288x16xf32> to vector<288x8xf32>
    %c0_56 = arith.constant 0 : index
    %c0_57 = arith.constant 0 : index
    %c0_58 = arith.constant 0 : index
    %68 = vector.load %arg6[%c0_56, %c0_57, %c0_58] : memref<1x288x8xf32, #tpu.memory_space<vmem>>, vector<1x288x8xf32>
    %69 = vector.shape_cast %68 : vector<1x288x8xf32> to vector<288x8xf32>
    %cst_59 = arith.constant 5.000000e-01 : f32
    %70 = vector.broadcast %cst_59 : f32 to vector<288x8xf32>
    %71 = arith.mulf %70, %67 : vector<288x8xf32>
    %72 = math.exp %71 : vector<288x8xf32>
    %73 = arith.mulf %69, %72 : vector<288x8xf32>
    %74 = arith.addf %66, %73 : vector<288x8xf32>
    %c0_60 = arith.constant 0 : index
    %c0_61 = arith.constant 0 : index
    %c0_62 = arith.constant 0 : index
    %75 = vector.load %arg7[%c0_60, %c0_61, %c0_62] : memref<1x288x56xf32, #tpu.memory_space<vmem>>, vector<1x288x32xf32>
    %76 = vector.shape_cast %75 : vector<1x288x32xf32> to vector<288x32xf32>
    %77 = vector.shape_cast %59 : vector<288x32xf32> to vector<1x288x32xf32>
    tpu.vector_store %arg7[%c0_60, %c0_61, %c0_62], %77 {strides = array<i32>} : memref<1x288x56xf32, #tpu.memory_space<vmem>>, vector<1x288x32xf32>,
    %c0_63 = arith.constant 0 : index
    %c0_64 = arith.constant 0 : index
    %c32 = arith.constant 32 : index
    %78 = vector.load %arg7[%c0_63, %c0_64, %c32] : memref<1x288x56xf32, #tpu.memory_space<vmem>>, vector<1x288x8xf32>
    %79 = vector.shape_cast %78 : vector<1x288x8xf32> to vector<288x8xf32>
    %80 = vector.shape_cast %74 : vector<288x8xf32> to vector<1x288x8xf32>
    tpu.vector_store %arg7[%c0_63, %c0_64, %c32], %80 {strides = array<i32>} : memref<1x288x56xf32, #tpu.memory_space<vmem>>, vector<1x288x8xf32>,
    %c0_65 = arith.constant 0 : index
    %c0_66 = arith.constant 0 : index
    %c40 = arith.constant 40 : index
    %81 = vector.load %arg7[%c0_65, %c0_66, %c40] : memref<1x288x56xf32, #tpu.memory_space<vmem>>, vector<1x288x8xf32>
    %82 = vector.shape_cast %81 : vector<1x288x8xf32> to vector<288x8xf32>
    %83 = vector.shape_cast %66 : vector<288x8xf32> to vector<1x288x8xf32>
    tpu.vector_store %arg7[%c0_65, %c0_66, %c40], %83 {strides = array<i32>} : memref<1x288x56xf32, #tpu.memory_space<vmem>>, vector<1x288x8xf32>,
    %c0_67 = arith.constant 0 : index
    %c0_68 = arith.constant 0 : index
    %c48 = arith.constant 48 : index
    %84 = vector.load %arg7[%c0_67, %c0_68, %c48] : memref<1x288x56xf32, #tpu.memory_space<vmem>>, vector<1x288x8xf32>
    %85 = vector.shape_cast %84 : vector<1x288x8xf32> to vector<288x8xf32>
    %86 = vector.shape_cast %67 : vector<288x8xf32> to vector<1x288x8xf32>
    tpu.vector_store %arg7[%c0_67, %c0_68, %c48], %86 {strides = array<i32>} : memref<1x288x56xf32, #tpu.memory_space<vmem>>, vector<1x288x8xf32>,
    return
  }
  func.func @transform_0(%arg0: i32) -> (i32, i32, i32) {
    %c0_i32 = arith.constant 0 : i32
    %c0_i32_0 = arith.constant 0 : i32
    %c0_i32_1 = arith.constant 0 : i32
    return %arg0, %c0_i32, %c0_i32_0 : i32, i32, i32
  }
  func.func @transform_1(%arg0: i32) -> (i32, i32, i32) {
    %c0_i32 = arith.constant 0 : i32
    %c0_i32_0 = arith.constant 0 : i32
    %c0_i32_1 = arith.constant 0 : i32
    %c0_i32_2 = arith.constant 0 : i32
    return %c0_i32, %c0_i32_0, %c0_i32_1 : i32, i32, i32
  }
  func.func @transform_2(%arg0: i32) -> (i32, i32) {
    %c0_i32 = arith.constant 0 : i32
    %c0_i32_0 = arith.constant 0 : i32
    %c0_i32_1 = arith.constant 0 : i32
    return %c0_i32, %c0_i32_0 : i32, i32
  }
  func.func @transform_3(%arg0: i32) -> (i32, i32) {
    %c0_i32 = arith.constant 0 : i32
    %c0_i32_0 = arith.constant 0 : i32
    %c0_i32_1 = arith.constant 0 : i32
    return %c0_i32, %c0_i32_0 : i32, i32
  }
  func.func @transform_4(%arg0: i32) -> (i32, i32) {
    %c0_i32 = arith.constant 0 : i32
    %c0_i32_0 = arith.constant 0 : i32
    %c0_i32_1 = arith.constant 0 : i32
    return %c0_i32, %c0_i32_0 : i32, i32
  }
  func.func @transform_5(%arg0: i32) -> (i32, i32, i32) {
    %c0_i32 = arith.constant 0 : i32
    %c0_i32_0 = arith.constant 0 : i32
    %c0_i32_1 = arith.constant 0 : i32
    return %arg0, %c0_i32, %c0_i32_0 : i32, i32, i32
  }
  func.func @transform_6(%arg0: i32) -> (i32, i32, i32) {
    %c0_i32 = arith.constant 0 : i32
    %c0_i32_0 = arith.constant 0 : i32
    %c0_i32_1 = arith.constant 0 : i32
    return %arg0, %c0_i32, %c0_i32_0 : i32, i32, i32
  }
}

</mosaic_0001>

<bundles_post_ra>
// kernel: _latent_forward.1
= control target key start
LH: loop header
LB: loop body
LE: loop exit
PB: predicated region body
PF: predicated region fallthrough
CT: control target
= control target key end

     0   :  { %s4761_s21 = smov 0   ;;  %s6506_s0 = inlined_call_operand.vmem [shape: bf16[2,342,4], index: 0, kind: input, shape index: {}]   ;;  %s6507_s1 = inlined_call_operand.vmem [shape: bf16[9,4,32], index: 1, kind: input, shape index: {}]   ;;  %s6508_s2 = inlined_call_operand.vmem [shape: f32[1,32], index: 2, kind: input, shape index: {}]   ;;  %s6509_s3 = inlined_call_operand.vmem [shape: bf16[32,16], index: 3, kind: input, shape index: {}]   ;;  %s6510_s4 = inlined_call_operand.vmem [shape: f32[1,16], index: 4, kind: input, shape index: {}]   ;;  %s6511_s5 = inlined_call_operand.vmem [shape: f32[2,288,8], index: 5, kind: input, shape index: {}]   ;;  %s6512_s6 = inlined_call_operand.vmem [shape: f32[2,288,56], index: 6, kind: output, shape index: {}]  }
   0x1 LB: > { %s4149_s22 = sadd.s32 4294967295, %s4721_s21   ;;  %p4153_p0 = scmp.ge.s32.totalorder %s4721_s21, 1  ;;  %s4721_s21 = sphi %s4761_s21, %s16_s21  }
   0x2   : > { %p222_p1 = scmp.lt.s32.totalorder %s4721_s21, 3 }
   0x4   : > { %p223_p2 = pnand %p4153_p0, %p222_p1 }
   0x6   : > { %226 = sbr.rel (%p223_p2) target bundleno = 1281 (0x501), region = 44 }
   0xb   : > { %v309_v0 = vld [vmem:[%s6507_s1] sm:$0x3]  ;;  %vm610_vm0 = vcmask 1041408   ;;  %p257_p3 = scmp.lt.s32.totalorder %s4149_s22, 1  ;;  %v4157_v2 = vld [vmem:[%s6507_s1 + $0x2] sm:$0x3] }
   0xc   : > { %v750_v1 = vsel %vm610_vm0, %v309_v0, 0  ;;  %v612_v3 = vsel %vm610_vm0, %v4157_v2, 0  ;;  %v4262_v4 = vld [vmem:[%s6507_s1 + $0x4] sm:$0x3]  ;;  %v4281_v5 = vld [vmem:[%s6507_s1 + $0x6] sm:$0x3] }
   0xd   : > { %4620 = vmatpush.bf16.msra.mxu3 %v750_v1  ;;  %s6532_s22 = smov (!%p257_p3, %s4149_s22), 1  ;;  %759 = vmatpush.bf16.msra.mxu1 %v750_v1  ;;  %v950_v6 = vsel %vm610_vm0, %v4262_v4, 0  ;;  %v1311_v7 = vsel %vm610_vm0, %v4281_v5, 0  ;;  %v4368_v8 = vld [vmem:[%s6507_s1 + $0x8] sm:$0x3]  ;;  %vm555_vm1 = vcmask 31744  }
   0xe   : > { %4619 = vmatpush.bf16.msra.mxu2 %v612_v3  ;;  %621 = vmatpush.bf16.msra.mxu0 %v612_v3  ;;  %s4621_s9 = smul.u32 172, %s6532_s22  ;;  %v1680_v9 = vsel %vm610_vm0, %v4368_v8, 0  ;;  %vm406_vm2 = vsmask.f32 7424  ;;  %vm1823_vm3 = vcmask 1045504   ;;  %vm857_vm4 = vcmask 1046528  }
   0xf   : > { %vm1454_vm5 = vsmask.f32 6400  ;;  %vm2420_vm6 = vsmask.f32 5376  ;;  %vm2789_vm7 = vcmask 1044480   ;;  %s4622_s29 = smul.u32 288, %s6532_s22 }
  0x10   : > { %s4795_s12 = scalar_lea.vmem %s6506_s0, %s4621_s9  ;;  %vm3133_vm8 = vcmask 261120   ;;  %s4723_s11 = smov 40   ;;  %vm3827_vm9 = vcmask 326912   ;;  %vm4008_vm10 = vcmask 392512   ;;  %vm4045_vm11 = vcmask 458112  }
  0x11   : > { %1320 = vmatpush.bf16.msrb.mxu3 %v1311_v7  ;;  %v4798_v10 = vld [vmem:[%s4795_s12 + $0x48] sm:$0xff]  ;;  %v4801_v11 = vld [vmem:[%s4795_s12 + $0x50] sm:$0xff]  ;;  %v4613_v12 = vld [vmem:[%s4795_s12] sm:$0xff]   ;;  %s5499_s8 = scalar_lea.vmem %s6512_s6, %s4622_s29  ;;  %s5885_s17 = scalar_lea.vmem %s6511_s5, %s4622_s29 }
  0x12   : > { %959 = vmatpush.bf16.msrb.mxu2 %v950_v6  ;;  %1689 = vmatpush.bf16.msrb.mxu0 %v1680_v9  ;;  %v4805_v13 = vld [vmem:[%s4795_s12 + $0x8] sm:$0xff]  ;;  %v408_v14 = vshrl.u32 %v4613_v12, 16  ;;  %v410_v15 = vshll.u32 %v4613_v12, 16  ;;  %v479_v16 = vshll.u32 %v4798_v10, 16  ;;  %v483_v17 = vshrl.u32 %v4798_v10, 16  ;;  %v4822_v28 = vld [vmem:[%s4795_s12 + $0x10] sm:$0xff] }
  0x13   : > { %4244 = vmatmul.msk.bf16.vlgmr.msra.gmra.mxu1 %vm555_vm1, %v4613_v12  ;;  %4253 = vmatmul.msk.bf16.vlgmr.msra.gmra.mxu3 %vm555_vm1, %v4798_v10  ;;  %v487_v18 = vshll.u32 %v4801_v11, 16  ;;  %v415_v20 = vshll.u32 %v4805_v13, 16  ;;  %v4825_v29 = vld [vmem:[%s4795_s12 + $0x58] sm:$0xff]  ;;  %v419_v30 = vshrl.u32 %v4805_v13, 16  ;;  %v423_v31 = vshll.u32 %v4822_v28, 16  ;;  %v4843_v41 = vld [vmem:[%s4795_s12 + $0x60] sm:$0xff] }
  0x14   : > { %v412_v19 = vrot.slane %v410_v15, 1  ;;  %v4814_v21 = vrot.slane %v479_v16, 1  ;;  %v491_v32 = vshrl.u32 %v4801_v11, 16  ;;  %v495_v33 = vshll.u32 %v4825_v29, 16  ;;  %v4840_v40 = vld [vmem:[%s4795_s12 + $0x18] sm:$0xff]  ;;  %v4858_v52 = vld [vmem:[%s4795_s12 + $0x20] sm:$0xff] }
  0x15   : > { %v489_v22 = vrot.slane %v487_v18, 1  ;;  %v417_v24 = vrot.slane %v415_v20, 1  ;;  %v425_v35 = vrot.slane %v423_v31, 1  ;;  %v427_v42 = vshrl.u32 %v4822_v28, 16  ;;  %v4571_v53 = vld [vmem:[%s4795_s12 + $0x68] sm:$0xff]  ;;  %v4572_v1 = vld [vmem:[%s4795_s12 + $0x70] sm:$0xff] }
  0x16   : > { %v413_v23 = vor.u32 %v412_v19, %v408_v14  ;;  %v485_v25 = vor.u32 %v483_v17, %v4814_v21  ;;  %v497_v37 = vrot.slane %v495_v33, 1  ;;  %v431_v43 = vshll.u32 %v4840_v40, 16  ;;  %v4873_v0 = vld [vmem:[%s4795_s12 + $0x28] sm:$0xff]  ;;  %v4886_v15 = vld [vmem:[%s4795_s12 + $0x30] sm:$0xff]  ;;  %v4573_v16 = vld [vmem:[%s4795_s12 + $0x78] sm:$0xff]  ;;  %s4725_s22 = smov 32  }
  0x17   : > { %v421_v34 = vor.u32 %v419_v30, %v417_v24  ;;  %v493_v36 = vor.u32 %v491_v32, %v489_v22  ;;  %v499_v44 = vshrl.u32 %v4825_v29, 16  ;;  %v503_v45 = vshll.u32 %v4843_v41, 16  ;;  %v4899_v30 = vld [vmem:[%s4795_s12 + $0x38] sm:$0xff]  ;;  %v4574_v31 = vld [vmem:[%s4795_s12 + $0x80] sm:$0xff] }
  0x18   : > { %v418_v26 = vsel %vm406_vm2, %v413_v23, %v417_v24  ;;  %v490_v27 = vsel %vm406_vm2, %v485_v25, %v489_v22  ;;  %v429_v46 = vor.u32 %v427_v42, %v425_v35  ;;  %v433_v47 = vrot.slane %v431_v43, 1 }
  0x19   : > { %4226 = vmatmul.msk.bf16.vlgmr.msra.gmra.mxu0 %vm555_vm1, %v418_v26  ;;  %4235 = vmatmul.msk.bf16.vlgmr.msra.gmra.mxu2 %vm555_vm1, %v490_v27  ;;  %v426_v38 = vsel %vm406_vm2, %v421_v34, %v425_v35  ;;  %v498_v39 = vsel %vm406_vm2, %v493_v36, %v497_v37  ;;  %v501_v48 = vor.u32 %v499_v44, %v497_v37  ;;  %v505_v49 = vrot.slane %v503_v45, 1  ;;  %v4912_v44 = vld [vmem:[%s4795_s12 + $0x40] sm:$0xff]  ;;  %v4575_v45 = vld [vmem:[%s4795_s12 + $0x88] sm:$0xff] }
  0x1a   : > { %v434_v50 = vsel %vm406_vm2, %v429_v46, %v433_v47  ;;  %v435_v54 = vshrl.u32 %v4840_v40, 16  ;;  %v439_v55 = vshll.u32 %v4858_v52, 16  ;;  %v507_v56 = vshrl.u32 %v4843_v41, 16 }
  0x1b   : > { %v506_v51 = vsel %vm406_vm2, %v501_v48, %v505_v49  ;;  %v511_v57 = vshll.u32 %v4571_v53, 16  ;;  %v443_v2 = vshrl.u32 %v4858_v52, 16  ;;  %v447_v3 = vshll.u32 %v4873_v0, 16 }
  0x1c   : > { %v437_v58 = vor.u32 %v435_v54, %v433_v47  ;;  %v441_v59 = vrot.slane %v439_v55, 1  ;;  %v509_v60 = vor.u32 %v507_v56, %v505_v49  ;;  %v515_v4 = vshrl.u32 %v4571_v53, 16  ;;  %v310_v55 = vld [vmem:[%s4795_s12 + $0x90] sm:$0x1] }
  0x1d   : > { %v513_v61 = vrot.slane %v511_v57, 1  ;;  %v519_v5 = vshll.u32 %v4572_v1, 16  ;;  %v449_v7 = vrot.slane %v447_v3, 1  ;;  %v451_v17 = vshrl.u32 %v4873_v0, 16 }
  0x1e   : > { %v442_v62 = vsel %vm406_vm2, %v437_v58, %v441_v59  ;;  %v445_v6 = vor.u32 %v443_v2, %v441_v59  ;;  %v455_v18 = vshll.u32 %v4886_v15, 16  ;;  %v523_v19 = vshrl.u32 %v4572_v1, 16  ;;  %v4406_v59 = vld [vmem:[%s6507_s1 + $0xc] sm:$0x3] }
  0x1f   : > { %v514_v63 = vsel %vm406_vm2, %v509_v60, %v513_v61  ;;  %v517_v8 = vor.u32 %v515_v4, %v513_v61  ;;  %v521_v9 = vrot.slane %v519_v5, 1  ;;  %v527_v20 = vshll.u32 %v4573_v16, 16  ;;  %v4493_v60 = vld [vmem:[%s6507_s1 + $0xe] sm:$0x3]  ;;  %v1087_v5 = vld [vmem:[%s4795_s12 + $0x8] sm:$0xe] }
  0x20   : > { %v450_v12 = vsel %vm406_vm2, %v445_v6, %v449_v7  ;;  %v453_v22 = vor.u32 %v451_v17, %v449_v7  ;;  %v457_v23 = vrot.slane %v455_v18, 1  ;;  %v459_v32 = vshrl.u32 %v4886_v15, 16  ;;  %v4387_v6 = vld [vmem:[%s6507_s1 + $0xa] sm:$0x3]  ;;  %v1088_v7 = vld [vmem:[%s4795_s12 + $0xc] sm:$0xf] }
  0x21   : > { %v522_v14 = vsel %vm406_vm2, %v517_v8, %v521_v9  ;;  %v525_v24 = vor.u32 %v523_v19, %v521_v9  ;;  %v529_v25 = vrot.slane %v527_v20, 1  ;;  %v463_v33 = vshll.u32 %v4899_v30, 16  ;;  %v1817_v9 = vld [vmem:[%s4795_s12 + $0x8] sm:$0xc]  ;;  %v4512_v19 = vld [vmem:[%s6507_s1 + $0x10] sm:$0x3] }
  0x22   : > { %v458_v26 = vsel %vm406_vm2, %v453_v22, %v457_v23  ;;  %v531_v34 = vshrl.u32 %v4573_v16, 16  ;;  %v535_v35 = vshll.u32 %v4574_v31, 16  ;;  %v461_v36 = vor.u32 %v459_v32, %v457_v23 }
  0x23   : > { %4245 = vmatmul.msk.bf16.gmra.mxu1 %vm555_vm1, %v4805_v13  ;;  %4254 = vmatmul.msk.bf16.gmra.mxu3 %vm555_vm1, %v4801_v11  ;;  %v530_v27 = vsel %vm406_vm2, %v525_v24, %v529_v25  ;;  %v465_v37 = vrot.slane %v463_v33, 1  ;;  %v467_v46 = vshrl.u32 %v4899_v30, 16  ;;  %v471_v47 = vshll.u32 %v4912_v44, 16 }
  0x24   : > { %v539_v48 = vshrl.u32 %v4574_v31, 16  ;;  %v543_v49 = vshll.u32 %v4575_v45, 16  ;;  %v386_v58 = vunpack.c.l.b16 %v310_v55  ;;  %v475_v2 = vshrl.u32 %v4912_v44, 16 }
  0x25   : > { %v466_v42 = vsel %vm406_vm2, %v461_v36, %v465_v37  ;;  %v1916_v8 = vsel %vm610_vm0, %v4387_v6, 0  ;;  %v1163_v17 = vunpack.c.l.b16 %v1087_v5  ;;  %v1164_v18 = vunpack.c.l.b16 %v1088_v7 }
  0x26   : > { %v545_v54 = vrot.slane %v543_v49, 1  ;;  %v4931_v61 = vpack.c.b16 %v386_v58, %v386_v58  ;;  %1925 = vmatpush.bf16.msrb.mxu1 %v1916_v8  ;;  %v1821_v20 = vunpack.c.l.b16 %v1817_v9  ;;  %v2882_v22 = vsel %vm610_vm0, %v4512_v19, 0 }
  0x27   : > { %2891 = vmatpush.bf16.msra.mxu0 %v2882_v22  ;;  %v1200_v32 = vpack.c.b16 %v1164_v18, %v1163_v17 }
  0x28   : > { %v551_v4 = vshll.u32 %v4931_v61, 16  ;;  %v1822_v33 = vpack.c.b16 %v1164_v18, %v1821_v20 }
  0x29   : > { %4227 = vmatmul.msk.bf16.gmra.mxu0 %vm555_vm1, %v426_v38  ;;  %4236 = vmatmul.msk.bf16.gmra.mxu2 %vm555_vm1, %v498_v39  ;;  %v533_v38 = vor.u32 %v531_v34, %v529_v25  ;;  %v537_v39 = vrot.slane %v535_v35, 1  ;;  %v4576_v34 = vld [vmem:[%s4795_s12 + $0x10] sm:$0xff]  ;;  %v1456_v35 = vshrl.u32 %v1200_v32, 16  ;;  %v1459_v36 = vshll.u32 %v1200_v32, 16 }
  0x2b   : > { %v538_v43 = vsel %vm406_vm2, %v533_v38, %v537_v39  ;;  %v1467_v38 = vshll.u32 %v4576_v34, 16 }
  0x2d   : > { %v1469_v55 = vrot.slane %v1467_v38, 2 }
  0x33   : > { %4246 = vmatmul.msk.bf16.gmra.mxu1 %vm555_vm1, %v4822_v28  ;;  %4255 = vmatmul.msk.bf16.gmra.mxu3 %vm555_vm1, %v4825_v29 }
  0x39   : > { %4228 = vmatmul.msk.bf16.gmra.mxu0 %vm555_vm1, %v434_v50  ;;  %4237 = vmatmul.msk.bf16.gmra.mxu2 %vm555_vm1, %v506_v51  ;;  %v469_v50 = vor.u32 %v467_v46, %v465_v37  ;;  %v473_v51 = vrot.slane %v471_v47, 1  ;;  %v1464_v37 = vshrl.u32 %v4576_v34, 16  ;;  %v4617_v46 = vld [vmem:[%s4795_s12] sm:$0xe] }
  0x3b   : > { %v474_v56 = vsel %vm406_vm2, %v469_v50, %v473_v51 }
  0x43   : > { %4247 = vmatmul.msk.bf16.gmra.mxu1 %vm555_vm1, %v4840_v40  ;;  %4256 = vmatmul.msk.bf16.gmra.mxu3 %vm555_vm1, %v4843_v41 }
  0x49   : > { %4229 = vmatmul.msk.bf16.gmra.mxu0 %vm555_vm1, %v442_v62  ;;  %4238 = vmatmul.msk.bf16.gmra.mxu2 %vm555_vm1, %v514_v63  ;;  %v2277_v62 = vsel %vm610_vm0, %v4406_v59, 0  ;;  %v2646_v63 = vsel %vm610_vm0, %v4493_v60, 0 }
  0x4a   : > { %2286 = vmatpush.bf16.msra.mxu2 %v2277_v62  ;;  %2655 = vmatpush.bf16.msra.mxu3 %v2646_v63 }
  0x53   : > { %4248 = vmatmul.msk.bf16.gmra.mxu1 %vm555_vm1, %v4858_v52  ;;  %4257 = vmatmul.msk.bf16.gmra.mxu3 %vm555_vm1, %v4571_v53  ;;  %v541_v53 = vor.u32 %v539_v48, %v537_v39  ;;  %v1219_v39 = vrot.slane %v1200_v32, 1  ;;  %v1458_v48 = vrot.slane %v1456_v35, 1  ;;  %v861_v35 = vrot.slane %v4822_v28, 1 }
  0x55   : > { %v546_v57 = vsel %vm406_vm2, %v541_v53, %v545_v54  ;;  %v1461_v53 = vrot.slane %v1459_v36, 2 }
  0x57   : > { %v1462_v62 = vor.u32 %v1461_v53, %v1458_v48 }
  0x59   : > { %4230 = vmatmul.msk.bf16.gmra.mxu0 %vm555_vm1, %v450_v12  ;;  %4239 = vmatmul.msk.bf16.gmra.mxu2 %vm555_vm1, %v522_v14  ;;  %v477_v14 = vor.u32 %v475_v2, %v473_v51  ;;  %v859_v2 = vrot.slane %v4805_v13, 1 }
  0x5b   : > { %v482_v25 = vsel %vm406_vm2, %v477_v14, %v4814_v21  ;;  %v1824_v21 = vrot.slane %v1822_v33, 2  ;;  %v4577_v14 = vld [vmem:[%s4795_s12 + $0x18] sm:$0xff] }
  0x5c   : > { %v1476_v13 = vshll.u32 %v4577_v14, 16  ;;  %v1827_v17 = vrot.slane %v4577_v14, 2  ;;  %v1222_v18 = vrot.slane %v4577_v14, 1 }
  0x63   : > { %4249 = vmatmul.msk.bf16.gmra.mxu1 %vm555_vm1, %v4873_v0  ;;  %4258 = vmatmul.msk.bf16.gmra.mxu3 %vm555_vm1, %v4572_v1  ;;  %v547_v1 = vshrl.u32 %v4575_v45, 16 }
  0x65   : > { %v549_v12 = vor.u32 %v547_v1, %v545_v54  ;;  %v1466_v54 = vrot.slane %v1464_v37, 1 }
  0x67   : > { %v1470_v63 = vor.u32 %v1469_v55, %v1466_v54 }
  0x69   : > { %4231 = vmatmul.msk.bf16.gmra.mxu0 %vm555_vm1, %v458_v26  ;;  %4240 = vmatmul.msk.bf16.gmra.mxu2 %vm555_vm1, %v530_v27  ;;  %v1471_v7 = vsel %vm1454_vm5, %v1462_v62, %v1470_v63 }
  0x73   : > { %4250 = vmatmul.msk.bf16.gmra.mxu1 %vm555_vm1, %v4886_v15  ;;  %4259 = vmatmul.msk.bf16.gmra.mxu3 %vm555_vm1, %v4573_v16  ;;  %v553_v16 = vrot.slane %v551_v4, 1 }
  0x75   : > { %v554_v27 = vsel %vm406_vm2, %v549_v12, %v553_v16  ;;  %v1473_v16 = vshrl.u32 %v4577_v14, 16 }
  0x79   : > { %4232 = vmatmul.msk.bf16.gmra.mxu0 %vm555_vm1, %v466_v42  ;;  %4241 = vmatmul.msk.bf16.gmra.mxu2 %vm555_vm1, %v538_v43  ;;  %v1825_v42 = vrot.slane %v4576_v34, 2  ;;  %v1220_v43 = vrot.slane %v4576_v34, 1 }
  0x7b   : > { %v1826_v59 = vsel %vm1823_vm3, %v1824_v21, %v1825_v42  ;;  %v1221_v60 = vsel %vm857_vm4, %v1219_v39, %v1220_v43  ;;  %v1828_v32 = vsel %vm1823_vm3, %v1825_v42, %v1827_v17  ;;  %v1223_v33 = vsel %vm857_vm4, %v1220_v43, %v1222_v18  ;;  %v4578_v43 = vld [vmem:[%s4795_s12 + $0x20] sm:$0xff] }
  0x7c   : > { %v862_v42 = vsel %vm857_vm4, %v859_v2, %v861_v35  ;;  %v1485_v48 = vshll.u32 %v4578_v43, 16  ;;  %v1829_v28 = vrot.slane %v4578_v43, 2 }
  0x7e   : > { %v1830_v62 = vsel %vm1823_vm3, %v1827_v17, %v1829_v28 }
  0x83   : > { %4251 = vmatmul.msk.bf16.gmra.mxu1 %vm555_vm1, %v4899_v30  ;;  %4260 = vmatmul.msk.bf16.gmra.mxu3 %vm555_vm1, %v4574_v31 }
  0x89   : > { %4233 = vmatmul.msk.bf16.gmra.mxu0 %vm555_vm1, %v474_v56  ;;  %4242 = vmatmul.msk.bf16.gmra.mxu2 %vm555_vm1, %v546_v57 }
  0x90   : > { %v761_v3 = vpop.f32.mrf.mxu1 }
  0x93   : > { %4252 = vmatmul.msk.bf16.gmra.mxu1 %vm555_vm1, %v4912_v44  ;;  %4261 = vmatmul.msk.bf16.gmra.mxu3 %vm555_vm1, %v4575_v45  ;;  %v4616_v45 = vld [vmem:[%s4795_s12] sm:$0xf0] }
  0x94   : > { %v4618_v58 = vor.u32 %v4617_v46, %v4616_v45 }
  0x96   : > { %v806_v23 = vpop.f32.mrf.mxu3  ;;  %v623_v24 = vpop.f32.mrf.mxu0  ;;  %v858_v1 = vrot.slane %v4618_v58, 1  ;;  %v1487_v58 = vrot.slane %v1485_v48, 2 }
  0x97   : > { %v4953_v26 = vadd.f32 %v761_v3, %v623_v24  ;;  %v1475_v24 = vrot.slane %v1473_v16, 1 }
  0x98   : > { %v763_v31 = vpop.f32.mrf.mxu1  ;;  %v860_v9 = vsel %vm857_vm4, %v858_v1, %v859_v2  ;;  %v863_v2 = vrot.slane %v4840_v40, 1 }
  0x99   : > { %4234 = vmatmul.msk.bf16.gmra.mxu0 %vm555_vm1, %v482_v25  ;;  %4243 = vmatmul.msk.bf16.gmra.mxu2 %vm555_vm1, %v554_v27  ;;  %v1478_v25 = vrot.slane %v1476_v13, 2  ;;  %v4579_v13 = vld [vmem:[%s4795_s12 + $0x28] sm:$0xff] }
  0x9a   : > { %v864_v14 = vsel %vm857_vm4, %v861_v35, %v863_v2  ;;  %v1491_v17 = vshrl.u32 %v4579_v13, 16  ;;  %v1831_v40 = vrot.slane %v4579_v13, 2 }
  0x9b   : > { %v1479_v34 = vor.u32 %v1478_v25, %v1475_v24 }
  0x9c   : > { %v668_v47 = vpop.f32.mrf.mxu2  ;;  %v1832_v35 = vsel %vm1823_vm3, %v1829_v28, %v1831_v40 }
  0x9d   : > { %v4961_v49 = vadd.f32 %v806_v23, %v668_v47  ;;  %v1480_v21 = vsel %vm1454_vm5, %v1470_v63, %v1479_v34  ;;  %v1482_v47 = vshrl.u32 %v4578_v43, 16 }
  0x9e   : > { %v808_v50 = vpop.f32.mrf.mxu3  ;;  %v625_v51 = vpop.f32.mrf.mxu0 }
  0x9f   : > { %v4963_v56 = vadd.f32 %v763_v31, %v625_v51 }
  0xa0   : > { %v766_v57 = vpop.f32.mrf.mxu1 }
  0xa3   : > { %4388 = vmatmul.msk.bf16.vlgmr.msrb.gmra.mxu1 %vm555_vm1, %v1826_v59  ;;  %4350 = vmatmul.msk.bf16.vlgmr.msrb.gmra.mxu3 %vm555_vm1, %v1221_v60 }
  0xa4   : > { %v670_v3 = vpop.f32.mrf.mxu2 }
  0xa5   : > { %v4970_v4 = vadd.f32 %v808_v50, %v670_v3  ;;  %v1224_v50 = vrot.slane %v4578_v43, 1 }
  0xa6   : > { %v811_v5 = vpop.f32.mrf.mxu3  ;;  %v628_v6 = vpop.f32.mrf.mxu0 }
  0xa7   : > { %v4973_v8 = vadd.f32 %v766_v57, %v628_v6  ;;  %v1484_v57 = vrot.slane %v1482_v47, 1  ;;  %v1225_v63 = vsel %vm857_vm4, %v1222_v18, %v1224_v50  ;;  %v1494_v18 = vshll.u32 %v4579_v13, 16 }
  0xa8   : > { %v768_v12 = vpop.f32.mrf.mxu1 }
  0xa9   : > { %4369 = vmatmul.msk.bf16.vlgmr.msrb.gmra.mxu0 %vm555_vm1, %v1471_v7  ;;  %4263 = vmatmul.msk.bf16.vlgmr.msrb.gmra.mxu2 %vm555_vm1, %v860_v9  ;;  %v1488_v1 = vor.u32 %v1487_v58, %v1484_v57 }
  0xab   : > { %v1489_v9 = vsel %vm1454_vm5, %v1479_v34, %v1488_v1 }
  0xac   : > { %v673_v19 = vpop.f32.mrf.mxu2 }
  0xad   : > { %v4979_v20 = vadd.f32 %v811_v5, %v673_v19  ;;  %v1226_v19 = vrot.slane %v4579_v13, 1 }
  0xae   : > { %v813_v22 = vpop.f32.mrf.mxu3  ;;  %v630_v23 = vpop.f32.mrf.mxu0 }
  0xaf   : > { %v4981_v27 = vadd.f32 %v768_v12, %v630_v23 }
  0xb0   : > { %v771_v31 = vpop.f32.mrf.mxu1 }
  0xb3   : > { %4389 = vmatmul.msk.bf16.gmra.mxu1 %vm555_vm1, %v1828_v32  ;;  %4351 = vmatmul.msk.bf16.gmra.mxu3 %vm555_vm1, %v1223_v33  ;;  %v1496_v32 = vrot.slane %v1494_v18, 2 }
  0xb4   : > { %v675_v36 = vpop.f32.mrf.mxu2 }
  0xb5   : > { %v4988_v37 = vadd.f32 %v813_v22, %v675_v36  ;;  %v1227_v36 = vsel %vm857_vm4, %v1224_v50, %v1226_v19  ;;  %v4580_v50 = vld [vmem:[%s4795_s12 + $0x30] sm:$0xff] }
  0xb6   : > { %v816_v38 = vpop.f32.mrf.mxu3  ;;  %v633_v39 = vpop.f32.mrf.mxu0  ;;  %v1228_v57 = vrot.slane %v4580_v50, 1 }
  0xb7   : > { %v4991_v45 = vadd.f32 %v771_v31, %v633_v39  ;;  %v1493_v31 = vrot.slane %v1491_v17, 1  ;;  %v865_v39 = vrot.slane %v4858_v52, 1  ;;  %v1833_v52 = vrot.slane %v4580_v50, 2 }
  0xb8   : > { %v773_v46 = vpop.f32.mrf.mxu1 }
  0xb9   : > { %4370 = vmatmul.msk.bf16.gmra.mxu0 %vm555_vm1, %v1480_v21  ;;  %4264 = vmatmul.msk.bf16.gmra.mxu2 %vm555_vm1, %v862_v42  ;;  %v866_v28 = vsel %vm857_vm4, %v863_v2, %v865_v39 }
  0xbc   : > { %v678_v51 = vpop.f32.mrf.mxu2 }
  0xbd   : > { %v4997_v53 = vadd.f32 %v816_v38, %v678_v51  ;;  %v1497_v38 = vor.u32 %v1496_v32, %v1493_v31 }
  0xbe   : > { %v818_v54 = vpop.f32.mrf.mxu3  ;;  %v635_v55 = vpop.f32.mrf.mxu0 }
  0xbf   : > { %v4999_v59 = vadd.f32 %v773_v46, %v635_v55  ;;  %v1498_v47 = vsel %vm1454_vm5, %v1488_v1, %v1497_v38  ;;  %v1503_v55 = vshll.u32 %v4580_v50, 16 }
  0xc0   : > { %v776_v60 = vpop.f32.mrf.mxu1 }
  0xc3   : > { %4390 = vmatmul.msk.bf16.gmra.mxu1 %vm555_vm1, %v1830_v62  ;;  %4352 = vmatmul.msk.bf16.gmra.mxu3 %vm555_vm1, %v1225_v63 }
  0xc4   : > { %v680_v3 = vpop.f32.mrf.mxu2 }
  0xc5   : > { %v5006_v5 = vadd.f32 %v818_v54, %v680_v3  ;;  %v1500_v54 = vshrl.u32 %v4580_v50, 16  ;;  %v1505_v3 = vrot.slane %v1503_v55, 2  ;;  %v869_v55 = vrot.slane %v4886_v15, 1 }
  0xc6   : > { %v821_v6 = vpop.f32.mrf.mxu3  ;;  %v638_v7 = vpop.f32.mrf.mxu0 }
  0xc7   : > { %v5009_v12 = vadd.f32 %v776_v60, %v638_v7  ;;  %v1502_v1 = vrot.slane %v1500_v54, 1  ;;  %v1834_v7 = vsel %vm1823_vm3, %v1831_v40, %v1833_v52 }
  0xc8   : > { %v778_v16 = vpop.f32.mrf.mxu1 }
  0xc9   : > { %4371 = vmatmul.msk.bf16.gmra.mxu0 %vm555_vm1, %v1489_v9  ;;  %4265 = vmatmul.msk.bf16.gmra.mxu2 %vm555_vm1, %v864_v14  ;;  %v1229_v9 = vsel %vm857_vm4, %v1226_v19, %v1228_v57  ;;  %v1506_v14 = vor.u32 %v1505_v3, %v1502_v1  ;;  %v4581_v19 = vld [vmem:[%s4795_s12 + $0x38] sm:$0xff] }
  0xca   : > { %v1509_v32 = vshrl.u32 %v4581_v19, 16 }
  0xcc   : > { %v683_v22 = vpop.f32.mrf.mxu2 }
  0xcd   : > { %v5015_v23 = vadd.f32 %v821_v6, %v683_v22 }
  0xce   : > { %v823_v24 = vpop.f32.mrf.mxu3  ;;  %v640_v25 = vpop.f32.mrf.mxu0 }
  0xcf   : > { %v5017_v33 = vadd.f32 %v778_v16, %v640_v25  ;;  %v867_v16 = vrot.slane %v4873_v0, 1  ;;  %v1835_v0 = vrot.slane %v4581_v19, 2 }
  0xd0   : > { %v781_v34 = vpop.f32.mrf.mxu1 }
  0xd1   : > { %v868_v40 = vsel %vm857_vm4, %v865_v39, %v867_v16 }
  0xd3   : > { %4391 = vmatmul.msk.bf16.gmra.mxu1 %vm555_vm1, %v1832_v35  ;;  %4353 = vmatmul.msk.bf16.gmra.mxu3 %vm555_vm1, %v1227_v36  ;;  %v1230_v35 = vrot.slane %v4581_v19, 1 }
  0xd4   : > { %v685_v21 = vpop.f32.mrf.mxu2 }
  0xd5   : > { %v5024_v42 = vadd.f32 %v823_v24, %v685_v21  ;;  %v1507_v24 = vsel %vm1454_vm5, %v1497_v38, %v1506_v14  ;;  %v1511_v38 = vrot.slane %v1509_v32, 1  ;;  %v1231_v50 = vsel %vm857_vm4, %v1228_v57, %v1230_v35  ;;  %v4582_v57 = vld [vmem:[%s4795_s12 + $0x40] sm:$0xff] }
  0xd6   : > { %v826_v46 = vpop.f32.mrf.mxu3  ;;  %v643_v43 = vpop.f32.mrf.mxu0  ;;  %v1837_v15 = vrot.slane %v4582_v57, 2 }
  0xd7   : > { %v5027_v48 = vadd.f32 %v781_v34, %v643_v43  ;;  %v1512_v34 = vshll.u32 %v4581_v19, 16 }
  0xd8   : > { %v783_v51 = vpop.f32.mrf.mxu1 }
  0xd9   : > { %4372 = vmatmul.msk.bf16.gmra.mxu0 %vm555_vm1, %v1498_v47  ;;  %4266 = vmatmul.msk.bf16.gmra.mxu2 %vm555_vm1, %v866_v28  ;;  %v1514_v47 = vrot.slane %v1512_v34, 2  ;;  %v1838_v34 = vsel %vm1823_vm3, %v1835_v0, %v1837_v15 }
  0xdb   : > { %v1515_v54 = vor.u32 %v1514_v47, %v1511_v38 }
  0xdc   : > { %v688_v58 = vpop.f32.mrf.mxu2 }
  0xdd   : > { %v5033_v60 = vadd.f32 %v826_v46, %v688_v58  ;;  %v1516_v3 = vsel %vm1454_vm5, %v1506_v14, %v1515_v54 }
  0xde   : > { %v828_v62 = vpop.f32.mrf.mxu3  ;;  %v645_v63 = vpop.f32.mrf.mxu0 }
  0xdf   : > { %v5035_v6 = vadd.f32 %v783_v51, %v645_v63  ;;  %v1836_v51 = vsel %vm1823_vm3, %v1833_v52, %v1835_v0  ;;  %v870_v52 = vsel %vm857_vm4, %v867_v16, %v869_v55 }
  0xe0   : > { %v786_v2 = vpop.f32.mrf.mxu1 }
  0xe3   : > { %4392 = vmatmul.msk.bf16.gmra.mxu1 %vm555_vm1, %v1834_v7  ;;  %4354 = vmatmul.msk.bf16.gmra.mxu3 %vm555_vm1, %v1229_v9  ;;  %v1518_v9 = vshrl.u32 %v4582_v57, 16 }
  0xe4   : > { %v690_v13 = vpop.f32.mrf.mxu2 }
  0xe5   : > { %v5042_v17 = vadd.f32 %v828_v62, %v690_v13  ;;  %v1521_v13 = vshll.u32 %v4582_v57, 16  ;;  %v1520_v14 = vrot.slane %v1518_v9, 1 }
  0xe6   : > { %v831_v18 = vpop.f32.mrf.mxu3  ;;  %v648_v22 = vpop.f32.mrf.mxu0 }
  0xe7   : > { %v5045_v25 = vadd.f32 %v786_v2, %v648_v22  ;;  %v1523_v19 = vrot.slane %v1521_v13, 2 }
  0xe8   : > { %v788_v31 = vpop.f32.mrf.mxu1 }
  0xe9   : > { %4373 = vmatmul.msk.bf16.gmra.mxu0 %vm555_vm1, %v1507_v24  ;;  %4267 = vmatmul.msk.bf16.gmra.mxu2 %vm555_vm1, %v868_v40 }
  0xec   : > { %v693_v36 = vpop.f32.mrf.mxu2 }
  0xed   : > { %v5051_v21 = vadd.f32 %v831_v18, %v693_v36  ;;  %v1232_v18 = vrot.slane %v4582_v57, 1 }
  0xee   : > { %v833_v46 = vpop.f32.mrf.mxu3  ;;  %v650_v43 = vpop.f32.mrf.mxu0 }
  0xef   : > { %v5053_v28 = vadd.f32 %v788_v31, %v650_v43  ;;  %v1233_v36 = vsel %vm857_vm4, %v1230_v35, %v1232_v18  ;;  %v871_v43 = vrot.slane %v4899_v30, 1  ;;  %v4583_v35 = vld [vmem:[%s4795_s12 + $0x48] sm:$0xff] }
  0xf0   : > { %v791_v39 = vpop.f32.mrf.mxu1  ;;  %v1839_v30 = vrot.slane %v4583_v35, 2 }
  0xf1   : > { %v872_v0 = vsel %vm857_vm4, %v869_v55, %v871_v43 }
  0xf3   : > { %4393 = vmatmul.msk.bf16.gmra.mxu1 %vm555_vm1, %v1836_v51  ;;  %4355 = vmatmul.msk.bf16.gmra.mxu3 %vm555_vm1, %v1231_v50 }
  0xf4   : > { %v695_v58 = vpop.f32.mrf.mxu2 }
  0xf5   : > { %v5060_v62 = vadd.f32 %v833_v46, %v695_v58  ;;  %v1524_v46 = vor.u32 %v1523_v19, %v1520_v14 }
  0xf6   : > { %v836_v63 = vpop.f32.mrf.mxu3  ;;  %v653_v1 = vpop.f32.mrf.mxu0 }
  0xf7   : > { %v5063_v2 = vadd.f32 %v791_v39, %v653_v1  ;;  %v1525_v50 = vsel %vm1454_vm5, %v1515_v54, %v1524_v46  ;;  %v1527_v1 = vshrl.u32 %v4583_v35, 16 }
  0xf8   : > { %v793_v7 = vpop.f32.mrf.mxu1 }
  0xf9   : > { %4374 = vmatmul.msk.bf16.gmra.mxu0 %vm555_vm1, %v1516_v3  ;;  %4268 = vmatmul.msk.bf16.gmra.mxu2 %vm555_vm1, %v870_v52  ;;  %v1530_v3 = vshll.u32 %v4583_v35, 16  ;;  %v1234_v52 = vrot.slane %v4583_v35, 1  ;;  %v1529_v54 = vrot.slane %v1527_v1, 1 }
  0xfb   : > { %v1235_v14 = vsel %vm857_vm4, %v1232_v18, %v1234_v52  ;;  %v4584_v18 = vld [vmem:[%s4795_s12 + $0x50] sm:$0xff] }
  0xfc   : > { %v698_v22 = vpop.f32.mrf.mxu2  ;;  %v1539_v35 = vshll.u32 %v4584_v18, 16  ;;  %v1236_v1 = vrot.slane %v4584_v18, 1 }
  0xfd   : > { %v5069_v24 = vadd.f32 %v836_v63, %v698_v22  ;;  %v1532_v22 = vrot.slane %v1530_v3, 2 }
  0xfe   : > { %v838_v40 = vpop.f32.mrf.mxu3  ;;  %v655_v31 = vpop.f32.mrf.mxu0 }
  0xff   : > { %v5071_v32 = vadd.f32 %v793_v7, %v655_v31  ;;  %v1840_v31 = vsel %vm1823_vm3, %v1837_v15, %v1839_v30  ;;  %v1533_v19 = vor.u32 %v1532_v22, %v1529_v54  ;;  %v1541_v54 = vrot.slane %v1539_v35, 2 }
 0x100   : > { %v796_v16 = vpop.f32.mrf.mxu1 }
 0x103   : > { %4394 = vmatmul.msk.bf16.gmra.mxu1 %vm555_vm1, %v1838_v34  ;;  %4356 = vmatmul.msk.bf16.gmra.mxu3 %vm555_vm1, %v1233_v36 }
 0x104   : > { %v700_v38 = vpop.f32.mrf.mxu2 }
 0x105   : > { %v5078_v47 = vadd.f32 %v838_v40, %v700_v38 }
 0x106   : > { %v841_v39 = vpop.f32.mrf.mxu3  ;;  %v658_v51 = vpop.f32.mrf.mxu0 }
 0x107   : > { %v5081_v58 = vadd.f32 %v796_v16, %v658_v51  ;;  %v873_v16 = vrot.slane %v4912_v44, 1  ;;  %v1534_v51 = vsel %vm1454_vm5, %v1524_v46, %v1533_v19  ;;  %v1841_v44 = vrot.slane %v4584_v18, 2 }
 0x108   : > { %v798_v63 = vpop.f32.mrf.mxu1 }
 0x109   : > { %4375 = vmatmul.msk.bf16.gmra.mxu0 %vm555_vm1, %v1525_v50  ;;  %4269 = vmatmul.msk.bf16.gmra.mxu2 %vm555_vm1, %v872_v0  ;;  %v874_v15 = vsel %vm857_vm4, %v871_v43, %v873_v16 }
 0x10c   : > { %v703_v7 = vpop.f32.mrf.mxu2 }
 0x10d   : > { %v5087_v57 = vadd.f32 %v841_v39, %v703_v7 }
 0x10e   : > { %v843_v9 = vpop.f32.mrf.mxu3  ;;  %v660_v13 = vpop.f32.mrf.mxu0 }
 0x10f   : > { %v5089_v40 = vadd.f32 %v798_v63, %v660_v13  ;;  %v1536_v63 = vshrl.u32 %v4584_v18, 16 }
 0x110   : > { %v801_v55 = vpop.f32.mrf.mxu1 }
 0x111   : > { %v1538_v46 = vrot.slane %v1536_v63, 1  ;;  %v4585_v63 = vld [vmem:[%s4795_s12 + $0x58] sm:$0xff] }
 0x112   : > { %v1545_v35 = vshrl.u32 %v4585_v63, 16 }
 0x113   : > { %4395 = vmatmul.msk.bf16.gmra.mxu1 %vm555_vm1, %v1840_v31  ;;  %4357 = vmatmul.msk.bf16.gmra.mxu3 %vm555_vm1, %v1235_v14  ;;  %v1237_v31 = vsel %vm857_vm4, %v1234_v52, %v1236_v1  ;;  %v4611_v14 = vld [vmem:[%s6509_s3 + $0x8] sm:$0xff] }
 0x114   : > { %v705_v34 = vpop.f32.mrf.mxu2  ;;  %3194 = vmatpush.bf16.msra.mxu1 %v4611_v14 }
 0x115   : > { %v5096_v36 = vadd.f32 %v843_v9, %v705_v34  ;;  %v1542_v34 = vor.u32 %v1541_v54, %v1538_v46 }
 0x116   : > { %v846_v38 = vpop.f32.mrf.mxu3  ;;  %v663_v39 = vpop.f32.mrf.mxu0 }
 0x117   : > { %v5099_v50 = vadd.f32 %v801_v55, %v663_v39  ;;  %v1842_v55 = vsel %vm1823_vm3, %v1839_v30, %v1841_v44  ;;  %v1543_v30 = vsel %vm1454_vm5, %v1533_v19, %v1542_v34 }
 0x118   : > { %v803_v0 = vpop.f32.mrf.mxu1 }
 0x119   : > { %4376 = vmatmul.msk.bf16.gmra.mxu0 %vm555_vm1, %v1534_v51  ;;  %4270 = vmatmul.msk.bf16.gmra.mxu2 %vm555_vm1, %v874_v15 }
 0x11c   : > { %v708_v3 = vpop.f32.mrf.mxu2 }
 0x11d   : > { %v5105_v7 = vadd.f32 %v846_v38, %v708_v3  ;;  %v875_v38 = vrot.slane %v4798_v10, 1  ;;  %v1548_v3 = vshll.u32 %v4585_v63, 16  ;;  %v1238_v10 = vrot.slane %v4585_v63, 1 }
 0x11e   : > { %v848_v9 = vpop.f32.mrf.mxu3  ;;  %v665_v13 = vpop.f32.mrf.mxu0 }
 0x11f   : > { %6513 = vst [vmem:[#allocation2_spill] sm:$0xff] %v5105_v7  ;;  %v5107_v22 = vadd.f32 %v803_v0, %v665_v13  ;;  %v876_v52 = vsel %vm857_vm4, %v873_v16, %v875_v38  ;;  %v1843_v13 = vrot.slane %v4585_v63, 2  ;;  %v1550_v14 = vrot.slane %v1548_v3, 2 }
 0x120   : > { %v1927_v43 = vpop.f32.mrf.mxu1  ;;  %v877_v63 = vrot.slane %v4801_v11, 1 }
 0x121   : > { %v1844_v16 = vsel %vm1823_vm3, %v1841_v44, %v1843_v13 }
 0x123   : > { %4396 = vmatmul.msk.bf16.gmra.mxu1 %vm555_vm1, %v1842_v55  ;;  %4358 = vmatmul.msk.bf16.gmra.mxu3 %vm555_vm1, %v1237_v31  ;;  %v1547_v31 = vrot.slane %v1545_v35, 1 }
 0x124   : > { %v710_v39 = vpop.f32.mrf.mxu2 }
 0x125   : > { %v5117_v51 = vadd.f32 %v848_v9, %v710_v39 }
 0x126   : > { %v1322_v15 = vpop.f32.mrf.mxu3  ;;  %v1691_v0 = vpop.f32.mrf.mxu0 }
 0x127   : > { %6514 = vst [vmem:[#allocation3_spill] sm:$0xff] %v5117_v51 }
 0x128   : > { %v1929_v18 = vpop.f32.mrf.mxu1 }
 0x129   : > { %4377 = vmatmul.msk.bf16.gmra.mxu0 %vm555_vm1, %v1543_v30  ;;  %4271 = vmatmul.msk.bf16.gmra.mxu2 %vm555_vm1, %v876_v52  ;;  %v1239_v30 = vsel %vm857_vm4, %v1236_v1, %v1238_v10  ;;  %v1551_v52 = vor.u32 %v1550_v14, %v1547_v31 }
 0x12b   : > { %v1552_v44 = vsel %vm1454_vm5, %v1542_v34, %v1551_v52 }
 0x12c   : > { %v961_v46 = vpop.f32.mrf.mxu2 }
 0x12d   : > { %v1051_v9 = vadd.f32 %v961_v46, %v4953_v26 }
 0x12e   : > { %v1324_v54 = vpop.f32.mrf.mxu3  ;;  %v1693_v55 = vpop.f32.mrf.mxu0 }
 0x12f   : > { %v1412_v39 = vadd.f32 %v1322_v15, %v1051_v9  ;;  %v878_v15 = vsel %vm857_vm4, %v875_v38, %v877_v63  ;;  %v4586_v9 = vld [vmem:[%s4795_s12 + $0x60] sm:$0xff] }
 0x130   : > { %v1932_v19 = vpop.f32.mrf.mxu1  ;;  %v1554_v11 = vshrl.u32 %v4586_v9, 16 }
 0x131   : > { %v1781_v51 = vadd.f32 %v1691_v0, %v1412_v39 }
 0x132   : > { %v1556_v38 = vrot.slane %v1554_v11, 1 }
 0x133   : > { %4397 = vmatmul.msk.bf16.gmra.mxu1 %vm555_vm1, %v1844_v16  ;;  %4359 = vmatmul.msk.bf16.gmra.mxu3 %vm555_vm1, %v1239_v30  ;;  %v5130_v26 = vadd.f32 %v1927_v43, %v1781_v51  ;;  %v1557_v43 = vshll.u32 %v4586_v9, 16  ;;  %v1845_v51 = vrot.slane %v4586_v9, 2 }
 0x134   : > { %v963_v46 = vpop.f32.mrf.mxu2 }
 0x135   : > { %v1052_v35 = vadd.f32 %v963_v46, %v4963_v56  ;;  %v1240_v56 = vrot.slane %v4586_v9, 1  ;;  %v1559_v46 = vrot.slane %v1557_v43, 2 }
 0x136   : > { %v1327_v3 = vpop.f32.mrf.mxu3  ;;  %v1696_v7 = vpop.f32.mrf.mxu0 }
 0x137   : > { %v1413_v0 = vadd.f32 %v1324_v54, %v1052_v35  ;;  %v1846_v35 = vsel %vm1823_vm3, %v1843_v13, %v1845_v51 }
 0x138   : > { %v1934_v1 = vpop.f32.mrf.mxu1 }
 0x139   : > { %4378 = vmatmul.msk.bf16.gmra.mxu0 %vm555_vm1, %v1552_v44  ;;  %4272 = vmatmul.msk.bf16.gmra.mxu2 %vm555_vm1, %v878_v15  ;;  %v1782_v31 = vadd.f32 %v1693_v55, %v1413_v0  ;;  %v1241_v55 = vsel %vm857_vm4, %v1238_v10, %v1240_v56  ;;  %v1560_v0 = vor.u32 %v1559_v46, %v1556_v38 }
 0x13b   : > { %v5138_v14 = vadd.f32 %v1929_v18, %v1782_v31  ;;  %v879_v18 = vrot.slane %v4825_v29, 1  ;;  %v1561_v13 = vsel %vm1454_vm5, %v1551_v52, %v1560_v0 }
 0x13c   : > { %v966_v16 = vpop.f32.mrf.mxu2 }
 0x13d   : > { %v1053_v39 = vadd.f32 %v966_v16, %v4973_v8  ;;  %v4587_v16 = vld [vmem:[%s4795_s12 + $0x68] sm:$0xff] }
 0x13e   : > { %v1329_v34 = vpop.f32.mrf.mxu3  ;;  %v1698_v30 = vpop.f32.mrf.mxu0  ;;  %v1563_v29 = vshrl.u32 %v4587_v16, 16  ;;  %v1847_v38 = vrot.slane %v4587_v16, 2 }
 0x13f   : > { %v1414_v44 = vadd.f32 %v1327_v3, %v1053_v39  ;;  %v880_v3 = vsel %vm857_vm4, %v877_v63, %v879_v18 }
 0x140   : > { %v1937_v54 = vpop.f32.mrf.mxu1  ;;  %v1565_v63 = vrot.slane %v1563_v29, 1 }
 0x141   : > { %v1783_v15 = vadd.f32 %v1696_v7, %v1414_v44 }
 0x143   : > { %4398 = vmatmul.msk.bf16.gmra.mxu1 %vm555_vm1, %v1846_v35  ;;  %4360 = vmatmul.msk.bf16.gmra.mxu3 %vm555_vm1, %v1241_v55  ;;  %v5146_v8 = vadd.f32 %v1932_v19, %v1783_v15  ;;  %v1566_v19 = vshll.u32 %v4587_v16, 16 }
 0x144   : > { %v968_v9 = vpop.f32.mrf.mxu2 }
 0x145   : > { %v1054_v31 = vadd.f32 %v968_v9, %v4981_v27  ;;  %v1242_v27 = vrot.slane %v4587_v16, 1  ;;  %v1568_v15 = vrot.slane %v1566_v19, 2  ;;  %v1848_v9 = vsel %vm1823_vm3, %v1845_v51, %v1847_v38  ;;  %v4588_v19 = vld [vmem:[%s4795_s12 + $0x70] sm:$0xff] }
 0x146   : > { %v1332_v11 = vpop.f32.mrf.mxu3  ;;  %v1701_v43 = vpop.f32.mrf.mxu0 }
 0x147   : > { %v1415_v7 = vadd.f32 %v1329_v34, %v1054_v31 }
 0x148   : > { %v1939_v10 = vpop.f32.mrf.mxu1 }
 0x149   : > { %4379 = vmatmul.msk.bf16.gmra.mxu0 %vm555_vm1, %v1561_v13  ;;  %4273 = vmatmul.msk.bf16.gmra.mxu2 %vm555_vm1, %v880_v3  ;;  %v1784_v39 = vadd.f32 %v1698_v30, %v1415_v7  ;;  %v1243_v30 = vsel %vm857_vm4, %v1240_v56, %v1242_v27  ;;  %v1569_v3 = vor.u32 %v1568_v15, %v1565_v63 }
 0x14b   : > { %v5154_v46 = vadd.f32 %v1934_v1, %v1784_v39  ;;  %v881_v1 = vrot.slane %v4843_v41, 1  ;;  %v1570_v51 = vsel %vm1454_vm5, %v1560_v0, %v1569_v3  ;;  %v1572_v41 = vshrl.u32 %v4588_v19, 16 }
 0x14c   : > { %v971_v35 = vpop.f32.mrf.mxu2 }
 0x14d   : > { %v1055_v44 = vadd.f32 %v971_v35, %v4991_v45 }
 0x14e   : > { %v1334_v52 = vpop.f32.mrf.mxu3  ;;  %v1703_v55 = vpop.f32.mrf.mxu0 }
 0x14f   : > { %v1416_v31 = vadd.f32 %v1332_v11, %v1055_v44  ;;  %v882_v11 = vsel %vm857_vm4, %v879_v18, %v881_v1  ;;  %v1849_v44 = vrot.slane %v4588_v19, 2 }
 0x150   : > { %v1942_v34 = vpop.f32.mrf.mxu1 }
 0x151   : > { %v1785_v13 = vadd.f32 %v1701_v43, %v1416_v31  ;;  %v1574_v31 = vrot.slane %v1572_v41, 1 }
 0x153   : > { %4399 = vmatmul.msk.bf16.gmra.mxu1 %vm555_vm1, %v1848_v9  ;;  %4361 = vmatmul.msk.bf16.gmra.mxu3 %vm555_vm1, %v1243_v30  ;;  %v5162_v45 = vadd.f32 %v1937_v54, %v1785_v13  ;;  %v1575_v54 = vshll.u32 %v4588_v19, 16  ;;  %v1850_v13 = vsel %vm1823_vm3, %v1847_v38, %v1849_v44 }
 0x154   : > { %v973_v7 = vpop.f32.mrf.mxu2 }
 0x155   : > { %v1056_v16 = vadd.f32 %v973_v7, %v4999_v59  ;;  %v1244_v59 = vrot.slane %v4588_v19, 1 }
 0x156   : > { %v1337_v39 = vpop.f32.mrf.mxu3  ;;  %v1706_v29 = vpop.f32.mrf.mxu0 }
 0x157   : > { %v1417_v43 = vadd.f32 %v1334_v52, %v1056_v16  ;;  %v1577_v52 = vrot.slane %v1575_v54, 2  ;;  %v4589_v54 = vld [vmem:[%s4795_s12 + $0x78] sm:$0xff] }
 0x158   : > { %v1944_v56 = vpop.f32.mrf.mxu1 }
 0x159   : > { %4380 = vmatmul.msk.bf16.gmra.mxu0 %vm555_vm1, %v1570_v51  ;;  %4274 = vmatmul.msk.bf16.gmra.mxu2 %vm555_vm1, %v882_v11  ;;  %v1786_v35 = vadd.f32 %v1703_v55, %v1417_v43  ;;  %v1245_v55 = vsel %vm857_vm4, %v1242_v27, %v1244_v59  ;;  %v1578_v51 = vor.u32 %v1577_v52, %v1574_v31  ;;  %v1851_v31 = vrot.slane %v4589_v54, 2 }
 0x15b   : > { %v5170_v63 = vadd.f32 %v1939_v10, %v1786_v35  ;;  %v4708_v10 = vld [vmem:[%s4795_s12 + $0x68] sm:$0xff]  ;;  %v1579_v38 = vsel %vm1454_vm5, %v1569_v3, %v1578_v51 }
 0x15c   : > { %v976_v15 = vpop.f32.mrf.mxu2  ;;  %v883_v11 = vrot.slane %v4708_v10, 1  ;;  %v1852_v10 = vsel %vm1823_vm3, %v1849_v44, %v1851_v31 }
 0x15d   : > { %v1057_v0 = vadd.f32 %v976_v15, %v5009_v12 }
 0x15e   : > { %v1339_v9 = vpop.f32.mrf.mxu3  ;;  %v1708_v18 = vpop.f32.mrf.mxu0  ;;  %v884_v27 = vsel %vm857_vm4, %v881_v1, %v883_v11 }
 0x15f   : > { %v1418_v7 = vadd.f32 %v1337_v39, %v1057_v0  ;;  %v1581_v0 = vshrl.u32 %v4589_v54, 16 }
 0x160   : > { %v1947_v30 = vpop.f32.mrf.mxu1 }
 0x161   : > { %v1787_v16 = vadd.f32 %v1706_v29, %v1418_v7 }
 0x163   : > { %4400 = vmatmul.msk.bf16.gmra.mxu1 %vm555_vm1, %v1850_v13  ;;  %4362 = vmatmul.msk.bf16.gmra.mxu3 %vm555_vm1, %v1245_v55  ;;  %v5178_v12 = vadd.f32 %v1942_v34, %v1787_v16  ;;  %v1584_v34 = vshll.u32 %v4589_v54, 16  ;;  %v1583_v55 = vrot.slane %v1581_v0, 1 }
 0x164   : > { %v978_v43 = vpop.f32.mrf.mxu2 }
 0x165   : > { %v1058_v19 = vadd.f32 %v978_v43, %v5017_v33  ;;  %v1246_v33 = vrot.slane %v4589_v54, 1 }
 0x166   : > { %v1342_v35 = vpop.f32.mrf.mxu3  ;;  %v1711_v41 = vpop.f32.mrf.mxu0 }
 0x167   : > { %v1419_v29 = vadd.f32 %v1339_v9, %v1058_v19  ;;  %v1586_v9 = vrot.slane %v1584_v34, 2  ;;  %v4590_v34 = vld [vmem:[%s4795_s12 + $0x80] sm:$0xff] }
 0x168   : > { %v1949_v39 = vpop.f32.mrf.mxu1 }
 0x169   : > { %4381 = vmatmul.msk.bf16.gmra.mxu0 %vm555_vm1, %v1579_v38  ;;  %4275 = vmatmul.msk.bf16.gmra.mxu2 %vm555_vm1, %v884_v27  ;;  %v1788_v15 = vadd.f32 %v1708_v18, %v1419_v29  ;;  %v1247_v18 = vsel %vm857_vm4, %v1244_v59, %v1246_v33  ;;  %v1587_v38 = vor.u32 %v1586_v9, %v1583_v55  ;;  %v1853_v55 = vrot.slane %v4590_v34, 2 }
 0x16b   : > { %v5186_v52 = vadd.f32 %v1944_v56, %v1788_v15  ;;  %v4709_v56 = vld [vmem:[%s4795_s12 + $0x70] sm:$0xff]  ;;  %v1588_v44 = vsel %vm1454_vm5, %v1578_v51, %v1587_v38 }
 0x16c   : > { %v981_v13 = vpop.f32.mrf.mxu2  ;;  %v885_v27 = vrot.slane %v4709_v56, 1  ;;  %v1854_v56 = vsel %vm1823_vm3, %v1851_v31, %v1853_v55 }
 0x16d   : > { %v1059_v3 = vadd.f32 %v981_v13, %v5027_v48 }
 0x16e   : > { %v1344_v7 = vpop.f32.mrf.mxu3  ;;  %v1713_v1 = vpop.f32.mrf.mxu0  ;;  %v886_v59 = vsel %vm857_vm4, %v883_v11, %v885_v27 }
 0x16f   : > { %v1420_v43 = vadd.f32 %v1342_v35, %v1059_v3  ;;  %v1590_v3 = vshrl.u32 %v4590_v34, 16 }
 0x170   : > { %v1952_v16 = vpop.f32.mrf.mxu1 }
 0x171   : > { %v1789_v19 = vadd.f32 %v1711_v41, %v1420_v43 }
 0x173   : > { %4401 = vmatmul.msk.bf16.gmra.mxu1 %vm555_vm1, %v1852_v10  ;;  %4363 = vmatmul.msk.bf16.gmra.mxu3 %vm555_vm1, %v1247_v18  ;;  %v5194_v48 = vadd.f32 %v1947_v30, %v1789_v19  ;;  %v1593_v30 = vshll.u32 %v4590_v34, 16  ;;  %v1592_v18 = vrot.slane %v1590_v3, 1 }
 0x174   : > { %v983_v29 = vpop.f32.mrf.mxu2 }
 0x175   : > { %v1060_v54 = vadd.f32 %v983_v29, %v5035_v6  ;;  %v1248_v6 = vrot.slane %v4590_v34, 1 }
 0x176   : > { %v1347_v15 = vpop.f32.mrf.mxu3  ;;  %v1716_v0 = vpop.f32.mrf.mxu0 }
 0x177   : > { %v1421_v41 = vadd.f32 %v1344_v7, %v1060_v54  ;;  %v1595_v7 = vrot.slane %v1593_v30, 2  ;;  %v4591_v30 = vld [vmem:[%s4795_s12 + $0x88] sm:$0xff] }
 0x178   : > { %v1954_v35 = vpop.f32.mrf.mxu1 }
 0x179   : > { %4382 = vmatmul.msk.bf16.gmra.mxu0 %vm555_vm1, %v1588_v44  ;;  %4276 = vmatmul.msk.bf16.gmra.mxu2 %vm555_vm1, %v886_v59  ;;  %v1790_v13 = vadd.f32 %v1713_v1, %v1421_v41  ;;  %v1249_v1 = vsel %vm857_vm4, %v1246_v33, %v1248_v6  ;;  %v1596_v44 = vor.u32 %v1595_v7, %v1592_v18  ;;  %v1855_v18 = vrot.slane %v4591_v30, 2 }
 0x17b   : > { %v5202_v9 = vadd.f32 %v1949_v39, %v1790_v13  ;;  %v4710_v39 = vld [vmem:[%s4795_s12 + $0x78] sm:$0xff]  ;;  %v1597_v31 = vsel %vm1454_vm5, %v1587_v38, %v1596_v44 }
 0x17c   : > { %v986_v10 = vpop.f32.mrf.mxu2  ;;  %v887_v59 = vrot.slane %v4710_v39, 1  ;;  %v1856_v39 = vsel %vm1823_vm3, %v1853_v55, %v1855_v18 }
 0x17d   : > { %v1061_v51 = vadd.f32 %v986_v10, %v5045_v25 }
 0x17e   : > { %v1349_v43 = vpop.f32.mrf.mxu3  ;;  %v1718_v11 = vpop.f32.mrf.mxu0  ;;  %v888_v33 = vsel %vm857_vm4, %v885_v27, %v887_v59 }
 0x17f   : > { %v1422_v29 = vadd.f32 %v1347_v15, %v1061_v51  ;;  %v1602_v51 = vshll.u32 %v4591_v30, 16 }
 0x180   : > { %v1957_v19 = vpop.f32.mrf.mxu1 }
 0x181   : > { %v1791_v54 = vadd.f32 %v1716_v0, %v1422_v29 }
 0x183   : > { %4402 = vmatmul.msk.bf16.gmra.mxu1 %vm555_vm1, %v1854_v56  ;;  %4364 = vmatmul.msk.bf16.gmra.mxu3 %vm555_vm1, %v1249_v1  ;;  %v5210_v25 = vadd.f32 %v1952_v16, %v1791_v54  ;;  %v1599_v16 = vshrl.u32 %v4591_v30, 16 }
 0x184   : > { %v988_v41 = vpop.f32.mrf.mxu2 }
 0x185   : > { %v1062_v34 = vadd.f32 %v988_v41, %v5053_v28  ;;  %v1250_v28 = vrot.slane %v4591_v30, 1  ;;  %v1601_v1 = vrot.slane %v1599_v16, 1 }
 0x186   : > { %v1352_v13 = vpop.f32.mrf.mxu3  ;;  %v1721_v3 = vpop.f32.mrf.mxu0 }
 0x187   : > { %v1423_v0 = vadd.f32 %v1349_v43, %v1062_v34  ;;  %v1604_v43 = vrot.slane %v1602_v51, 2  ;;  %v4592_v51 = vld [vmem:[%s4795_s12 + $0x90] sm:$0xff] }
 0x188   : > { %v5215_v15 = vpop.f32.mrf.mxu1 }
 0x189   : > { %4383 = vmatmul.msk.bf16.gmra.mxu0 %vm555_vm1, %v1597_v31  ;;  %4277 = vmatmul.msk.bf16.gmra.mxu2 %vm555_vm1, %v888_v33  ;;  %v1792_v10 = vadd.f32 %v1718_v11, %v1423_v0  ;;  %v1251_v11 = vsel %vm857_vm4, %v1248_v6, %v1250_v28  ;;  %v1605_v31 = vor.u32 %v1604_v43, %v1601_v1  ;;  %v1252_v1 = vrot.slane %v4592_v51, 1 }
 0x18b   : > { %v5220_v7 = vadd.f32 %v1954_v35, %v1792_v10  ;;  %v4711_v35 = vld [vmem:[%s4795_s12 + $0x80] sm:$0xff]  ;;  %v1606_v55 = vsel %vm1454_vm5, %v1596_v44, %v1605_v31 }
 0x18c   : > { %v991_v56 = vpop.f32.mrf.mxu2  ;;  %v889_v33 = vrot.slane %v4711_v35, 1  ;;  %v1448_v35 = vld [vmem:[%s4795_s12 + $0x98] sm:$0x3] }
 0x18d   : > { %v1063_v38 = vadd.f32 %v991_v56, %v5063_v2  ;;  %v1608_v56 = vshrl.u32 %v4592_v51, 16 }
 0x18e   : > { %v1354_v27 = vpop.f32.mrf.mxu3  ;;  %v1723_v29 = vpop.f32.mrf.mxu0  ;;  %v890_v6 = vsel %vm857_vm4, %v887_v59, %v889_v33 }
 0x18f   : > { %v1424_v41 = vadd.f32 %v1352_v13, %v1063_v38  ;;  %v1857_v38 = vrot.slane %v4592_v51, 2 }
 0x190   : > { %v1962_v54 = vpop.f32.mrf.mxu1 }
 0x191   : > { %v1793_v34 = vadd.f32 %v1721_v3, %v1424_v41 }
 0x193   : > { %4403 = vmatmul.msk.bf16.gmra.mxu1 %vm555_vm1, %v1856_v39  ;;  %4365 = vmatmul.msk.bf16.gmra.mxu3 %vm555_vm1, %v1251_v11  ;;  %v5228_v2 = vadd.f32 %v1957_v19, %v1793_v34  ;;  %v1858_v34 = vsel %vm1823_vm3, %v1855_v18, %v1857_v38 }
 0x194   : > { %v993_v0 = vpop.f32.mrf.mxu2 }
 0x195   : > { %v1064_v30 = vadd.f32 %v993_v0, %v5071_v32  ;;  %v1611_v32 = vshll.u32 %v4592_v51, 16 }
 0x196   : > { %v1357_v10 = vpop.f32.mrf.mxu3  ;;  %v1726_v16 = vpop.f32.mrf.mxu0 }
 0x197   : > { %v1425_v3 = vadd.f32 %v1354_v27, %v1064_v30  ;;  %v1610_v27 = vrot.slane %v1608_v56, 1  ;;  %v1613_v41 = vrot.slane %v1611_v32, 2  ;;  %v1123_v30 = vld [vmem:[%s4795_s12 + $0x98] sm:$0x1] }
 0x198   : > { %v5233_v13 = vpop.f32.mrf.mxu1  ;;  %v1199_v32 = vunpack.c.l.b16 %v1123_v30 }
 0x199   : > { %6515 = vst [vmem:[#allocation4_spill] sm:$0xff] %v5233_v13  ;;  %4384 = vmatmul.msk.bf16.gmra.mxu0 %vm555_vm1, %v1606_v55  ;;  %4278 = vmatmul.msk.bf16.gmra.mxu2 %vm555_vm1, %v890_v6  ;;  %v5238_v19 = vadd.f32 %v1723_v29, %v1425_v3  ;;  %v1253_v29 = vsel %vm857_vm4, %v1250_v28, %v1252_v1  ;;  %v1452_v3 = vunpack.c.l.b16 %v1448_v35 }
 0x19a   : > { %v1614_v6 = vor.u32 %v1613_v41, %v1610_v27  ;;  %v1218_v35 = vpack.c.b16 %v1199_v32, %v1199_v32 }
 0x19c   : > { %v996_v43 = vpop.f32.mrf.mxu2 }
 0x19d   : > { %v1065_v44 = vadd.f32 %v996_v43, %v5081_v58  ;;  %v4712_v58 = vld [vmem:[%s4795_s12 + $0x88] sm:$0xff] }
 0x19e   : > { %v1359_v59 = vpop.f32.mrf.mxu3  ;;  %v1728_v39 = vpop.f32.mrf.mxu0  ;;  %v891_v51 = vrot.slane %v4712_v58, 1  ;;  %v1254_v58 = vrot.slane %v1218_v35, 1 }
 0x19f   : > { %v1426_v0 = vadd.f32 %v1357_v10, %v1065_v44  ;;  %v1453_v44 = vpack.c.b16 %v1452_v3, %v1452_v3 }
 0x1a0   : > { %v1967_v11 = vpop.f32.mrf.mxu1  ;;  %v892_v27 = vsel %vm857_vm4, %v889_v33, %v891_v51 }
 0x1a1   : > { %v1795_v55 = vadd.f32 %v1726_v16, %v1426_v0  ;;  %v1615_v16 = vsel %vm1454_vm5, %v1605_v31, %v1614_v6  ;;  %v2053_v0 = vld [vmem:[%s4795_s12 + $0x10] sm:$0xc]  ;;  %v1620_v30 = vshll.u32 %v1453_v44, 16  ;;  %v1859_v3 = vrot.slane %v1453_v44, 2 }
 0x1a3   : > { %4404 = vmatmul.msk.bf16.gmra.mxu1 %vm555_vm1, %v1858_v34  ;;  %4366 = vmatmul.msk.bf16.gmra.mxu3 %vm555_vm1, %v1253_v29  ;;  %v5248_v56 = vadd.f32 %v1962_v54, %v1795_v55  ;;  %v2054_v29 = vld [vmem:[%s4795_s12 + $0x14] sm:$0xf]  ;;  %v2129_v55 = vunpack.c.l.b16 %v2053_v0  ;;  %v893_v0 = vrot.slane %v4931_v61, 1 }
 0x1a4   : > { %v998_v18 = vpop.f32.mrf.mxu2  ;;  %v2130_v31 = vunpack.c.l.b16 %v2054_v29 }
 0x1a5   : > { %v1066_v10 = vadd.f32 %v998_v18, %v5089_v40  ;;  %v1617_v40 = vshrl.u32 %v1453_v44, 16  ;;  %v4610_v44 = vld [vmem:[%s6509_s3] sm:$0xff]  ;;  %v894_v61 = vsel %vm857_vm4, %v891_v51, %v893_v0 }
 0x1a6   : > { %v1362_v43 = vpop.f32.mrf.mxu3  ;;  %v1731_v28 = vpop.f32.mrf.mxu0  ;;  %3195 = vmatpush.bf16.msra.mxu1 %v4610_v44 }
 0x1a7   : > { %v1427_v34 = vadd.f32 %v1359_v59, %v1066_v10  ;;  %v1619_v10 = vrot.slane %v1617_v40, 1 }
 0x1a8   : > { %v5253_v41 = vpop.f32.mrf.mxu1 }
 0x1a9   : > { %6516 = vst [vmem:[#allocation5_spill] sm:$0xff] %v5253_v41  ;;  %4385 = vmatmul.msk.bf16.gmra.mxu0 %vm555_vm1, %v1615_v16  ;;  %4279 = vmatmul.msk.bf16.gmra.mxu2 %vm555_vm1, %v892_v27  ;;  %v5259_v54 = vadd.f32 %v1728_v39, %v1427_v34  ;;  %v1622_v41 = vrot.slane %v1620_v30, 2  ;;  %v5262_v16 = vpack.c.b16 %v2130_v31, %v2129_v55 }
 0x1aa   : > { %v1860_v39 = vsel %vm1823_vm3, %v1857_v38, %v1859_v3  ;;  %v1255_v34 = vsel %vm857_vm4, %v1252_v1, %v1254_v58 }
 0x1ab   : > { %6517 = vst [vmem:[#allocation6_spill] sm:$0xff] %v5259_v54  ;;  %v5267_v54 = vld [vmem:[%s4795_s12 + $0x18] sm:$0xff]  ;;  %v2422_v38 = vshrl.u32 %v5262_v16, 16  ;;  %v2425_v1 = vshll.u32 %v5262_v16, 16 }
 0x1ac   : > { %v1001_v33 = vpop.f32.mrf.mxu2  ;;  %v2430_v29 = vshrl.u32 %v5267_v54, 16  ;;  %v2433_v40 = vshll.u32 %v5267_v54, 16 }
 0x1ad   : > { %v1067_v18 = vadd.f32 %v1001_v33, %v5099_v50  ;;  %v1623_v50 = vor.u32 %v1622_v41, %v1619_v10  ;;  %v2424_v58 = vrot.slane %v2422_v38, 2  ;;  %v2427_v10 = vrot.slane %v2425_v1, 3 }
 0x1ae   : > { %v1364_v59 = vpop.f32.mrf.mxu3  ;;  %v1733_v32 = vpop.f32.mrf.mxu0 }
 0x1af   : > { %v1428_v27 = vadd.f32 %v1362_v43, %v1067_v18  ;;  %v1624_v3 = vsel %vm1454_vm5, %v1614_v6, %v1623_v50  ;;  %v2428_v44 = vor.u32 %v2427_v10, %v2424_v58 }
 0x1b0   : > { %v1972_v13 = vpop.f32.mrf.mxu1 }
 0x1b1   : > { %v1797_v35 = vadd.f32 %v1731_v28, %v1428_v27  ;;  %v2435_v27 = vrot.slane %v2433_v40, 3  ;;  %v5294_v40 = vld [vmem:[%s4795_s12 + $0x20] sm:$0xff] }
 0x1b3   : > { %4405 = vmatmul.msk.bf16.gmra.mxu1 %vm555_vm1, %v1860_v39  ;;  %4367 = vmatmul.msk.bf16.gmra.mxu3 %vm555_vm1, %v1255_v34  ;;  %v5276_v43 = vadd.f32 %v1967_v11, %v1797_v35  ;;  %v2783_v11 = vld [vmem:[%s4795_s12 + $0x10] sm:$0x8]  ;;  %v2432_v39 = vrot.slane %v2430_v29, 2 }
 0x1b4   : > { %v1003_v28 = vpop.f32.mrf.mxu2  ;;  %v2787_v34 = vunpack.c.l.b16 %v2783_v11 }
 0x1b5   : > { %v1068_v41 = vadd.f32 %v1003_v28, %v5107_v22  ;;  %v2436_v6 = vor.u32 %v2435_v27, %v2432_v39 }
 0x1b6   : > { %v1367_v30 = vpop.f32.mrf.mxu3  ;;  %v1736_v55 = vpop.f32.mrf.mxu0 }
 0x1b7   : > { %v1429_v18 = vadd.f32 %v1364_v59, %v1068_v41  ;;  %v2788_v59 = vpack.c.b16 %v2130_v31, %v2787_v34  ;;  %v2437_v29 = vsel %vm2420_vm6, %v2428_v44, %v2436_v6  ;;  %v2439_v31 = vshrl.u32 %v5294_v40, 16 }
 0x1b8   : > { %v5284_v33 = vpop.f32.mrf.mxu1 }
 0x1b9   : > { %4386 = vmatmul.msk.bf16.gmra.mxu0 %vm555_vm1, %v1624_v3  ;;  %4280 = vmatmul.msk.bf16.gmra.mxu2 %vm555_vm1, %v894_v61  ;;  %v5289_v22 = vadd.f32 %v1733_v32, %v1429_v18  ;;  %v2790_v41 = vrot.slane %v2788_v59, 3  ;;  %v2791_v32 = vrot.slane %v5267_v54, 3  ;;  %v2185_v3 = vrot.slane %v5262_v16, 2 }
 0x1ba   : > { %v2186_v61 = vrot.slane %v5267_v54, 2  ;;  %v2441_v27 = vrot.slane %v2439_v31, 2 }
 0x1bb   : > { %v2792_v10 = vsel %vm2789_vm7, %v2790_v41, %v2791_v32  ;;  %v5316_v41 = vld [vmem:[%s4795_s12 + $0x28] sm:$0xff] }
 0x1bc   : > { %v1006_v35 = vpop.f32.mrf.mxu2  ;;  %v2187_v39 = vsel %vm1823_vm3, %v2185_v3, %v2186_v61  ;;  %v2793_v3 = vrot.slane %v5294_v40, 3 }
 0x1bd   : > { %v1069_v51 = vadd.f32 %v1006_v35, %v4961_v49 }
 0x1be   : > { %v1369_v50 = vpop.f32.mrf.mxu3  ;;  %v1738_v0 = vpop.f32.mrf.mxu0 }
 0x1bf   : > { %v1430_v1 = vadd.f32 %v1367_v30, %v1069_v51  ;;  %v2442_v30 = vshll.u32 %v5294_v40, 16 }
 0x1c0   : > { %v1977_v38 = vpop.f32.mrf.mxu1 }
 0x1c1   : > { %v1799_v28 = vadd.f32 %v1736_v55, %v1430_v1 }
 0x1c3   : > { %4494 = vmatmul.msk.bf16.vlgmr.msra.gmra.mxu3 %vm555_vm1, %v2437_v29  ;;  %v5300_v49 = vadd.f32 %v1972_v13, %v1799_v28  ;;  %v2444_v13 = vrot.slane %v2442_v30, 3  ;;  %v2448_v30 = vshrl.u32 %v5316_v41, 16 }
 0x1c4   : > { %v1008_v58 = vpop.f32.mrf.mxu2 }
 0x1c5   : > { %v1070_v11 = vadd.f32 %v1008_v58, %v4970_v4  ;;  %v2445_v44 = vor.u32 %v2444_v13, %v2441_v27 }
 0x1c6   : > { %v1372_v55 = vpop.f32.mrf.mxu3  ;;  %v1741_v18 = vpop.f32.mrf.mxu0 }
 0x1c7   : > { %v1431_v54 = vadd.f32 %v1369_v50, %v1070_v11  ;;  %v2446_v28 = vsel %vm2420_vm6, %v2436_v6, %v2445_v44 }
 0x1c8   : > { %v5307_v16 = vpop.f32.mrf.mxu1 }
 0x1c9   : > { %4513 = vmatmul.msk.bf16.vlgmr.msra.gmra.mxu0 %vm555_vm1, %v2792_v10  ;;  %4475 = vmatmul.msk.bf16.vlgmr.msra.gmra.mxu2 %vm555_vm1, %v2187_v39  ;;  %v5311_v34 = vadd.f32 %v1738_v0, %v1431_v54  ;;  %v2188_v0 = vrot.slane %v5294_v40, 2  ;;  %v2794_v10 = vsel %vm2789_vm7, %v2791_v32, %v2793_v3  ;;  %v2450_v40 = vrot.slane %v2448_v30, 2 }
 0x1ca   : > { %v2795_v30 = vrot.slane %v5316_v41, 3 }
 0x1cc   : > { %v1011_v4 = vpop.f32.mrf.mxu2 }
 0x1cd   : > { %v1071_v35 = vadd.f32 %v1011_v4, %v4979_v20  ;;  %v2451_v20 = vshll.u32 %v5316_v41, 16 }
 0x1ce   : > { %v1374_v51 = vpop.f32.mrf.mxu3  ;;  %v1743_v59 = vpop.f32.mrf.mxu0 }
 0x1cf   : > { %v1432_v29 = vadd.f32 %v1372_v55, %v1071_v35 }
 0x1d0   : > { %v1982_v1 = vpop.f32.mrf.mxu1 }
 0x1d1   : > { %v1801_v50 = vadd.f32 %v1741_v18, %v1432_v29  ;;  %v2189_v18 = vsel %vm1823_vm3, %v2186_v61, %v2188_v0 }
 0x1d3   : > { %4495 = vmatmul.msk.bf16.gmra.mxu3 %vm555_vm1, %v2446_v28  ;;  %v5321_v31 = vadd.f32 %v1977_v38, %v1801_v50  ;;  %v2453_v38 = vrot.slane %v2451_v20, 3  ;;  %v5337_v50 = vld [vmem:[%s4795_s12 + $0x30] sm:$0xff] }
 0x1d4   : > { %v1013_v58 = vpop.f32.mrf.mxu2 }
 0x1d5   : > { %v1072_v11 = vadd.f32 %v1013_v58, %v4988_v37  ;;  %v2454_v13 = vor.u32 %v2453_v38, %v2450_v40  ;;  %v2457_v58 = vshrl.u32 %v5337_v50, 16 }
 0x1d6   : > { %v1377_v55 = vpop.f32.mrf.mxu3  ;;  %v1746_v6 = vpop.f32.mrf.mxu0 }
 0x1d7   : > { %v1433_v54 = vadd.f32 %v1374_v51, %v1072_v11  ;;  %v2455_v28 = vsel %vm2420_vm6, %v2445_v44, %v2454_v13 }
 0x1d8   : > { %v5328_v39 = vpop.f32.mrf.mxu1 }
 0x1d9   : > { %4514 = vmatmul.msk.bf16.gmra.mxu0 %vm555_vm1, %v2794_v10  ;;  %4476 = vmatmul.msk.bf16.gmra.mxu2 %vm555_vm1, %v2189_v18  ;;  %v5332_v27 = vadd.f32 %v1743_v59, %v1433_v54  ;;  %v2190_v59 = vrot.slane %v5316_v41, 2  ;;  %v2796_v18 = vsel %vm2789_vm7, %v2793_v3, %v2795_v30  ;;  %v2459_v41 = vrot.slane %v2457_v58, 2 }
 0x1dc   : > { %v1016_v37 = vpop.f32.mrf.mxu2 }
 0x1dd   : > { %v1073_v4 = vadd.f32 %v1016_v37, %v4997_v53  ;;  %v2460_v53 = vshll.u32 %v5337_v50, 16 }
 0x1de   : > { %v1379_v35 = vpop.f32.mrf.mxu3  ;;  %v1748_v32 = vpop.f32.mrf.mxu0 }
 0x1df   : > { %v1434_v61 = vadd.f32 %v1377_v55, %v1073_v4 }
 0x1e0   : > { %v1987_v29 = vpop.f32.mrf.mxu1 }
 0x1e1   : > { %v1803_v51 = vadd.f32 %v1746_v6, %v1434_v61  ;;  %v2191_v6 = vsel %vm1823_vm3, %v2188_v0, %v2190_v59 }
 0x1e3   : > { %4496 = vmatmul.msk.bf16.gmra.mxu3 %vm555_vm1, %v2455_v28  ;;  %v5342_v20 = vadd.f32 %v1982_v1, %v1803_v51  ;;  %v2462_v1 = vrot.slane %v2460_v53, 3  ;;  %v5358_v51 = vld [vmem:[%s4795_s12 + $0x38] sm:$0xff]  ;;  %v2797_v53 = vrot.slane %v5337_v50, 3 }
 0x1e4   : > { %v1018_v11 = vpop.f32.mrf.mxu2 }
 0x1e5   : > { %v1074_v55 = vadd.f32 %v1018_v11, %v5006_v5  ;;  %v2463_v37 = vor.u32 %v2462_v1, %v2459_v41 }
 0x1e6   : > { %v1382_v10 = vpop.f32.mrf.mxu3  ;;  %v1751_v44 = vpop.f32.mrf.mxu0 }
 0x1e7   : > { %v1435_v40 = vadd.f32 %v1379_v35, %v1074_v55  ;;  %v2464_v0 = vsel %vm2420_vm6, %v2454_v13, %v2463_v37  ;;  %v2466_v55 = vshrl.u32 %v5358_v51, 16 }
 0x1e8   : > { %v5349_v54 = vpop.f32.mrf.mxu1 }
 0x1e9   : > { %4515 = vmatmul.msk.bf16.gmra.mxu0 %vm555_vm1, %v2796_v18  ;;  %4477 = vmatmul.msk.bf16.gmra.mxu2 %vm555_vm1, %v2191_v6  ;;  %v5353_v38 = vadd.f32 %v1748_v32, %v1435_v40  ;;  %v2192_v32 = vrot.slane %v5337_v50, 2  ;;  %v2798_v40 = vsel %vm2789_vm7, %v2795_v30, %v2797_v53  ;;  %v2468_v1 = vrot.slane %v2466_v55, 2 }
 0x1ec   : > { %v1021_v5 = vpop.f32.mrf.mxu2 }
 0x1ed   : > { %v1075_v4 = vadd.f32 %v1021_v5, %v5015_v23  ;;  %v2469_v23 = vshll.u32 %v5358_v51, 16 }
 0x1ee   : > { %v1384_v61 = vpop.f32.mrf.mxu3  ;;  %v1753_v3 = vpop.f32.mrf.mxu0 }
 0x1ef   : > { %v1436_v28 = vadd.f32 %v1382_v10, %v1075_v4  ;;  %v2471_v5 = vrot.slane %v2469_v23, 3  ;;  %v2799_v23 = vrot.slane %v5358_v51, 3 }
 0x1f0   : > { %v1992_v35 = vpop.f32.mrf.mxu1 }
 0x1f1   : > { %v1805_v58 = vadd.f32 %v1751_v44, %v1436_v28  ;;  %v2193_v44 = vsel %vm1823_vm3, %v2190_v59, %v2192_v32  ;;  %v2472_v4 = vor.u32 %v2471_v5, %v2468_v1 }
 0x1f3   : > { %4497 = vmatmul.msk.bf16.gmra.mxu3 %vm555_vm1, %v2464_v0  ;;  %v5363_v11 = vadd.f32 %v1987_v29, %v1805_v58  ;;  %v2473_v59 = vsel %vm2420_vm6, %v2463_v37, %v2472_v4 }
 0x1f4   : > { %v1023_v18 = vpop.f32.mrf.mxu2 }
 0x1f5   : > { %v1076_v10 = vadd.f32 %v1023_v18, %v5024_v42 }
 0x1f6   : > { %v1387_v13 = vpop.f32.mrf.mxu3  ;;  %v1756_v6 = vpop.f32.mrf.mxu0 }
 0x1f7   : > { %v1437_v41 = vadd.f32 %v1384_v61, %v1076_v10  ;;  %v5379_v61 = vld [vmem:[%s4795_s12 + $0x40] sm:$0xff] }
 0x1f8   : > { %v5374_v50 = vpop.f32.mrf.mxu1  ;;  %v2475_v10 = vshrl.u32 %v5379_v61, 16 }
 0x1f9   : > { %4516 = vmatmul.msk.bf16.gmra.mxu0 %vm555_vm1, %v2798_v40  ;;  %4478 = vmatmul.msk.bf16.gmra.mxu2 %vm555_vm1, %v2193_v44  ;;  %v5372_v29 = vadd.f32 %v1753_v3, %v1437_v41  ;;  %v2194_v3 = vrot.slane %v5358_v51, 2 }
 0x1fb   : > { %v2195_v1 = vsel %vm1823_vm3, %v2192_v32, %v2194_v3 }
 0x1fc   : > { %v1026_v42 = vpop.f32.mrf.mxu2 }
 0x1fd   : > { %v1077_v28 = vadd.f32 %v1026_v42, %v5033_v60  ;;  %v2478_v60 = vshll.u32 %v5379_v61, 16  ;;  %v2477_v42 = vrot.slane %v2475_v10, 2 }
 0x1fe   : > { %v1389_v0 = vpop.f32.mrf.mxu3  ;;  %v1758_v30 = vpop.f32.mrf.mxu0 }
 0x1ff   : > { %v1438_v58 = vadd.f32 %v1387_v13, %v1077_v28  ;;  %v2480_v51 = vrot.slane %v2478_v60, 3  ;;  %v2801_v60 = vrot.slane %v5379_v61, 3 }
 0x200   : > { %v1997_v44 = vpop.f32.mrf.mxu1 }
 0x201   : > { %v1807_v55 = vadd.f32 %v1756_v6, %v1438_v58  ;;  %v2800_v6 = vsel %vm2789_vm7, %v2797_v53, %v2799_v23  ;;  %v2481_v28 = vor.u32 %v2480_v51, %v2477_v42  ;;  %v2802_v42 = vsel %vm2789_vm7, %v2799_v23, %v2801_v60 }
 0x203   : > { %4498 = vmatmul.msk.bf16.gmra.mxu3 %vm555_vm1, %v2473_v59  ;;  %v5384_v18 = vadd.f32 %v1992_v35, %v1807_v55  ;;  %v2482_v32 = vsel %vm2420_vm6, %v2472_v4, %v2481_v28 }
 0x204   : > { %v1028_v40 = vpop.f32.mrf.mxu2 }
 0x205   : > { %v1078_v13 = vadd.f32 %v1028_v40, %v5042_v17 }
 0x206   : > { %v1392_v37 = vpop.f32.mrf.mxu3  ;;  %v1761_v41 = vpop.f32.mrf.mxu0 }
 0x207   : > { %v1439_v5 = vadd.f32 %v1389_v0, %v1078_v13  ;;  %v5400_v0 = vld [vmem:[%s4795_s12 + $0x48] sm:$0xff] }
 0x208   : > { %v5396_v40 = vpop.f32.mrf.mxu1 }
 0x209   : > { %4517 = vmatmul.msk.bf16.gmra.mxu0 %vm555_vm1, %v2800_v6  ;;  %4479 = vmatmul.msk.bf16.gmra.mxu2 %vm555_vm1, %v2195_v1  ;;  %v5393_v35 = vadd.f32 %v1758_v30, %v1439_v5  ;;  %6518 = vst [vmem:[#allocation7_spill] sm:$0xff] %v5396_v40  ;;  %v2196_v30 = vrot.slane %v5379_v61, 2  ;;  %v2487_v6 = vshll.u32 %v5400_v0, 16 }
 0x20c   : > { %v1031_v58 = vpop.f32.mrf.mxu2 }
 0x20d   : > { %v1079_v17 = vadd.f32 %v1031_v58, %v5051_v21  ;;  %v2484_v21 = vshrl.u32 %v5400_v0, 16 }
 0x20e   : > { %v1394_v59 = vpop.f32.mrf.mxu3  ;;  %v1763_v55 = vpop.f32.mrf.mxu0 }
 0x20f   : > { %v1440_v53 = vadd.f32 %v1392_v37, %v1079_v17  ;;  %v2486_v58 = vrot.slane %v2484_v21, 2  ;;  %v2489_v17 = vrot.slane %v2487_v6, 3  ;;  %v2803_v21 = vrot.slane %v5400_v0, 3 }
 0x210   : > { %v2002_v61 = vpop.f32.mrf.mxu1  ;;  %v2198_v6 = vrot.slane %v5400_v0, 2 }
 0x211   : > { %v1809_v10 = vadd.f32 %v1761_v41, %v1440_v53  ;;  %v2197_v41 = vsel %vm1823_vm3, %v2194_v3, %v2196_v30  ;;  %v2490_v53 = vor.u32 %v2489_v17, %v2486_v58  ;;  %v5419_v3 = vld [vmem:[%s4795_s12 + $0x50] sm:$0xff] }
 0x213   : > { %4499 = vmatmul.msk.bf16.gmra.mxu3 %vm555_vm1, %v2482_v32  ;;  %v5405_v13 = vadd.f32 %v1997_v44, %v1809_v10  ;;  %v2491_v40 = vsel %vm2420_vm6, %v2481_v28, %v2490_v53 }
 0x214   : > { %v1033_v1 = vpop.f32.mrf.mxu2 }
 0x215   : > { %v1080_v37 = vadd.f32 %v1033_v1, %v5060_v62 }
 0x216   : > { %v1397_v5 = vpop.f32.mrf.mxu3  ;;  %v1766_v4 = vpop.f32.mrf.mxu0 }
 0x217   : > { %v1441_v51 = vadd.f32 %v1394_v59, %v1080_v37 }
 0x219   : > { %4518 = vmatmul.msk.bf16.gmra.mxu0 %vm555_vm1, %v2802_v42  ;;  %4480 = vmatmul.msk.bf16.gmra.mxu2 %vm555_vm1, %v2197_v41  ;;  %v5414_v44 = vadd.f32 %v1763_v55, %v1441_v51  ;;  %v5424_v55 = vpop.f32.mrf.mxu1  ;;  %v2496_v42 = vshll.u32 %v5419_v3, 16 }
 0x21a   : > { %6519 = vst [vmem:[#allocation8_spill] sm:$0xff] %v5424_v55 }
 0x21b   : > { %v2498_v17 = vrot.slane %v2496_v42, 3 }
 0x21c   : > { %v1036_v32 = vpop.f32.mrf.mxu2 }
 0x21d   : > { %v1081_v62 = vadd.f32 %v1036_v32, %v5069_v24  ;;  %v2493_v24 = vshrl.u32 %v5419_v3, 16 }
 0x21e   : > { %v1399_v10 = vpop.f32.mrf.mxu3  ;;  %v1768_v1 = vpop.f32.mrf.mxu0 }
 0x21f   : > { %v1442_v23 = vadd.f32 %v1397_v5, %v1081_v62  ;;  %v2495_v0 = vrot.slane %v2493_v24, 2  ;;  %v2805_v24 = vrot.slane %v5419_v3, 3 }
 0x221   : > { %v1811_v59 = vadd.f32 %v1766_v4, %v1442_v23  ;;  %v2804_v4 = vsel %vm2789_vm7, %v2801_v60, %v2803_v21  ;;  %v2499_v32 = vor.u32 %v2498_v17, %v2495_v0  ;;  %v2007_v23 = vpop.f32.mrf.mxu1 }
 0x223   : > { %4500 = vmatmul.msk.bf16.gmra.mxu3 %vm555_vm1, %v2491_v40  ;;  %v5426_v37 = vadd.f32 %v2002_v61, %v1811_v59  ;;  %v2199_v40 = vsel %vm1823_vm3, %v2196_v30, %v2198_v6  ;;  %v2500_v55 = vsel %vm2420_vm6, %v2490_v53, %v2499_v32  ;;  %v5440_v30 = vld [vmem:[%s4795_s12 + $0x58] sm:$0xff] }
 0x224   : > { %v1038_v5 = vpop.f32.mrf.mxu2 }
 0x225   : > { %v1082_v28 = vadd.f32 %v1038_v5, %v5078_v47 }
 0x226   : > { %v1402_v41 = vpop.f32.mrf.mxu3  ;;  %v1771_v51 = vpop.f32.mrf.mxu0 }
 0x227   : > { %v1443_v58 = vadd.f32 %v1399_v10, %v1082_v28  ;;  %v2502_v28 = vshrl.u32 %v5440_v30, 16 }
 0x229   : > { %4519 = vmatmul.msk.bf16.gmra.mxu0 %vm555_vm1, %v2804_v4  ;;  %4481 = vmatmul.msk.bf16.gmra.mxu2 %vm555_vm1, %v2199_v40  ;;  %v5435_v61 = vadd.f32 %v1768_v1, %v1443_v58  ;;  %v2200_v1 = vrot.slane %v5419_v3, 2  ;;  %v2806_v58 = vsel %vm2789_vm7, %v2803_v21, %v2805_v24  ;;  %v5452_v0 = vpop.f32.mrf.mxu1  ;;  %v2504_v3 = vrot.slane %v2502_v28, 2 }
 0x22c   : > { %v1041_v62 = vpop.f32.mrf.mxu2 }
 0x22d   : > { %v1083_v47 = vadd.f32 %v1041_v62, %v5087_v57  ;;  %v2505_v57 = vshll.u32 %v5440_v30, 16 }
 0x22e   : > { %v1404_v59 = vpop.f32.mrf.mxu3  ;;  %v1773_v5 = vpop.f32.mrf.mxu0 }
 0x22f   : > { %v1444_v60 = vadd.f32 %v1402_v41, %v1083_v47  ;;  %v2507_v17 = vrot.slane %v2505_v57, 3  ;;  %v6521_v47 = vld [vmem:[#allocation2_spill] sm:$0xff]  ;;  %v2807_v57 = vrot.slane %v5440_v30, 3 }
 0x231   : > { %v1813_v10 = vadd.f32 %v1771_v51, %v1444_v60  ;;  %v2201_v51 = vsel %vm1823_vm3, %v2198_v6, %v2200_v1 }
 0x233   : > { %4501 = vmatmul.msk.bf16.gmra.mxu3 %vm555_vm1, %v2500_v55  ;;  %v5445_v42 = vadd.f32 %v2007_v23, %v1813_v10  ;;  %v2508_v23 = vor.u32 %v2507_v17, %v2504_v3 }
 0x234   : > { %v1043_v4 = vpop.f32.mrf.mxu2 }
 0x235   : > { %6520 = vst [vmem:[#allocation9_spill] sm:$0xff] %v5445_v42  ;;  %v1084_v41 = vadd.f32 %v1043_v4, %v5096_v36  ;;  %v2509_v6 = vsel %vm2420_vm6, %v2499_v32, %v2508_v23  ;;  %v5461_v42 = vld [vmem:[%s4795_s12 + $0x60] sm:$0xff] }
 0x236   : > { %v1407_v40 = vpop.f32.mrf.mxu3  ;;  %v1776_v53 = vpop.f32.mrf.mxu0 }
 0x237   : > { %v1445_v55 = vadd.f32 %v1404_v59, %v1084_v41  ;;  %v2012_v59 = vpop.f32.mrf.mxu1 }
 0x239   : > { %4520 = vmatmul.msk.bf16.gmra.mxu0 %vm555_vm1, %v2806_v58  ;;  %4482 = vmatmul.msk.bf16.gmra.mxu2 %vm555_vm1, %v2201_v51  ;;  %v5456_v62 = vadd.f32 %v1773_v5, %v1445_v55  ;;  %v2202_v5 = vrot.slane %v5440_v30, 2  ;;  %v2511_v58 = vshrl.u32 %v5461_v42, 16  ;;  %v2514_v51 = vshll.u32 %v5461_v42, 16 }
 0x23b   : > { %v2516_v30 = vrot.slane %v2514_v51, 3  ;;  %v2809_v51 = vrot.slane %v5461_v42, 3 }
 0x23c   : > { %v1046_v36 = vpop.f32.mrf.mxu2 }
 0x23d   : > { %v1085_v60 = vadd.f32 %v1046_v36, %v6521_v47  ;;  %v2808_v36 = vsel %vm2789_vm7, %v2805_v24, %v2807_v57 }
 0x23e   : > { %v1409_v10 = vpop.f32.mrf.mxu3  ;;  %v1778_v21 = vpop.f32.mrf.mxu0 }
 0x23f   : > { %v1446_v4 = vadd.f32 %v1407_v40, %v1085_v60  ;;  %v6522_v40 = vld [vmem:[#allocation3_spill] sm:$0xff]  ;;  %v2513_v60 = vrot.slane %v2511_v58, 2 }
 0x240   : > { %v5485_v58 = vld [vmem:[%s4795_s12 + $0x68] sm:$0xff] }
 0x241   : > { %v1815_v28 = vadd.f32 %v1776_v53, %v1446_v4  ;;  %v2203_v53 = vsel %vm1823_vm3, %v2200_v1, %v2202_v5  ;;  %v5481_v1 = vld [vmem:[%s6508_s2] ss:$0 sm:$0xff] }
 0x243   : > { %4502 = vmatmul.msk.bf16.gmra.mxu3 %vm555_vm1, %v2509_v6  ;;  %v5466_v41 = vadd.f32 %v2012_v59, %v1815_v28  ;;  %v2517_v6 = vor.u32 %v2516_v30, %v2513_v60  ;;  %v2810_v60 = vsel %vm2789_vm7, %v2807_v57, %v2809_v51 }
 0x244   : > { %v1048_v55 = vpop.f32.mrf.mxu2 }
 0x245   : > { %v1086_v3 = vadd.f32 %v1048_v55, %v6522_v40 }
 0x246   : > { %v2657_v32 = vpop.f32.mrf.mxu3  ;;  %v2893_v17 = vpop.f32.mrf.mxu0 }
 0x247   : > { %v1447_v47 = vadd.f32 %v1409_v10, %v1086_v3  ;;  %v2518_v10 = vsel %vm2420_vm6, %v2508_v23, %v2517_v6 }
 0x249   : > { %4521 = vmatmul.msk.bf16.gmra.mxu0 %vm555_vm1, %v2808_v36  ;;  %4483 = vmatmul.msk.bf16.gmra.mxu2 %vm555_vm1, %v2203_v53  ;;  %v5475_v4 = vadd.f32 %v1778_v21, %v1447_v47  ;;  %v2523_v36 = vshll.u32 %v5485_v58, 16 }
 0x24b   : > { %6523 = vst [vmem:[#allocation2_spill] sm:$0xff] %v5475_v4  ;;  %v5512_v4 = vld [vmem:[%s4795_s12 + $0x70] sm:$0xff] }
 0x24c   : > { %v2288_v59 = vpop.f32.mrf.mxu2 }
 0x24d   : > { %v2378_v28 = vadd.f32 %v2288_v59, %v5130_v26  ;;  %v2204_v26 = vrot.slane %v5461_v42, 2 }
 0x24e   : > { %v2659_v55 = vpop.f32.mrf.mxu3  ;;  %v2895_v24 = vpop.f32.mrf.mxu0 }
 0x24f   : > { %v2747_v40 = vadd.f32 %v2657_v32, %v2378_v28  ;;  %v2520_v32 = vshrl.u32 %v5485_v58, 16  ;;  %v2205_v30 = vsel %vm1823_vm3, %v2202_v5, %v2204_v26 }
 0x251   : > { %v2983_v21 = vadd.f32 %v2893_v17, %v2747_v40  ;;  %v2522_v28 = vrot.slane %v2520_v32, 2  ;;  %v2525_v40 = vrot.slane %v2523_v36, 3 }
 0x253   : > { %4503 = vmatmul.msk.bf16.gmra.mxu3 %vm555_vm1, %v2518_v10  ;;  %v3023_v3 = vadd.f32 %v5481_v1, %v2983_v21  ;;  %v2526_v21 = vor.u32 %v2525_v40, %v2522_v28 }
 0x254   : > { %v2290_v53 = vpop.f32.mrf.mxu2 }
 0x255   : > { %v3059_v23 = vmax.f32 %v3023_v3, 0.0  ;;  %v2379_v17 = vadd.f32 %v2290_v53, %v5138_v14  ;;  %v2527_v36 = vsel %vm2420_vm6, %v2517_v6, %v2526_v21  ;;  %v2532_v6 = vshll.u32 %v5512_v4, 16 }
 0x256   : > { %v2662_v47 = vpop.f32.mrf.mxu3  ;;  %v2898_v42 = vpop.f32.mrf.mxu0 }
 0x257   : > { %v2748_v59 = vadd.f32 %v2659_v55, %v2379_v17  ;;  %3647 = vst.msk [vmem:[%s5499_s8] sm:$0xff] %vm3133_vm8, %v3059_v23 }
 0x259   : > { %4522 = vmatmul.msk.bf16.gmra.mxu0 %vm555_vm1, %v2810_v60  ;;  %v2984_v10 = vadd.f32 %v2895_v24, %v2748_v59  ;;  %4484 = vmatmul.msk.bf16.gmra.mxu2 %vm555_vm1, %v2205_v30  ;;  %v2811_v60 = vrot.slane %v5485_v58, 3  ;;  %v2206_v30 = vrot.slane %v5485_v58, 2 }
 0x25b   : > { %v3024_v14 = vadd.f32 %v5481_v1, %v2984_v10  ;;  %v2812_v10 = vsel %vm2789_vm7, %v2809_v51, %v2811_v60 }
 0x25c   : > { %v2293_v3 = vpop.f32.mrf.mxu2 }
 0x25d   : > { %v3060_v53 = vmax.f32 %v3024_v14, 0.0  ;;  %v2380_v57 = vadd.f32 %v2293_v3, %v5146_v8  ;;  %v2207_v14 = vsel %vm1823_vm3, %v2204_v26, %v2206_v30 }
 0x25e   : > { %v2664_v5 = vpop.f32.mrf.mxu3  ;;  %v2900_v55 = vpop.f32.mrf.mxu0 }
 0x25f   : > { %v3095_v32 = vpack.c.bf16 %v3060_v53, %v3059_v23  ;;  %v2749_v17 = vadd.f32 %v2662_v47, %v2380_v57  ;;  %3648 = vst.msk [vmem:[%s5499_s8 + $0x8] sm:$0xff] %vm3133_vm8, %v3060_v53  ;;  %v2529_v23 = vshrl.u32 %v5512_v4, 16  ;;  %v2534_v53 = vrot.slane %v2532_v6, 3  ;;  %v5534_v6 = vld [vmem:[%s4795_s12 + $0x78] sm:$0xff] }
 0x261   : > { %v2985_v24 = vadd.f32 %v2898_v42, %v2749_v17  ;;  %4539 = vmatmul.msk.bf16.vlgmr.msra.gmra.mxu1 %vm3133_vm8, %v3095_v32  ;;  %v2531_v58 = vrot.slane %v2529_v23, 2 }
 0x263   : > { %4504 = vmatmul.msk.bf16.gmra.mxu3 %vm555_vm1, %v2527_v36  ;;  %v3025_v8 = vadd.f32 %v5481_v1, %v2985_v24  ;;  %v2535_v32 = vor.u32 %v2534_v53, %v2531_v58 }
 0x264   : > { %v2295_v47 = vpop.f32.mrf.mxu2 }
 0x265   : > { %v3061_v59 = vmax.f32 %v3025_v8, 0.0  ;;  %v2381_v28 = vadd.f32 %v2295_v47, %v5154_v46  ;;  %v2536_v23 = vsel %vm2420_vm6, %v2526_v21, %v2535_v32  ;;  %v2813_v47 = vrot.slane %v5512_v4, 3 }
 0x266   : > { %v2667_v42 = vpop.f32.mrf.mxu3  ;;  %v2903_v40 = vpop.f32.mrf.mxu0  ;;  %v2541_v21 = vshll.u32 %v5534_v6, 16 }
 0x267   : > { %v2750_v3 = vadd.f32 %v2664_v5, %v2381_v28  ;;  %3649 = vst.msk [vmem:[%s5499_s8 + $0x10] sm:$0xff] %vm3133_vm8, %v3061_v59  ;;  %v2208_v28 = vrot.slane %v5512_v4, 2  ;;  %v2814_v58 = vsel %vm2789_vm7, %v2811_v60, %v2813_v47 }
 0x269   : > { %4523 = vmatmul.msk.bf16.gmra.mxu0 %vm555_vm1, %v2812_v10  ;;  %v2986_v57 = vadd.f32 %v2900_v55, %v2750_v3  ;;  %4485 = vmatmul.msk.bf16.gmra.mxu2 %vm555_vm1, %v2207_v14  ;;  %v2209_v53 = vsel %vm1823_vm3, %v2206_v30, %v2208_v28 }
 0x26b   : > { %v3026_v46 = vadd.f32 %v5481_v1, %v2986_v57 }
 0x26c   : > { %v2298_v17 = vpop.f32.mrf.mxu2 }
 0x26d   : > { %v3062_v36 = vmax.f32 %v3026_v46, 0.0  ;;  %v2382_v51 = vadd.f32 %v2298_v17, %v5162_v45  ;;  %v2543_v46 = vrot.slane %v2541_v21, 3  ;;  %v2210_v21 = vrot.slane %v5534_v6, 2 }
 0x26e   : > { %v2669_v26 = vpop.f32.mrf.mxu3  ;;  %v2905_v5 = vpop.f32.mrf.mxu0 }
 0x26f   : > { %v2751_v24 = vadd.f32 %v2667_v42, %v2382_v51  ;;  %v3096_v8 = vpack.c.bf16 %v3062_v36, %v3061_v59  ;;  %3650 = vst.msk [vmem:[%s5499_s8 + $0x18] sm:$0xff] %vm3133_vm8, %v3062_v36  ;;  %v2538_v59 = vshrl.u32 %v5534_v6, 16 }
 0x271   : > { %v2987_v55 = vadd.f32 %v2903_v40, %v2751_v24  ;;  %4540 = vmatmul.msk.bf16.gmra.mxu1 %vm3133_vm8, %v3096_v8  ;;  %v2540_v4 = vrot.slane %v2538_v59, 2  ;;  %v2815_v59 = vrot.slane %v5534_v6, 3 }
 0x273   : > { %4505 = vmatmul.msk.bf16.gmra.mxu3 %vm555_vm1, %v2536_v23  ;;  %v3027_v45 = vadd.f32 %v5481_v1, %v2987_v55  ;;  %v2544_v36 = vor.u32 %v2543_v46, %v2540_v4 }
 0x274   : > { %v2300_v42 = vpop.f32.mrf.mxu2 }
 0x275   : > { %v3063_v10 = vmax.f32 %v3027_v45, 0.0  ;;  %v2383_v14 = vadd.f32 %v2300_v42, %v5170_v63  ;;  %v2545_v55 = vsel %vm2420_vm6, %v2535_v32, %v2544_v36  ;;  %v5556_v45 = vld [vmem:[%s4795_s12 + $0x80] sm:$0xff] }
 0x276   : > { %v2672_v40 = vpop.f32.mrf.mxu3  ;;  %v2908_v3 = vpop.f32.mrf.mxu0  ;;  %v2547_v42 = vshrl.u32 %v5556_v45, 16  ;;  %v2550_v32 = vshll.u32 %v5556_v45, 16 }
 0x277   : > { %v2752_v57 = vadd.f32 %v2669_v26, %v2383_v14  ;;  %3651 = vst.msk [vmem:[%s5499_s8 + $0x20] sm:$0xff] %vm3133_vm8, %v3063_v10 }
 0x278   : > { %v2549_v6 = vrot.slane %v2547_v42, 2  ;;  %v2552_v46 = vrot.slane %v2550_v32, 3 }
 0x279   : > { %4524 = vmatmul.msk.bf16.gmra.mxu0 %vm555_vm1, %v2814_v58  ;;  %v2988_v17 = vadd.f32 %v2905_v5, %v2752_v57  ;;  %4486 = vmatmul.msk.bf16.gmra.mxu2 %vm555_vm1, %v2209_v53  ;;  %v2816_v53 = vsel %vm2789_vm7, %v2813_v47, %v2815_v59  ;;  %v2211_v57 = vsel %vm1823_vm3, %v2208_v28, %v2210_v21 }
 0x27b   : > { %v3028_v63 = vadd.f32 %v5481_v1, %v2988_v17 }
 0x27c   : > { %v2303_v51 = vpop.f32.mrf.mxu2 }
 0x27d   : > { %v3064_v24 = vmax.f32 %v3028_v63, 0.0  ;;  %v2384_v60 = vadd.f32 %v2303_v51, %v5178_v12  ;;  %v2553_v63 = vor.u32 %v2552_v46, %v2549_v6 }
 0x27e   : > { %v2674_v30 = vpop.f32.mrf.mxu3  ;;  %v2910_v26 = vpop.f32.mrf.mxu0 }
 0x27f   : > { %v2753_v8 = vadd.f32 %v2672_v40, %v2384_v60  ;;  %v3097_v23 = vpack.c.bf16 %v3064_v24, %v3063_v10  ;;  %3652 = vst.msk [vmem:[%s5499_s8 + $0x28] sm:$0xff] %vm3133_vm8, %v3064_v24 }
 0x281   : > { %v2989_v5 = vadd.f32 %v2908_v3, %v2753_v8  ;;  %4541 = vmatmul.msk.bf16.gmra.mxu1 %vm3133_vm8, %v3097_v23  ;;  %v2554_v23 = vsel %vm2420_vm6, %v2544_v36, %v2553_v63 }
 0x283   : > { %4506 = vmatmul.msk.bf16.gmra.mxu3 %vm555_vm1, %v2545_v55  ;;  %v3029_v12 = vadd.f32 %v5481_v1, %v2989_v5  ;;  %v5578_v55 = vld [vmem:[%s4795_s12 + $0x88] sm:$0xff]  ;;  %v2817_v5 = vrot.slane %v5556_v45, 3 }
 0x284   : > { %v2305_v10 = vpop.f32.mrf.mxu2  ;;  %v2556_v42 = vshrl.u32 %v5578_v55, 16  ;;  %v2559_v36 = vshll.u32 %v5578_v55, 16 }
 0x285   : > { %v3065_v14 = vmax.f32 %v3029_v12, 0.0  ;;  %v2385_v40 = vadd.f32 %v2305_v10, %v5186_v52  ;;  %v2212_v12 = vrot.slane %v5556_v45, 2 }
 0x286   : > { %v2677_v3 = vpop.f32.mrf.mxu3  ;;  %v2913_v58 = vpop.f32.mrf.mxu0  ;;  %v2558_v45 = vrot.slane %v2556_v42, 2 }
 0x287   : > { %v2754_v4 = vadd.f32 %v2674_v30, %v2385_v40  ;;  %3653 = vst.msk [vmem:[%s5499_s8 + $0x30] sm:$0xff] %vm3133_vm8, %v3065_v14 }
 0x289   : > { %4525 = vmatmul.msk.bf16.gmra.mxu0 %vm555_vm1, %v2816_v53  ;;  %v2990_v17 = vadd.f32 %v2910_v26, %v2754_v4  ;;  %4487 = vmatmul.msk.bf16.gmra.mxu2 %vm555_vm1, %v2211_v57  ;;  %v2213_v53 = vsel %vm1823_vm3, %v2210_v21, %v2212_v12  ;;  %v2561_v4 = vrot.slane %v2559_v36, 3 }
 0x28b   : > { %v3030_v52 = vadd.f32 %v5481_v1, %v2990_v17  ;;  %v2562_v46 = vor.u32 %v2561_v4, %v2558_v45 }
 0x28c   : > { %v2308_v51 = vpop.f32.mrf.mxu2 }
 0x28d   : > { %v3066_v24 = vmax.f32 %v3030_v52, 0.0  ;;  %v2386_v47 = vadd.f32 %v2308_v51, %v5194_v48 }
 0x28e   : > { %v2679_v28 = vpop.f32.mrf.mxu3  ;;  %v2915_v60 = vpop.f32.mrf.mxu0 }
 0x28f   : > { %v2755_v30 = vadd.f32 %v2677_v3, %v2386_v47  ;;  %v3098_v8 = vpack.c.bf16 %v3066_v24, %v3065_v14  ;;  %3654 = vst.msk [vmem:[%s5499_s8 + $0x38] sm:$0xff] %vm3133_vm8, %v3066_v24 }
 0x291   : > { %v2991_v26 = vadd.f32 %v2913_v58, %v2755_v30  ;;  %4542 = vmatmul.msk.bf16.gmra.mxu1 %vm3133_vm8, %v3098_v8  ;;  %v2818_v58 = vsel %vm2789_vm7, %v2815_v59, %v2817_v5  ;;  %v5600_v30 = vld [vmem:[%s4795_s12 + $0x90] sm:$0xff]  ;;  %v2819_v8 = vrot.slane %v5578_v55, 3 }
 0x293   : > { %4507 = vmatmul.msk.bf16.gmra.mxu3 %vm555_vm1, %v2554_v23  ;;  %v3031_v48 = vadd.f32 %v5481_v1, %v2991_v26  ;;  %v2214_v23 = vrot.slane %v5578_v55, 2  ;;  %v2565_v26 = vshrl.u32 %v5600_v30, 16 }
 0x294   : > { %v2310_v32 = vpop.f32.mrf.mxu2 }
 0x295   : > { %v3067_v10 = vmax.f32 %v3031_v48, 0.0  ;;  %v2387_v14 = vadd.f32 %v2310_v32, %v5202_v9  ;;  %v2567_v55 = vrot.slane %v2565_v26, 2 }
 0x296   : > { %v2682_v40 = vpop.f32.mrf.mxu3  ;;  %v2918_v3 = vpop.f32.mrf.mxu0 }
 0x297   : > { %v2756_v57 = vadd.f32 %v2679_v28, %v2387_v14  ;;  %3655 = vst.msk [vmem:[%s5499_s8 + $0x40] sm:$0xff] %vm3133_vm8, %v3067_v10  ;;  %v2563_v28 = vsel %vm2420_vm6, %v2553_v63, %v2562_v46  ;;  %v2568_v63 = vshll.u32 %v5600_v30, 16  ;;  %v2820_v14 = vsel %vm2789_vm7, %v2817_v5, %v2819_v8 }
 0x299   : > { %4526 = vmatmul.msk.bf16.gmra.mxu0 %vm555_vm1, %v2818_v58  ;;  %v2992_v6 = vadd.f32 %v2915_v60, %v2756_v57  ;;  %4488 = vmatmul.msk.bf16.gmra.mxu2 %vm555_vm1, %v2213_v53  ;;  %v2570_v58 = vrot.slane %v2568_v63, 3 }
 0x29b   : > { %v3032_v9 = vadd.f32 %v5481_v1, %v2992_v6  ;;  %v2571_v57 = vor.u32 %v2570_v58, %v2567_v55 }
 0x29c   : > { %v2313_v17 = vpop.f32.mrf.mxu2 }
 0x29d   : > { %v3068_v52 = vmax.f32 %v3032_v9, 0.0  ;;  %v2388_v59 = vadd.f32 %v2313_v17, %v5210_v25 }
 0x29e   : > { %v2684_v21 = vpop.f32.mrf.mxu3  ;;  %v2920_v51 = vpop.f32.mrf.mxu0 }
 0x29f   : > { %v2757_v24 = vadd.f32 %v2682_v40, %v2388_v59  ;;  %v3099_v47 = vpack.c.bf16 %v3068_v52, %v3067_v10  ;;  %3656 = vst.msk [vmem:[%s5499_s8 + $0x48] sm:$0xff] %vm3133_vm8, %v3068_v52  ;;  %v2215_v40 = vsel %vm1823_vm3, %v2212_v12, %v2214_v23  ;;  %v2572_v52 = vsel %vm2420_vm6, %v2562_v46, %v2571_v57  ;;  %v5622_v59 = vld [vmem:[%s4795_s12 + $0x98] sm:$0xff] }
 0x2a1   : > { %v2993_v60 = vadd.f32 %v2918_v3, %v2757_v24  ;;  %4543 = vmatmul.msk.bf16.gmra.mxu1 %vm3133_vm8, %v3099_v47  ;;  %v2216_v24 = vrot.slane %v5600_v30, 2  ;;  %v2574_v47 = vshrl.u32 %v5622_v59, 16 }
 0x2a3   : > { %4508 = vmatmul.msk.bf16.gmra.mxu3 %vm555_vm1, %v2563_v28  ;;  %v3033_v25 = vadd.f32 %v5481_v1, %v2993_v60  ;;  %v2577_v28 = vshll.u32 %v5622_v59, 16 }
 0x2a4   : > { %v2315_v48 = vpop.f32.mrf.mxu2 }
 0x2a5   : > { %v3069_v42 = vmax.f32 %v3033_v25, 0.0  ;;  %v2389_v36 = vadd.f32 %v2315_v48, %v5220_v7 }
 0x2a6   : > { %v2687_v32 = vpop.f32.mrf.mxu3  ;;  %v2923_v10 = vpop.f32.mrf.mxu0 }
 0x2a7   : > { %v2758_v3 = vadd.f32 %v2684_v21, %v2389_v36  ;;  %3657 = vst.msk [vmem:[%s5499_s8 + $0x50] sm:$0xff] %vm3133_vm8, %v3069_v42 }
 0x2a9   : > { %4527 = vmatmul.msk.bf16.gmra.mxu0 %vm555_vm1, %v2820_v14  ;;  %v2994_v53 = vadd.f32 %v2920_v51, %v2758_v3  ;;  %4489 = vmatmul.msk.bf16.gmra.mxu2 %vm555_vm1, %v2215_v40  ;;  %v2821_v51 = vrot.slane %v5600_v30, 3 }
 0x2ab   : > { %v3034_v7 = vadd.f32 %v5481_v1, %v2994_v53  ;;  %v2822_v30 = vsel %vm2789_vm7, %v2819_v8, %v2821_v51 }
 0x2ac   : > { %v2318_v45 = vpop.f32.mrf.mxu2 }
 0x2ad   : > { %v3070_v4 = vmax.f32 %v3034_v7, 0.0  ;;  %v2390_v5 = vadd.f32 %v2318_v45, %v5228_v2  ;;  %v2030_v2 = vadd.f32 %v5215_v15, %v5238_v19  ;;  %v2414_v15 = vld [vmem:[%s4795_s12 + $0xa0] sm:$0x7] }
 0x2ae   : > { %v2689_v12 = vpop.f32.mrf.mxu3  ;;  %v2925_v6 = vpop.f32.mrf.mxu0  ;;  %v2418_v3 = vunpack.c.l.b16 %v2414_v15 }
 0x2af   : > { %v2759_v9 = vadd.f32 %v2687_v32, %v2390_v5  ;;  %v3100_v17 = vpack.c.bf16 %v3070_v4, %v3069_v42  ;;  %3658 = vst.msk [vmem:[%s5499_s8 + $0x58] sm:$0xff] %vm3133_vm8, %v3070_v4  ;;  %v2217_v42 = vsel %vm1823_vm3, %v2214_v23, %v2216_v24  ;;  %v2576_v32 = vrot.slane %v2574_v47, 2 }
 0x2b0   : > { %v2419_v5 = vpack.c.b16 %v2418_v3, %v2418_v3 }
 0x2b1   : > { %v2995_v21 = vadd.f32 %v2923_v10, %v2759_v9  ;;  %4544 = vmatmul.msk.bf16.gmra.mxu1 %vm3133_vm8, %v3100_v17  ;;  %v2579_v10 = vrot.slane %v2577_v28, 3  ;;  %v2218_v9 = vrot.slane %v5622_v59, 2  ;;  %v6525_v17 = vld [vmem:[#allocation4_spill] sm:$0xff] }
 0x2b3   : > { %4509 = vmatmul.msk.bf16.gmra.mxu3 %vm555_vm1, %v2572_v52  ;;  %v3035_v46 = vadd.f32 %v5481_v1, %v2995_v21  ;;  %v2580_v40 = vor.u32 %v2579_v10, %v2576_v32 }
 0x2b4   : > { %v2320_v60 = vpop.f32.mrf.mxu2 }
 0x2b5   : > { %v3071_v25 = vmax.f32 %v3035_v46, 0.0  ;;  %v2391_v26 = vadd.f32 %v2320_v60, %v2030_v2  ;;  %v2581_v4 = vsel %vm2420_vm6, %v2571_v57, %v2580_v40  ;;  %v2583_v57 = vshrl.u32 %v2419_v5, 16 }
 0x2b6   : > { %v2692_v63 = vpop.f32.mrf.mxu3  ;;  %v2928_v48 = vpop.f32.mrf.mxu0  ;;  %v2586_v2 = vshll.u32 %v2419_v5, 16 }
 0x2b7   : > { %v2760_v36 = vadd.f32 %v2689_v12, %v2391_v26  ;;  %3659 = vst.msk [vmem:[%s5499_s8 + $0x60] sm:$0xff] %vm3133_vm8, %v3071_v25 }
 0x2b9   : > { %4528 = vmatmul.msk.bf16.gmra.mxu0 %vm555_vm1, %v2822_v30  ;;  %v2996_v19 = vadd.f32 %v2925_v6, %v2760_v36  ;;  %4490 = vmatmul.msk.bf16.gmra.mxu2 %vm555_vm1, %v2217_v42  ;;  %v2823_v6 = vrot.slane %v5622_v59, 3  ;;  %v2585_v30 = vrot.slane %v2583_v57, 2  ;;  %v2588_v42 = vrot.slane %v2586_v2, 3  ;;  %v5672_v2 = vpop.f32.mrf.mxu1 }
 0x2bb   : > { %v3036_v14 = vadd.f32 %v5481_v1, %v2996_v19  ;;  %v2824_v26 = vsel %vm2789_vm7, %v2821_v51, %v2823_v6  ;;  %v2589_v15 = vor.u32 %v2588_v42, %v2585_v30 }
 0x2bc   : > { %v2323_v55 = vpop.f32.mrf.mxu2 }
 0x2bd   : > { %v3072_v8 = vmax.f32 %v3036_v14, 0.0  ;;  %v2392_v23 = vadd.f32 %v2323_v55, %v5248_v56  ;;  %v6524_v56 = vld [vmem:[#allocation6_spill] sm:$0xff] }
 0x2be   : > { %v2694_v58 = vpop.f32.mrf.mxu3  ;;  %v2930_v53 = vpop.f32.mrf.mxu0  ;;  %v2032_v52 = vadd.f32 %v6525_v17, %v6524_v56 }
 0x2bf   : > { %v2761_v7 = vadd.f32 %v2692_v63, %v2392_v23  ;;  %v3101_v45 = vpack.c.bf16 %v3072_v8, %v3071_v25  ;;  %3660 = vst.msk [vmem:[%s5499_s8 + $0x68] sm:$0xff] %vm3133_vm8, %v3072_v8  ;;  %v2219_v63 = vsel %vm1823_vm3, %v2216_v24, %v2218_v9 }
 0x2c1   : > { %v2997_v12 = vadd.f32 %v2928_v48, %v2761_v7  ;;  %4545 = vmatmul.msk.bf16.gmra.mxu1 %vm3133_vm8, %v3101_v45  ;;  %v2089_v48 = vld [vmem:[%s4795_s12 + $0xa0] sm:$0x3]  ;;  %v2825_v7 = vrot.slane %v2419_v5, 3  ;;  %s4724_s12 = smov 120  }
 0x2c2   : > { %v2165_v32 = vunpack.c.l.b16 %v2089_v48 }
 0x2c3   : > { %4510 = vmatmul.msk.bf16.gmra.mxu3 %vm555_vm1, %v2581_v4  ;;  %v3037_v21 = vadd.f32 %v5481_v1, %v2997_v12  ;;  %v6526_v4 = vld [vmem:[#allocation5_spill] sm:$0xff]  ;;  %v2826_v57 = vsel %vm2789_vm7, %v2823_v6, %v2825_v7 }
 0x2c4   : > { %v2325_v46 = vpop.f32.mrf.mxu2  ;;  %v2184_v55 = vpack.c.b16 %v2165_v32, %v2165_v32 }
 0x2c5   : > { %v3073_v47 = vmax.f32 %v3037_v21, 0.0  ;;  %v2393_v28 = vadd.f32 %v2325_v46, %v2032_v52 }
 0x2c6   : > { %v2697_v60 = vpop.f32.mrf.mxu3  ;;  %v2933_v25 = vpop.f32.mrf.mxu0  ;;  %v2220_v45 = vrot.slane %v2184_v55, 2 }
 0x2c7   : > { %v2762_v59 = vadd.f32 %v2694_v58, %v2393_v28  ;;  %3661 = vst.msk [vmem:[%s5499_s8 + $0x70] sm:$0xff] %vm3133_vm8, %v3073_v47  ;;  %v2590_v58 = vsel %vm2420_vm6, %v2580_v40, %v2589_v15  ;;  %v5683_v28 = vld [vmem:[%s6510_s4] ss:$0 sm:$0xff] }
 0x2c8   : > { %v2221_v46 = vsel %vm1823_vm3, %v2218_v9, %v2220_v45 }
 0x2c9   : > { %4529 = vmatmul.msk.bf16.gmra.mxu0 %vm555_vm1, %v2824_v26  ;;  %v2998_v36 = vadd.f32 %v2930_v53, %v2762_v59  ;;  %4491 = vmatmul.msk.bf16.gmra.mxu2 %vm555_vm1, %v2219_v63 }
 0x2cb   : > { %v3038_v10 = vadd.f32 %v5481_v1, %v2998_v36 }
 0x2cc   : > { %v2328_v19 = vpop.f32.mrf.mxu2 }
 0x2cd   : > { %v3074_v51 = vmax.f32 %v3038_v10, 0.0  ;;  %v2394_v24 = vadd.f32 %v2328_v19, %v5276_v43  ;;  %v2034_v43 = vadd.f32 %v6526_v4, %v5289_v22 }
 0x2ce   : > { %v2699_v14 = vpop.f32.mrf.mxu3  ;;  %v2935_v3 = vpop.f32.mrf.mxu0 }
 0x2cf   : > { %v2763_v8 = vadd.f32 %v2697_v60, %v2394_v24  ;;  %v3102_v23 = vpack.c.bf16 %v3074_v51, %v3073_v47  ;;  %3662 = vst.msk [vmem:[%s5499_s8 + $0x78] sm:$0xff] %vm3133_vm8, %v3074_v51 }
 0x2d1   : > { %v2999_v53 = vadd.f32 %v2933_v25, %v2763_v8  ;;  %4546 = vmatmul.msk.bf16.gmra.mxu1 %vm3133_vm8, %v3102_v23 }
 0x2d3   : > { %4511 = vmatmul.msk.bf16.gmra.mxu3 %vm555_vm1, %v2590_v58  ;;  %v3039_v12 = vadd.f32 %v5481_v1, %v2999_v53 }
 0x2d4   : > { %v2330_v56 = vpop.f32.mrf.mxu2 }
 0x2d5   : > { %v3075_v17 = vmax.f32 %v3039_v12, 0.0  ;;  %v2395_v52 = vadd.f32 %v2330_v56, %v2034_v43 }
 0x2d6   : > { %v2702_v21 = vpop.f32.mrf.mxu3  ;;  %v2938_v40 = vpop.f32.mrf.mxu0 }
 0x2d7   : > { %v2764_v5 = vadd.f32 %v2699_v14, %v2395_v52  ;;  %3663 = vst.msk [vmem:[%s5499_s8 + $0x80] sm:$0xff] %vm3133_vm8, %v3075_v17 }
 0x2d9   : > { %4530 = vmatmul.msk.bf16.gmra.mxu0 %vm555_vm1, %v2826_v57  ;;  %v3000_v22 = vadd.f32 %v2935_v3, %v2764_v5  ;;  %4492 = vmatmul.msk.bf16.gmra.mxu2 %vm555_vm1, %v2221_v46  ;;  %v2038_v46 = vadd.f32 %v5307_v16, %v5332_v27 }
 0x2db   : > { %v3040_v47 = vadd.f32 %v5481_v1, %v3000_v22 }
 0x2dc   : > { %v2333_v6 = vpop.f32.mrf.mxu2 }
 0x2dd   : > { %v3076_v60 = vmax.f32 %v3040_v47, 0.0  ;;  %v2396_v9 = vadd.f32 %v2333_v6, %v5300_v49  ;;  %v2036_v49 = vadd.f32 %v5284_v33, %v5311_v34 }
 0x2de   : > { %v2704_v25 = vpop.f32.mrf.mxu3  ;;  %v2940_v26 = vpop.f32.mrf.mxu0 }
 0x2df   : > { %v3197_v63 = vpop.f32.mrf.mxu1  ;;  %v2765_v59 = vadd.f32 %v2702_v21, %v2396_v9  ;;  %v3103_v30 = vpack.c.bf16 %v3076_v60, %v3075_v17  ;;  %3664 = vst.msk [vmem:[%s5499_s8 + $0x88] sm:$0xff] %vm3133_vm8, %v3076_v60 }
 0x2e0   : > { %v5687_v48 = vadd.f32 %v5683_v28, %v3197_v63 }
 0x2e1   : > { %v3001_v42 = vadd.f32 %v2938_v40, %v2765_v59  ;;  %4547 = vmatmul.msk.bf16.gmra.mxu1 %vm3133_vm8, %v3103_v30 }
 0x2e2   : > { %v3323_v36 = vmul.f32 0.5, %v5687_v48  ;;  %3900 = vrot.lane.b32.xlu0 %v5687_v48, %s4723_s11 }
 0x2e3   : > { %v3041_v32 = vadd.f32 %v5481_v1, %v3001_v42 }
 0x2e4   : > { %v3359_v10 = vmul.f32 1.442695, %v3323_v36  ;;  %v2335_v15 = vpop.f32.mrf.mxu2 }
 0x2e5   : > { %v3077_v19 = vmax.f32 %v3041_v32, 0.0  ;;  %v2397_v51 = vadd.f32 %v2335_v15, %v2036_v49 }
 0x2e6   : > { %4636 = vpow2.f32 %v3359_v10  ;;  %v2707_v24 = vpop.f32.mrf.mxu3  ;;  %v2943_v14 = vpop.f32.mrf.mxu0 }
 0x2e7   : > { %v3199_v3 = vpop.f32.mrf.mxu1  ;;  %v2766_v55 = vadd.f32 %v2704_v25, %v2397_v51  ;;  %3665 = vst.msk [vmem:[%s5499_s8 + $0x90] sm:$0xff] %vm3133_vm8, %v3077_v19 }
 0x2e8   : > { %v5699_v8 = vadd.f32 %v5683_v28, %v3199_v3 }
 0x2e9   : > { %v3002_v23 = vadd.f32 %v2940_v26, %v2766_v55 }
 0x2ea   : > { %v3324_v58 = vmul.f32 0.5, %v5699_v8  ;;  %3902 = vrot.lane.b32.xlu1 %v5699_v8, %s4723_s11 }
 0x2eb   : > { %v3042_v34 = vadd.f32 %v5481_v1, %v3002_v23 }
 0x2ec   : > { %v4637_v33 = vpop.eup %4636  ;;  %v3361_v53 = vmul.f32 1.442695, %v3324_v58  ;;  %v2338_v7 = vpop.f32.mrf.mxu2 }
 0x2ed   : > { %3467 = vrot.lane.b32.xlu0 %v4637_v33, %s4724_s12  ;;  %v3078_v45 = vmax.f32 %v3042_v34, 0.0  ;;  %v2398_v4 = vadd.f32 %v2338_v7, %v5321_v31 }
 0x2ee   : > { %4638 = vpow2.f32 %v3361_v53  ;;  %v2709_v43 = vpop.f32.mrf.mxu3  ;;  %v2945_v12 = vpop.f32.mrf.mxu0 }
 0x2ef   : > { %v3202_v56 = vpop.f32.mrf.mxu1  ;;  %v2767_v17 = vadd.f32 %v2707_v24, %v2398_v4  ;;  %v3104_v21 = vpack.c.bf16 %v3078_v45, %v3077_v19  ;;  %3666 = vst.msk [vmem:[%s5499_s8 + $0x98] sm:$0xff] %vm3133_vm8, %v3078_v45 }
 0x2f0   : > { %v5710_v52 = vadd.f32 %v5683_v28, %v3202_v56 }
 0x2f1   : > { %v3003_v57 = vadd.f32 %v2943_v14, %v2767_v17  ;;  %4548 = vmatmul.msk.bf16.gmra.mxu1 %vm3133_vm8, %v3104_v21 }
 0x2f2   : > { %v3325_v40 = vmul.f32 0.5, %v5710_v52  ;;  %3904 = vrot.lane.b32.xlu2 %v5710_v52, %s4723_s11 }
 0x2f3   : > { %v3043_v22 = vadd.f32 %v5481_v1, %v3003_v57 }
 0x2f4   : > { %v4639_v31 = vpop.eup %4638  ;;  %v3363_v5 = vmul.f32 1.442695, %v3325_v40  ;;  %v2340_v47 = vpop.f32.mrf.mxu2 }
 0x2f5   : > { %3469 = vrot.lane.b32.xlu0 %v4639_v31, %s4724_s12  ;;  %v3079_v6 = vmax.f32 %v3043_v22, 0.0  ;;  %v2399_v60 = vadd.f32 %v2340_v47, %v2038_v46 }
 0x2f6   : > { %4640 = vpow2.f32 %v3363_v5  ;;  %v2712_v9 = vpop.f32.mrf.mxu3  ;;  %v2948_v25 = vpop.f32.mrf.mxu0 }
 0x2f7   : > { %v3204_v26 = vpop.f32.mrf.mxu1  ;;  %v2768_v63 = vadd.f32 %v2709_v43, %v2399_v60  ;;  %3667 = vst.msk [vmem:[%s5499_s8 + $0xa0] sm:$0xff] %vm3133_vm8, %v3079_v6 }
 0x2f8   : > { %v5725_v59 = vadd.f32 %v5683_v28, %v3204_v26 }
 0x2f9   : > { %v3004_v16 = vadd.f32 %v2945_v12, %v2768_v63 }
 0x2fa   : > { %v3326_v36 = vmul.f32 0.5, %v5725_v59 }
 0x2fb   : > { %v3044_v30 = vadd.f32 %v5481_v1, %v3004_v16 }
 0x2fc   : > { %v4641_v27 = vpop.eup %4640  ;;  %v2343_v42 = vpop.f32.mrf.mxu2  ;;  %v3365_v3 = vmul.f32 1.442695, %v3326_v36 }
 0x2fd   : > { %3906 = vrot.lane.b32.xlu0 %v5725_v59, %s4723_s11  ;;  %3471 = vrot.lane.b32.xlu1 %v4641_v27, %s4724_s12  ;;  %v3080_v49 = vmax.f32 %v3044_v30, 0.0  ;;  %v2400_v32 = vadd.f32 %v2343_v42, %v5342_v20  ;;  %v2040_v20 = vadd.f32 %v5328_v39, %v5353_v38 }
 0x2fe   : > { %v2714_v10 = vpop.f32.mrf.mxu3  ;;  %v2950_v15 = vpop.f32.mrf.mxu0  ;;  %4642 = vpow2.f32 %v3365_v3 }
 0x2ff   : > { %v3207_v19 = vpop.f32.mrf.mxu1  ;;  %v3105_v51 = vpack.c.bf16 %v3080_v49, %v3079_v6  ;;  %v2769_v24 = vadd.f32 %v2712_v9, %v2400_v32  ;;  %3668 = vst.msk [vmem:[%s5499_s8 + $0xa8] sm:$0xff] %vm3133_vm8, %v3080_v49 }
 0x300   : > { %v5734_v14 = vadd.f32 %v5683_v28, %v3207_v19 }
 0x301   : > { %v3005_v55 = vadd.f32 %v2948_v25, %v2769_v24  ;;  %4549 = vmatmul.msk.bf16.gmra.mxu1 %vm3133_vm8, %v3105_v51 }
 0x302   : > { %v3327_v23 = vmul.f32 0.5, %v5734_v14 }
 0x303   : > { %v3045_v58 = vadd.f32 %v5481_v1, %v3005_v55 }
 0x304   : > { %v2345_v33 = vpop.f32.mrf.mxu2  ;;  %v3367_v4 = vmul.f32 1.442695, %v3327_v23  ;;  %v4643_v17 = vpop.eup %4642 }
 0x305   : > { %3908 = vrot.lane.b32.xlu1 %v5734_v14, %s4723_s11  ;;  %v3081_v34 = vmax.f32 %v3045_v58, 0.0  ;;  %v2401_v53 = vadd.f32 %v2345_v33, %v2040_v20 }
 0x306   : > { %v2717_v7 = vpop.f32.mrf.mxu3  ;;  %v2953_v45 = vpop.f32.mrf.mxu0  ;;  %4644 = vpow2.f32 %v3367_v4 }
 0x307   : > { %v3209_v43 = vpop.f32.mrf.mxu1  ;;  %v2770_v12 = vadd.f32 %v2714_v10, %v2401_v53  ;;  %3669 = vst.msk [vmem:[%s5499_s8 + $0xb0] sm:$0xff] %vm3133_vm8, %v3081_v34 }
 0x308   : > { %v5746_v56 = vadd.f32 %v5683_v28, %v3209_v43 }
 0x309   : > { %v3006_v39 = vadd.f32 %v2950_v15, %v2770_v12 }
 0x30a   : > { %3910 = vrot.lane.b32.xlu2 %v5746_v56, %s4723_s11  ;;  %v3328_v38 = vmul.f32 0.5, %v5746_v56 }
 0x30b   : > { %v3046_v21 = vadd.f32 %v5481_v1, %v3006_v39  ;;  %v2044_v39 = vadd.f32 %v5374_v50, %v5393_v35 }
 0x30c   : > { %v2348_v40 = vpop.f32.mrf.mxu2  ;;  %v3369_v22 = vmul.f32 1.442695, %v3328_v38  ;;  %v4645_v25 = vpop.eup %4644 }
 0x30d   : > { %3473 = vrot.lane.b32.xlu1 %v4643_v17, %s4724_s12  ;;  %v3082_v57 = vmax.f32 %v3046_v21, 0.0  ;;  %v2402_v31 = vadd.f32 %v2348_v40, %v5363_v11  ;;  %v2042_v11 = vadd.f32 %v5349_v54, %v5372_v29 }
 0x30e   : > { %v2719_v46 = vpop.f32.mrf.mxu3  ;;  %v2955_v5 = vpop.f32.mrf.mxu0  ;;  %4646 = vpow2.f32 %v3369_v22 }
 0x30f   : > { %v3212_v47 = vpop.f32.mrf.mxu1  ;;  %v3106_v6 = vpack.c.bf16 %v3082_v57, %v3081_v34  ;;  %v2771_v60 = vadd.f32 %v2717_v7, %v2402_v31  ;;  %3670 = vst.msk [vmem:[%s5499_s8 + $0xb8] sm:$0xff] %vm3133_vm8, %v3082_v57 }
 0x310   : > { %v5757_v9 = vadd.f32 %v5683_v28, %v3212_v47 }
 0x311   : > { %v3007_v63 = vadd.f32 %v2953_v45, %v2771_v60  ;;  %4550 = vmatmul.msk.bf16.gmra.mxu1 %vm3133_vm8, %v3106_v6 }
 0x312   : > { %v3329_v26 = vmul.f32 0.5, %v5757_v9  ;;  %3475 = vrot.lane.b32.xlu2 %v4645_v25, %s4724_s12  ;;  %3912 = vrot.lane.b32.xlu0 %v5757_v9, %s4723_s11 }
 0x313   : > { %v3047_v27 = vadd.f32 %v5481_v1, %v3007_v63 }
 0x314   : > { %v3371_v16 = vmul.f32 1.442695, %v3329_v26  ;;  %v2350_v30 = vpop.f32.mrf.mxu2  ;;  %v4647_v51 = vpop.eup %4646 }
 0x315   : > { %v3083_v42 = vmax.f32 %v3047_v27, 0.0  ;;  %v2403_v36 = vadd.f32 %v2350_v30, %v2042_v11 }
 0x316   : > { %4648 = vpow2.f32 %v3371_v16  ;;  %v2722_v49 = vpop.f32.mrf.mxu3  ;;  %v2958_v32 = vpop.f32.mrf.mxu0 }
 0x317   : > { %v3214_v10 = vpop.f32.mrf.mxu1  ;;  %v2772_v15 = vadd.f32 %v2719_v46, %v2403_v36  ;;  %3671 = vst.msk [vmem:[%s5499_s8 + $0xc0] sm:$0xff] %vm3133_vm8, %v3083_v42 }
 0x318   : > { %v5770_v19 = vadd.f32 %v5683_v28, %v3214_v10 }
 0x319   : > { %v3008_v54 = vadd.f32 %v2955_v5, %v2772_v15  ;;  %v6527_v15 = vld [vmem:[#allocation7_spill] sm:$0xff] }
 0x31a   : > { %v3330_v24 = vmul.f32 0.5, %v5770_v19  ;;  %3477 = vrot.lane.b32.xlu2 %v4647_v51, %s4724_s12  ;;  %3914 = vrot.lane.b32.xlu1 %v5770_v19, %s4723_s11  ;;  %v2046_v51 = vadd.f32 %v6527_v15, %v5414_v44 }
 0x31b   : > { %v3048_v55 = vadd.f32 %v5481_v1, %v3008_v54 }
 0x31c   : > { %v4649_v29 = vpop.eup %4648  ;;  %v3373_v3 = vmul.f32 1.442695, %v3330_v24  ;;  %v2353_v23 = vpop.f32.mrf.mxu2 }
 0x31d   : > { %3479 = vrot.lane.b32.xlu0 %v4649_v29, %s4724_s12  ;;  %v3084_v20 = vmax.f32 %v3048_v55, 0.0  ;;  %v2404_v58 = vadd.f32 %v2353_v23, %v5384_v18 }
 0x31e   : > { %4650 = vpow2.f32 %v3373_v3  ;;  %v2724_v33 = vpop.f32.mrf.mxu3  ;;  %v2960_v34 = vpop.f32.mrf.mxu0 }
 0x31f   : > { %v3217_v53 = vpop.f32.mrf.mxu1  ;;  %v3107_v7 = vpack.c.bf16 %v3084_v20, %v3083_v42  ;;  %v2773_v45 = vadd.f32 %v2722_v49, %v2404_v58  ;;  %3672 = vst.msk [vmem:[%s5499_s8 + $0xc8] sm:$0xff] %vm3133_vm8, %v3084_v20 }
 0x320   : > { %v5782_v4 = vadd.f32 %v5683_v28, %v3217_v53 }
 0x321   : > { %v3009_v12 = vadd.f32 %v2958_v32, %v2773_v45  ;;  %4551 = vmatmul.msk.bf16.gmra.mxu1 %vm3133_vm8, %v3107_v7  ;;  %v5829_v45 = vld [vmem:[%s6508_s2] ss:$0 sm:$0xff] }
 0x322   : > { %v3331_v43 = vmul.f32 0.5, %v5782_v4  ;;  %3916 = vrot.lane.b32.xlu2 %v5782_v4, %s4723_s11 }
 0x323   : > { %v3049_v17 = vadd.f32 %v5481_v1, %v3009_v12 }
 0x324   : > { %v4651_v18 = vpop.eup %4650  ;;  %v3375_v38 = vmul.f32 1.442695, %v3331_v43  ;;  %v2355_v21 = vpop.f32.mrf.mxu2 }
 0x325   : > { %3481 = vrot.lane.b32.xlu1 %v4651_v18, %s4724_s12  ;;  %v3085_v40 = vmax.f32 %v3049_v17, 0.0  ;;  %v2405_v57 = vadd.f32 %v2355_v21, %v2044_v39 }
 0x326   : > { %4652 = vpow2.f32 %v3375_v38  ;;  %v2727_v31 = vpop.f32.mrf.mxu3  ;;  %v2963_v46 = vpop.f32.mrf.mxu0 }
 0x327   : > { %v3219_v5 = vpop.f32.mrf.mxu1  ;;  %v2774_v22 = vadd.f32 %v2724_v33, %v2405_v57  ;;  %3673 = vst.msk [vmem:[%s5499_s8 + $0xd0] sm:$0xff] %vm3133_vm8, %v3085_v40 }
 0x328   : > { %v5795_v47 = vadd.f32 %v5683_v28, %v3219_v5 }
 0x329   : > { %v3010_v35 = vadd.f32 %v2960_v34, %v2774_v22  ;;  %v6528_v22 = vld [vmem:[#allocation8_spill] sm:$0xff] }
 0x32a   : > { %v3332_v50 = vmul.f32 0.5, %v5795_v47  ;;  %3918 = vrot.lane.b32.xlu0 %v5795_v47, %s4723_s11 }
 0x32b   : > { %v3050_v25 = vadd.f32 %v5481_v1, %v3010_v35 }
 0x32c   : > { %v4653_v6 = vpop.eup %4652  ;;  %v3377_v60 = vmul.f32 1.442695, %v3332_v50  ;;  %v2358_v26 = vpop.f32.mrf.mxu2  ;;  %v2048_v50 = vadd.f32 %v6528_v22, %v5435_v61  ;;  %v3287_v22 = vld [vmem:[%s5885_s17] sm:$0xff] }
 0x32d   : > { %3483 = vrot.lane.b32.xlu2 %v4653_v6, %s4724_s12  ;;  %v3086_v63 = vmax.f32 %v3050_v25, 0.0  ;;  %v2406_v11 = vadd.f32 %v2358_v26, %v5405_v13 }
 0x32e   : > { %4654 = vpow2.f32 %v3377_v60  ;;  %v2729_v16 = vpop.f32.mrf.mxu3  ;;  %v2965_v27 = vpop.f32.mrf.mxu0 }
 0x32f   : > { %v3222_v30 = vpop.f32.mrf.mxu1  ;;  %v3108_v42 = vpack.c.bf16 %v3086_v63, %v3085_v40  ;;  %v2775_v36 = vadd.f32 %v2727_v31, %v2406_v11  ;;  %3674 = vst.msk [vmem:[%s5499_s8 + $0xd8] sm:$0xff] %vm3133_vm8, %v3086_v63 }
 0x330   : > { %v5806_v49 = vadd.f32 %v5683_v28, %v3222_v30 }
 0x331   : > { %v3011_v10 = vadd.f32 %v2963_v46, %v2775_v36  ;;  %4552 = vmatmul.msk.bf16.gmra.mxu1 %vm3133_vm8, %v3108_v42 }
 0x332   : > { %v3333_v32 = vmul.f32 0.5, %v5806_v49  ;;  %3920 = vrot.lane.b32.xlu1 %v5806_v49, %s4723_s11 }
 0x333   : > { %v3051_v54 = vadd.f32 %v5481_v1, %v3011_v10 }
 0x334   : > { %v4655_v13 = vpop.eup %4654  ;;  %v3379_v24 = vmul.f32 1.442695, %v3333_v32  ;;  %v2360_v29 = vpop.f32.mrf.mxu2 }
 0x335   : > { %3485 = vrot.lane.b32.xlu0 %v4655_v13, %s4724_s12  ;;  %v3087_v3 = vmax.f32 %v3051_v54, 0.0  ;;  %v2407_v55 = vadd.f32 %v2360_v29, %v2046_v51  ;;  %v6529_v51 = vld [vmem:[#allocation9_spill] sm:$0xff] }
 0x336   : > { %4656 = vpow2.f32 %v3379_v24  ;;  %v2732_v23 = vpop.f32.mrf.mxu3  ;;  %v2968_v20 = vpop.f32.mrf.mxu0 }
 0x337   : > { %v3224_v58 = vpop.f32.mrf.mxu1  ;;  %v2776_v33 = vadd.f32 %v2729_v16, %v2407_v55  ;;  %3675 = vst.msk [vmem:[%s5499_s8 + $0xe0] sm:$0xff] %vm3133_vm8, %v3087_v3 }
 0x338   : > { %v5819_v34 = vadd.f32 %v5683_v28, %v3224_v58 }
 0x339   : > { %v3012_v53 = vadd.f32 %v2965_v27, %v2776_v33 }
 0x33a   : > { %v3334_v44 = vmul.f32 0.5, %v5819_v34  ;;  %3922 = vrot.lane.b32.xlu2 %v5819_v34, %s4723_s11 }
 0x33b   : > { %v3052_v43 = vadd.f32 %v5829_v45, %v3012_v53  ;;  %v2050_v53 = vadd.f32 %v5452_v0, %v5456_v62 }
 0x33c   : > { %v4657_v1 = vpop.eup %4656  ;;  %v3381_v7 = vmul.f32 1.442695, %v3334_v44  ;;  %v2363_v12 = vpop.f32.mrf.mxu2 }
 0x33d   : > { %3487 = vrot.lane.b32.xlu1 %v4657_v1, %s4724_s12  ;;  %v3088_v18 = vmax.f32 %v3052_v43, 0.0  ;;  %v2408_v39 = vadd.f32 %v2363_v12, %v5426_v37 }
 0x33e   : > { %4658 = vpow2.f32 %v3381_v7  ;;  %v2734_v38 = vpop.f32.mrf.mxu3  ;;  %v2970_v17 = vpop.f32.mrf.mxu0 }
 0x33f   : > { %v3227_v21 = vpop.f32.mrf.mxu1  ;;  %v3109_v40 = vpack.c.bf16 %v3088_v18, %v3087_v3  ;;  %v2777_v57 = vadd.f32 %v2732_v23, %v2408_v39  ;;  %3676 = vst.msk [vmem:[%s5499_s8 + $0xe8] sm:$0xff] %vm3133_vm8, %v3088_v18 }
 0x340   : > { %v5835_v31 = vadd.f32 %v5683_v28, %v3227_v21 }
 0x341   : > { %v3013_v5 = vadd.f32 %v2968_v20, %v2777_v57  ;;  %4553 = vmatmul.msk.bf16.gmra.mxu1 %vm3133_vm8, %v3109_v40 }
 0x342   : > { %v3335_v46 = vmul.f32 0.5, %v5835_v31  ;;  %3924 = vrot.lane.b32.xlu0 %v5835_v31, %s4723_s11 }
 0x343   : > { %v3053_v6 = vadd.f32 %v5829_v45, %v3013_v5 }
 0x344   : > { %v4659_v37 = vpop.eup %4658  ;;  %v3383_v35 = vmul.f32 1.442695, %v3335_v46  ;;  %v2365_v60 = vpop.f32.mrf.mxu2 }
 0x345   : > { %3489 = vrot.lane.b32.xlu2 %v4659_v37, %s4724_s12  ;;  %v3089_v25 = vmax.f32 %v3053_v6, 0.0  ;;  %v2409_v26 = vadd.f32 %v2365_v60, %v2048_v50 }
 0x346   : > { %4660 = vpow2.f32 %v3383_v35  ;;  %v2737_v11 = vpop.f32.mrf.mxu3  ;;  %v2973_v30 = vpop.f32.mrf.mxu0 }
 0x347   : > { %v3229_v63 = vpop.f32.mrf.mxu1  ;;  %v2778_v16 = vadd.f32 %v2734_v38, %v2409_v26  ;;  %3677 = vst.msk [vmem:[%s5499_s8 + $0xf0] sm:$0xff] %vm3133_vm8, %v3089_v25 }
 0x348   : > { %v5848_v27 = vadd.f32 %v5683_v28, %v3229_v63 }
 0x349   : > { %v3014_v42 = vadd.f32 %v2970_v17, %v2778_v16 }
 0x34a   : > { %v3336_v61 = vmul.f32 0.5, %v5848_v27  ;;  %3926 = vrot.lane.b32.xlu1 %v5848_v27, %s4723_s11 }
 0x34b   : > { %v3054_v10 = vadd.f32 %v5829_v45, %v3014_v42 }
 0x34c   : > { %v4661_v36 = vpop.eup %4660  ;;  %v3385_v32 = vmul.f32 1.442695, %v3336_v61  ;;  %v2368_v13 = vpop.f32.mrf.mxu2 }
 0x34d   : > { %3491 = vrot.lane.b32.xlu0 %v4661_v36, %s4724_s12  ;;  %v3090_v15 = vmax.f32 %v3054_v10, 0.0  ;;  %v2410_v24 = vadd.f32 %v2368_v13, %v6529_v51  ;;  %v5903_v36 = vpop.permute.xlu2 %3904  ;;  %v3288_v13 = vld [vmem:[%s5885_s17 + $0x8] sm:$0xff] }
 0x34e   : > { %4662 = vpow2.f32 %v3385_v32  ;;  %v2739_v23 = vpop.f32.mrf.mxu3  ;;  %v2975_v33 = vpop.f32.mrf.mxu0 }
 0x34f   : > { %v3232_v54 = vpop.f32.mrf.mxu1  ;;  %v3110_v29 = vpack.c.bf16 %v3090_v15, %v3089_v25  ;;  %v2779_v3 = vadd.f32 %v2737_v11, %v2410_v24  ;;  %3678 = vst.msk [vmem:[%s5499_s8 + $0xf8] sm:$0xff] %vm3133_vm8, %v3090_v15 }
 0x350   : > { %v5859_v55 = vadd.f32 %v5683_v28, %v3232_v54 }
 0x351   : > { %v3015_v58 = vadd.f32 %v2973_v30, %v2779_v3  ;;  %4554 = vmatmul.msk.bf16.gmra.mxu1 %vm3133_vm8, %v3110_v29 }
 0x352   : > { %v3337_v20 = vmul.f32 0.5, %v5859_v55  ;;  %3928 = vrot.lane.b32.xlu2 %v5859_v55, %s4723_s11 }
 0x353   : > { %v3055_v7 = vadd.f32 %v5829_v45, %v3015_v58 }
 0x354   : > { %v4663_v44 = vpop.eup %4662  ;;  %v3387_v1 = vmul.f32 1.442695, %v3337_v20  ;;  %v2370_v43 = vpop.f32.mrf.mxu2 }
 0x355   : > { %3493 = vrot.lane.b32.xlu1 %v4663_v44, %s4724_s12  ;;  %v3091_v12 = vmax.f32 %v3055_v7, 0.0  ;;  %v2411_v18 = vadd.f32 %v2370_v43, %v2050_v53  ;;  %v5871_v39 = vpop.permute.xlu0 %3900 }
 0x356   : > { %4664 = vpow2.f32 %v3387_v1  ;;  %v2742_v0 = vpop.f32.mrf.mxu3  ;;  %v2978_v46 = vpop.f32.mrf.mxu0 }
 0x357   : > { %v3234_v38 = vpop.f32.mrf.mxu1  ;;  %v2780_v17 = vadd.f32 %v2739_v23, %v2411_v18  ;;  %3679 = vst.msk [vmem:[%s5499_s8 + $0x100] sm:$0xff] %vm3133_vm8, %v3091_v12 }
 0x358   : > { %v5874_v21 = vadd.f32 %v5683_v28, %v3234_v38 }
 0x359   : > { %v3016_v40 = vadd.f32 %v2975_v33, %v2780_v17 }
 0x35a   : > { %3930 = vrot.lane.b32.xlu0 %v5874_v21, %s4723_s11  ;;  %v3338_v5 = vmul.f32 0.5, %v5874_v21 }
 0x35b   : > { %v3056_v57 = vadd.f32 %v5829_v45, %v3016_v40 }
 0x35c   : > { %v4665_v62 = vpop.eup %4664  ;;  %v2373_v37 = vpop.f32.mrf.mxu2  ;;  %v3389_v16 = vmul.f32 1.442695, %v3338_v5 }
 0x35d   : > { %3495 = vrot.lane.b32.xlu2 %v4665_v62, %s4724_s12  ;;  %v3092_v50 = vmax.f32 %v3056_v57, 0.0  ;;  %v2412_v35 = vadd.f32 %v2373_v37, %v5466_v41  ;;  %v6530_v41 = vld [vmem:[#allocation2_spill] sm:$0xff]  ;;  %v5908_v15 = vpop.permute.xlu1 %3902 }
 0x35e   : > { %v2052_v42 = vadd.f32 %v5672_v2, %v6530_v41  ;;  %4666 = vpow2.f32 %v3389_v16  ;;  %v2980_v29 = vpop.f32.mrf.mxu0 }
 0x35f   : > { %v3468_v6 = vpop.permute.xlu0 %3467  ;;  %v3237_v60 = vpop.f32.mrf.mxu1  ;;  %v3111_v25 = vpack.c.bf16 %v3092_v50, %v3091_v12  ;;  %v2781_v26 = vadd.f32 %v2742_v0, %v2412_v35  ;;  %3680 = vst.msk [vmem:[%s5499_s8 + $0x108] sm:$0xff] %vm3133_vm8, %v3092_v50  ;;  %v3289_v12 = vld [vmem:[%s5885_s17 + $0x10] sm:$0xff]  ;;  %v3291_v35 = vld [vmem:[%s5885_s17 + $0x20] sm:$0xff] }
 0x360   : > { %v3575_v63 = vmul.f32 %v3468_v6, %v3287_v22  ;;  %v5893_v11 = vadd.f32 %v5683_v28, %v3237_v60  ;;  %v3290_v60 = vld [vmem:[%s5885_s17 + $0x18] sm:$0xff] }
 0x361   : > { %v3017_v61 = vadd.f32 %v2978_v46, %v2781_v26  ;;  %4555 = vmatmul.msk.bf16.gmra.mxu1 %vm3133_vm8, %v3111_v25 }
 0x362   : > { %v3611_v30 = vadd.f32 %v3575_v63, %v5687_v48  ;;  %3932 = vrot.lane.b32.xlu1 %v5893_v11, %s4723_s11  ;;  %v2744_v48 = vpop.f32.mrf.mxu3  ;;  %v3339_v51 = vmul.f32 0.5, %v5893_v11 }
 0x363   : > { %v3057_v32 = vadd.f32 %v5829_v45, %v3017_v61 }
 0x364   : > { %3719 = vrot.lane.b32.xlu0 %v3611_v30, %s4725_s22  ;;  %v2375_v10 = vpop.f32.mrf.mxu2  ;;  %v3391_v33 = vmul.f32 1.442695, %v3339_v51  ;;  %v4667_v1 = vpop.eup %4666 }
 0x365   : > { %v3093_v24 = vmax.f32 %v3057_v32, 0.0  ;;  %v2413_v54 = vadd.f32 %v2375_v10, %v2052_v42  ;;  %v5924_v38 = vpop.permute.xlu2 %3910 }
 0x366   : > { %4668 = vpow2.f32 %v3391_v33 }
 0x367   : > { %v3470_v2 = vpop.permute.xlu0 %3469  ;;  %v3239_v3 = vpop.f32.mrf.mxu1  ;;  %3681 = vst.msk [vmem:[%s5499_s8 + $0x110] sm:$0xff] %vm3133_vm8, %v3093_v24  ;;  %v2782_v23 = vadd.f32 %v2744_v48, %v2413_v54 }
 0x368   : > { %v3576_v20 = vmul.f32 %v3470_v2, %v3288_v13  ;;  %v5914_v58 = vadd.f32 %v5683_v28, %v3239_v3  ;;  %v3292_v13 = vld [vmem:[%s5885_s17 + $0x28] sm:$0xff] }
 0x369   : > { %v3018_v53 = vadd.f32 %v2980_v29, %v2782_v23 }
 0x36a   : > { %v3612_v44 = vadd.f32 %v3576_v20, %v5699_v8  ;;  %3934 = vrot.lane.b32.xlu2 %v5914_v58, %s4723_s11  ;;  %v3340_v43 = vmul.f32 0.5, %v5914_v58 }
 0x36b   : > { %v3058_v7 = vadd.f32 %v5829_v45, %v3018_v53 }
 0x36c   : > { %3497 = vrot.lane.b32.xlu0 %v4667_v1, %s4724_s12  ;;  %3721 = vrot.lane.b32.xlu1 %v3612_v44, %s4725_s22  ;;  %v3393_v62 = vmul.f32 1.442695, %v3340_v43  ;;  %v4669_v46 = vpop.eup %4668 }
 0x36d   : > { %v3094_v18 = vmax.f32 %v3058_v7, 0.0  ;;  %v3476_v22 = vpop.permute.xlu2 %3475  ;;  %v3293_v7 = vld [vmem:[%s5885_s17 + $0x30] sm:$0xff] }
 0x36e   : > { %4670 = vpow2.f32 %v3393_v62  ;;  %v3579_v26 = vmul.f32 %v3476_v22, %v3291_v35  ;;  %v3295_v35 = vld [vmem:[%s5885_s17 + $0x40] sm:$0xff] }
 0x36f   : > { %v3472_v17 = vpop.permute.xlu1 %3471  ;;  %v3112_v8 = vpack.c.bf16 %v3094_v18, %v3093_v24  ;;  %3682 = vst.msk [vmem:[%s5499_s8 + $0x118] sm:$0xff] %vm3133_vm8, %v3094_v18  ;;  %v3242_v0 = vpop.f32.mrf.mxu1  ;;  %v3294_v18 = vld [vmem:[%s5885_s17 + $0x38] sm:$0xff] }
 0x370   : > { %v3577_v40 = vmul.f32 %v3472_v17, %v3289_v12  ;;  %v5930_v57 = vadd.f32 %v5683_v28, %v3242_v0  ;;  %v3615_v10 = vadd.f32 %v3579_v26, %v5734_v14  ;;  %v5954_v48 = vpop.permute.xlu0 %3906 }
 0x371   : > { %4556 = vmatmul.msk.bf16.gmra.mxu1 %vm3133_vm8, %v3112_v8 }
 0x372   : > { %v3613_v45 = vadd.f32 %v3577_v40, %v5710_v52  ;;  %v3341_v6 = vmul.f32 0.5, %v5930_v57 }
 0x374   : > { %3936 = vrot.lane.b32.xlu0 %v5930_v57, %s4723_s11  ;;  %3723 = vrot.lane.b32.xlu2 %v3613_v45, %s4725_s22  ;;  %v4671_v50 = vpop.eup %4670  ;;  %v3395_v61 = vmul.f32 1.442695, %v3341_v6 }
 0x375   : > { %3499 = vrot.lane.b32.xlu1 %v4669_v46, %s4724_s12  ;;  %v3478_v51 = vpop.permute.xlu2 %3477 }
 0x376   : > { %4672 = vpow2.f32 %v3395_v61  ;;  %v3580_v54 = vmul.f32 %v3478_v51, %v3292_v13  ;;  %v3296_v51 = vld [vmem:[%s5885_s17 + $0x48] sm:$0xff] }
 0x377   : > { %v5937_v5 = vpop.permute.xlu1 %3908  ;;  %v3244_v37 = vpop.f32.mrf.mxu1 }
 0x378   : > { %v5940_v52 = vadd.f32 %v5683_v28, %v3244_v37  ;;  %v3616_v14 = vadd.f32 %v3580_v54, %v5746_v56 }
 0x37a   : > { %v3342_v25 = vmul.f32 0.5, %v5940_v52 }
 0x37c   : > { %3501 = vrot.lane.b32.xlu2 %v4671_v50, %s4724_s12  ;;  %v3397_v42 = vmul.f32 1.442695, %v3342_v25  ;;  %v4673_v2 = vpop.eup %4672 }
 0x37d   : > { %3938 = vrot.lane.b32.xlu1 %v5940_v52, %s4723_s11  ;;  %v5976_v1 = vpop.permute.xlu2 %3916 }
 0x37e   : > { %4674 = vpow2.f32 %v3397_v42 }
 0x37f   : > { %v3474_v63 = vpop.permute.xlu1 %3473  ;;  %v3247_v30 = vpop.f32.mrf.mxu1 }
 0x380   : > { %v3578_v16 = vmul.f32 %v3474_v63, %v3290_v60  ;;  %v5950_v41 = vadd.f32 %v5683_v28, %v3247_v30 }
 0x382   : > { %v3614_v32 = vadd.f32 %v3578_v16, %v5725_v59  ;;  %v3343_v24 = vmul.f32 0.5, %v5950_v41 }
 0x384   : > { %3725 = vrot.lane.b32.xlu0 %v3614_v32, %s4725_s22  ;;  %3940 = vrot.lane.b32.xlu2 %v5950_v41, %s4723_s11  ;;  %v3399_v59 = vmul.f32 1.442695, %v3343_v24  ;;  %v5963_v3 = vpop.permute.xlu0 %3912  ;;  %v4675_v23 = vpop.eup %4674 }
 0x385   : > { %3727 = vrot.lane.b32.xlu1 %v3615_v10, %s4725_s22 }
 0x386   : > { %4676 = vpow2.f32 %v3399_v59 }
 0x387   : > { %v3249_v29 = vpop.f32.mrf.mxu1  ;;  %v3484_v6 = vpop.permute.xlu2 %3483 }
 0x388   : > { %v5971_v44 = vadd.f32 %v5683_v28, %v3249_v29  ;;  %v3583_v25 = vmul.f32 %v3484_v6, %v3295_v35  ;;  %v3297_v29 = vld [vmem:[%s5885_s17 + $0x50] sm:$0xff] }
 0x38a   : > { %v3344_v12 = vmul.f32 0.5, %v5971_v44  ;;  %v3619_v63 = vadd.f32 %v3583_v25, %v5782_v4 }
 0x38c   : > { %3503 = vrot.lane.b32.xlu0 %v4673_v2, %s4724_s12  ;;  %3729 = vrot.lane.b32.xlu2 %v3616_v14, %s4725_s22  ;;  %v5968_v20 = vpop.permute.xlu1 %3914  ;;  %v4677_v53 = vpop.eup %4676  ;;  %v3401_v45 = vmul.f32 1.442695, %v3344_v12 }
 0x38d   : > { %3505 = vrot.lane.b32.xlu1 %v4675_v23, %s4724_s12 }
 0x38e   : > { %4678 = vpow2.f32 %v3401_v45 }
 0x38f   : > { %v3252_v33 = vpop.f32.mrf.mxu1  ;;  %v3480_v43 = vpop.permute.xlu0 %3479 }
 0x390   : > { %v5974_v56 = vadd.f32 %v5683_v28, %v3252_v33  ;;  %v3581_v17 = vmul.f32 %v3480_v43, %v3293_v7 }
 0x392   : > { %v3345_v8 = vmul.f32 0.5, %v5974_v56  ;;  %v3617_v37 = vadd.f32 %v3581_v17, %v5757_v9 }
 0x394   : > { %3942 = vrot.lane.b32.xlu0 %v5971_v44, %s4723_s11  ;;  %3507 = vrot.lane.b32.xlu2 %v4677_v53, %s4724_s12  ;;  %v3403_v22 = vmul.f32 1.442695, %v3345_v8  ;;  %v6004_v61 = vpop.permute.xlu2 %3922  ;;  %v3298_v8 = vld [vmem:[%s5885_s17 + $0x58] sm:$0xff] }
 0x395   : > { %3944 = vrot.lane.b32.xlu1 %v5974_v56, %s4723_s11 }
 0x396   : > { %4680 = vpow2.f32 %v3403_v22 }
 0x397   : > { %v3482_v40 = vpop.permute.xlu1 %3481  ;;  %v3254_v62 = vpop.f32.mrf.mxu1 }
 0x398   : > { %v3582_v0 = vmul.f32 %v3482_v40, %v3294_v18  ;;  %v5988_v46 = vadd.f32 %v5683_v28, %v3254_v62 }
 0x39a   : > { %v3618_v50 = vadd.f32 %v3582_v0, %v5770_v19  ;;  %v3346_v60 = vmul.f32 0.5, %v5988_v46  ;;  %v4679_v19 = vpop.eup %4678 }
 0x39c   : > { %3731 = vrot.lane.b32.xlu0 %v3617_v37, %s4725_s22  ;;  %3946 = vrot.lane.b32.xlu2 %v5988_v46, %s4723_s11  ;;  %v3405_v9 = vmul.f32 1.442695, %v3346_v60  ;;  %v5999_v16 = vpop.permute.xlu0 %3918  ;;  %v4681_v30 = vpop.eup %4680 }
 0x39d   : > { %3733 = vrot.lane.b32.xlu1 %v3618_v50, %s4725_s22 }
 0x39e   : > { %4682 = vpow2.f32 %v3405_v9  ;;  %v3299_v9 = vld [vmem:[%s5885_s17 + $0x60] sm:$0xff] }
 0x39f   : > { %v3257_v26 = vpop.f32.mrf.mxu1  ;;  %v3490_v59 = vpop.permute.xlu2 %3489 }
 0x3a0   : > { %v6009_v10 = vadd.f32 %v5683_v28, %v3257_v26  ;;  %v3586_v0 = vmul.f32 %v3490_v59, %v3298_v8 }
 0x3a2   : > { %v3347_v54 = vmul.f32 0.5, %v6009_v10 }
 0x3a4   : > { %3509 = vrot.lane.b32.xlu0 %v4679_v19, %s4724_s12  ;;  %3735 = vrot.lane.b32.xlu2 %v3619_v63, %s4725_s22  ;;  %v6006_v42 = vpop.permute.xlu1 %3920  ;;  %v4683_v13 = vpop.eup %4682  ;;  %v3407_v7 = vmul.f32 1.442695, %v3347_v54 }
 0x3a5   : > { %3511 = vrot.lane.b32.xlu1 %v4681_v30, %s4724_s12  ;;  %v3300_v30 = vld [vmem:[%s5885_s17 + $0x68] sm:$0xff] }
 0x3a6   : > { %4684 = vpow2.f32 %v3407_v7 }
 0x3a7   : > { %v3259_v32 = vpop.f32.mrf.mxu1  ;;  %v3486_v24 = vpop.permute.xlu0 %3485 }
 0x3a8   : > { %v6012_v4 = vadd.f32 %v5683_v28, %v3259_v32  ;;  %v3584_v14 = vmul.f32 %v3486_v24, %v3296_v51 }
 0x3aa   : > { %v3348_v2 = vmul.f32 0.5, %v6012_v4  ;;  %v3620_v12 = vadd.f32 %v3584_v14, %v5795_v47 }
 0x3ac   : > { %3948 = vrot.lane.b32.xlu0 %v6009_v10, %s4723_s11  ;;  %3513 = vrot.lane.b32.xlu2 %v4683_v13, %s4724_s12  ;;  %v3409_v18 = vmul.f32 1.442695, %v3348_v2  ;;  %v6034_v62 = vpop.permute.xlu2 %3928  ;;  %v4685_v37 = vpop.eup %4684 }
 0x3ad   : > { %3950 = vrot.lane.b32.xlu1 %v6012_v4, %s4723_s11 }
 0x3ae   : > { %4686 = vpow2.f32 %v3409_v18 }
 0x3af   : > { %v3488_v23 = vpop.permute.xlu1 %3487  ;;  %v3262_v53 = vpop.f32.mrf.mxu1 }
 0x3b0   : > { %v3585_v33 = vmul.f32 %v3488_v23, %v3297_v29  ;;  %v6024_v43 = vadd.f32 %v5683_v28, %v3262_v53  ;;  %v3301_v53 = vld [vmem:[%s5885_s17 + $0x70] sm:$0xff] }
 0x3b2   : > { %v3621_v17 = vadd.f32 %v3585_v33, %v5806_v49  ;;  %v3349_v40 = vmul.f32 0.5, %v6024_v43  ;;  %v3622_v49 = vadd.f32 %v3586_v0, %v5819_v34 }
 0x3b4   : > { %3737 = vrot.lane.b32.xlu0 %v3620_v12, %s4725_s22  ;;  %3952 = vrot.lane.b32.xlu2 %v6024_v43, %s4723_s11  ;;  %v3411_v47 = vmul.f32 1.442695, %v3349_v40  ;;  %v6037_v22 = vpop.permute.xlu0 %3924  ;;  %v4687_v50 = vpop.eup %4686 }
 0x3b5   : > { %3739 = vrot.lane.b32.xlu1 %v3621_v17, %s4725_s22 }
 0x3b6   : > { %4688 = vpow2.f32 %v3411_v47 }
 0x3b7   : > { %v3264_v45 = vpop.f32.mrf.mxu1  ;;  %v3496_v35 = vpop.permute.xlu2 %3495 }
 0x3b8   : > { %v6045_v25 = vadd.f32 %v5683_v28, %v3264_v45 }
 0x3ba   : > { %v3350_v19 = vmul.f32 0.5, %v6045_v25 }
 0x3bc   : > { %3515 = vrot.lane.b32.xlu0 %v4685_v37, %s4724_s12  ;;  %3741 = vrot.lane.b32.xlu2 %v3622_v49, %s4725_s22  ;;  %v6042_v6 = vpop.permute.xlu1 %3926  ;;  %v4689_v26 = vpop.eup %4688  ;;  %v3413_v59 = vmul.f32 1.442695, %v3350_v19 }
 0x3bd   : > { %3517 = vrot.lane.b32.xlu1 %v4687_v50, %s4724_s12 }
 0x3be   : > { %4690 = vpow2.f32 %v3413_v59 }
 0x3bf   : > { %v3267_v60 = vpop.f32.mrf.mxu1  ;;  %v3492_v63 = vpop.permute.xlu0 %3491 }
 0x3c0   : > { %v6048_v34 = vadd.f32 %v5683_v28, %v3267_v60  ;;  %v3587_v32 = vmul.f32 %v3492_v63, %v3299_v9 }
 0x3c2   : > { %v3351_v13 = vmul.f32 0.5, %v6048_v34  ;;  %v3623_v2 = vadd.f32 %v3587_v32, %v5835_v31 }
 0x3c4   : > { %3954 = vrot.lane.b32.xlu0 %v6045_v25, %s4723_s11  ;;  %3519 = vrot.lane.b32.xlu2 %v4689_v26, %s4724_s12  ;;  %v6059_v51 = vpop.permute.xlu2 %3934  ;;  %v3415_v23 = vmul.f32 1.442695, %v3351_v13  ;;  %v4691_v8 = vpop.eup %4690 }
 0x3c5   : > { %3956 = vrot.lane.b32.xlu1 %v6048_v34, %s4723_s11 }
 0x3c6   : > { %4692 = vpow2.f32 %v3415_v23 }
 0x3c7   : > { %v3494_v24 = vpop.permute.xlu1 %3493  ;;  %v3269_v29 = vpop.f32.mrf.mxu1 }
 0x3c8   : > { %v3588_v54 = vmul.f32 %v3494_v24, %v3300_v30  ;;  %v6062_v14 = vadd.f32 %v5683_v28, %v3269_v29  ;;  %v3589_v28 = vmul.f32 %v3496_v35, %v3301_v53  ;;  %v3302_v35 = vld [vmem:[%s5885_s17 + $0x78] sm:$0xff]  ;;  %v3304_v24 = vld [vmem:[%s5885_s17 + $0x88] sm:$0xff] }
 0x3ca   : > { %v3624_v33 = vadd.f32 %v3588_v54, %v5848_v27  ;;  %v3352_v7 = vmul.f32 0.5, %v6062_v14  ;;  %v3625_v17 = vadd.f32 %v3589_v28, %v5859_v55 }
 0x3cc   : > { %3743 = vrot.lane.b32.xlu0 %v3623_v2, %s4725_s22  ;;  %3958 = vrot.lane.b32.xlu2 %v6062_v14, %s4723_s11  ;;  %v6072_v31 = vpop.permute.xlu0 %3930  ;;  %v3417_v18 = vmul.f32 1.442695, %v3352_v7  ;;  %v4693_v40 = vpop.eup %4692 }
 0x3cd   : > { %3745 = vrot.lane.b32.xlu1 %v3624_v33, %s4725_s22 }
 0x3ce   : > { %v3724_v27 = vpop.permute.xlu2 %3723  ;;  %4694 = vpow2.f32 %v3417_v18 }
 0x3cf   : > { %3830 = vst.msk [vmem:[%s5499_s8 + $0x10] sm:$0xff] %vm3827_vm9, %v3724_v27  ;;  %v3272_v12 = vpop.f32.mrf.mxu1 }
 0x3d0   : > { %4011 = vst.msk [vmem:[%s5499_s8 + $0x10] sm:$0xff] %vm4008_vm10, %v5903_v36 }
 0x3d1   : > { %4048 = vst.msk [vmem:[%s5499_s8 + $0x10] sm:$0xff] %vm4045_vm11, %v5903_v36  ;;  %v6096_v36 = vld [vmem:[%s6510_s4] ss:$0 sm:$0xff] }
 0x3d2   : > { %v6099_v49 = vadd.f32 %v6096_v36, %v3272_v12 }
 0x3d4   : > { %3521 = vrot.lane.b32.xlu0 %v4691_v8, %s4724_s12  ;;  %3747 = vrot.lane.b32.xlu2 %v3625_v17, %s4725_s22  ;;  %v6086_v47 = vpop.permute.xlu1 %3932  ;;  %v4695_v37 = vpop.eup %4694  ;;  %v3353_v60 = vmul.f32 0.5, %v6099_v49 }
 0x3d5   : > { %3523 = vrot.lane.b32.xlu1 %v4693_v40, %s4724_s12  ;;  %v3307_v40 = vld [vmem:[%s5885_s17 + $0xa0] sm:$0xff] }
 0x3d6   : > { %v3720_v0 = vpop.permute.xlu0 %3719  ;;  %v3502_v45 = vpop.permute.xlu2 %3501  ;;  %v3419_v30 = vmul.f32 1.442695, %v3353_v60 }
 0x3d7   : > { %3828 = vst.msk [vmem:[%s5499_s8] sm:$0xff] %vm3827_vm9, %v3720_v0  ;;  %v3274_v55 = vpop.f32.mrf.mxu1  ;;  %v3592_v2 = vmul.f32 %v3502_v45, %v3304_v24  ;;  %v3306_v24 = vld [vmem:[%s5885_s17 + $0x98] sm:$0xff] }
 0x3d8   : > { %4009 = vst.msk [vmem:[%s5499_s8] sm:$0xff] %vm4008_vm10, %v5871_v39  ;;  %v6105_v50 = vadd.f32 %v6096_v36, %v3274_v55  ;;  %4696 = vpow2.f32 %v3419_v30 }
 0x3d9   : > { %4046 = vst.msk [vmem:[%s5499_s8] sm:$0xff] %vm4045_vm11, %v5871_v39  ;;  %v3628_v12 = vadd.f32 %v3592_v2, %v5914_v58 }
 0x3da   : > { %v3354_v54 = vmul.f32 0.5, %v6105_v50 }
 0x3dc   : > { %3960 = vrot.lane.b32.xlu0 %v6099_v49, %s4723_s11  ;;  %3525 = vrot.lane.b32.xlu2 %v4695_v37, %s4724_s12  ;;  %v3421_v53 = vmul.f32 1.442695, %v3354_v54 }
 0x3dd   : > { %3962 = vrot.lane.b32.xlu1 %v6105_v50, %s4723_s11 }
 0x3de   : > { %v3498_v26 = vpop.permute.xlu0 %3497  ;;  %v6114_v39 = vpop.permute.xlu2 %3940  ;;  %4698 = vpow2.f32 %v3421_v53  ;;  %v3310_v53 = vld [vmem:[%s5885_s17 + $0xb8] sm:$0xff] }
 0x3df   : > { %v3590_v9 = vmul.f32 %v3498_v26, %v3302_v35  ;;  %v3722_v63 = vpop.permute.xlu1 %3721  ;;  %v3277_v19 = vpop.f32.mrf.mxu1 }
 0x3e0   : > { %3829 = vst.msk [vmem:[%s5499_s8 + $0x8] sm:$0xff] %vm3827_vm9, %v3722_v63  ;;  %v6126_v13 = vadd.f32 %v6096_v36, %v3277_v19  ;;  %v4697_v27 = vpop.eup %4696 }
 0x3e1   : > { %v3626_v32 = vadd.f32 %v3590_v9, %v5874_v21  ;;  %4010 = vst.msk [vmem:[%s5499_s8 + $0x8] sm:$0xff] %vm4008_vm10, %v5908_v15  ;;  %v3303_v21 = vld [vmem:[%s5885_s17 + $0x80] sm:$0xff] }
 0x3e2   : > { %4047 = vst.msk [vmem:[%s5499_s8 + $0x8] sm:$0xff] %vm4045_vm11, %v5908_v15  ;;  %v3355_v29 = vmul.f32 0.5, %v6126_v13 }
 0x3e4   : > { %3749 = vrot.lane.b32.xlu0 %v3626_v32, %s4725_s22  ;;  %3964 = vrot.lane.b32.xlu2 %v6126_v13, %s4723_s11  ;;  %v3423_v7 = vmul.f32 1.442695, %v3355_v29  ;;  %v4699_v8 = vpop.eup %4698 }
 0x3e6   : > { %v3730_v59 = vpop.permute.xlu2 %3729  ;;  %4700 = vpow2.f32 %v3423_v7  ;;  %v6148_v18 = vpop.permute.xlu0 %3936 }
 0x3e7   : > { %3833 = vst.msk [vmem:[%s5499_s8 + $0x28] sm:$0xff] %vm3827_vm9, %v3730_v59  ;;  %v3500_v15 = vpop.permute.xlu1 %3499  ;;  %v3279_v33 = vpop.f32.mrf.mxu1 }
 0x3e8   : > { %4014 = vst.msk [vmem:[%s5499_s8 + $0x28] sm:$0xff] %vm4008_vm10, %v5924_v38  ;;  %v3591_v23 = vmul.f32 %v3500_v15, %v3303_v21  ;;  %v6160_v35 = vadd.f32 %v6096_v36, %v3279_v33 }
 0x3e9   : > { %4051 = vst.msk [vmem:[%s5499_s8 + $0x28] sm:$0xff] %vm4045_vm11, %v5924_v38 }
 0x3ea   : > { %v3627_v28 = vadd.f32 %v3591_v23, %v5893_v11  ;;  %v3356_v30 = vmul.f32 0.5, %v6160_v35 }
 0x3ec   : > { %3751 = vrot.lane.b32.xlu1 %v3627_v28, %s4725_s22  ;;  %3527 = vrot.lane.b32.xlu0 %v4697_v27, %s4724_s12  ;;  %v4701_v58 = vpop.eup %4700  ;;  %v3425_v59 = vmul.f32 1.442695, %v3356_v30 }
 0x3ed   : > { %3753 = vrot.lane.b32.xlu2 %v3628_v12, %s4725_s22 }
 0x3ee   : > { %v3508_v38 = vpop.permute.xlu2 %3507 }
 0x3ef   : > { %v6150_v17 = vpop.permute.xlu1 %3938  ;;  %v3282_v11 = vpop.f32.mrf.mxu1  ;;  %v3595_v55 = vmul.f32 %v3508_v38, %v3307_v40 }
 0x3f0   : > { %v6166_v26 = vadd.f32 %v6096_v36, %v3282_v11 }
 0x3f1   : > { %v3631_v63 = vadd.f32 %v3595_v55, %v5950_v41 }
 0x3f4   : > { %3529 = vrot.lane.b32.xlu1 %v4699_v8, %s4724_s12 }
 0x3f5   : > { %3531 = vrot.lane.b32.xlu2 %v4701_v58, %s4724_s12  ;;  %v3309_v58 = vld [vmem:[%s5885_s17 + $0xb0] sm:$0xff] }
 0x3f6   : > { %v3726_v0 = vpop.permute.xlu0 %3725  ;;  %v6155_v45 = vpop.permute.xlu2 %3946 }
 0x3f7   : > { %3831 = vst.msk [vmem:[%s5499_s8 + $0x18] sm:$0xff] %vm3827_vm9, %v3726_v0  ;;  %v3728_v37 = vpop.permute.xlu1 %3727  ;;  %v3284_v60 = vpop.f32.mrf.mxu1 }
 0x3f8   : > { %4012 = vst.msk [vmem:[%s5499_s8 + $0x18] sm:$0xff] %vm4008_vm10, %v5954_v48  ;;  %v6172_v9 = vadd.f32 %v6096_v36, %v3284_v60  ;;  %v3357_v36 = vmul.f32 0.5, %v6166_v26 }
 0x3f9   : > { %4049 = vst.msk [vmem:[%s5499_s8 + $0x18] sm:$0xff] %vm4045_vm11, %v5954_v48  ;;  %v3305_v48 = vld [vmem:[%s5885_s17 + $0x90] sm:$0xff] }
 0x3fa   : > { %3832 = vst.msk [vmem:[%s5499_s8 + $0x20] sm:$0xff] %vm3827_vm9, %v3728_v37  ;;  %v3358_v19 = vmul.f32 0.5, %v6172_v9  ;;  %v3427_v2 = vmul.f32 1.442695, %v3357_v36 }
 0x3fb   : > { %4013 = vst.msk [vmem:[%s5499_s8 + $0x20] sm:$0xff] %vm4008_vm10, %v5937_v5 }
 0x3fc   : > { %4050 = vst.msk [vmem:[%s5499_s8 + $0x20] sm:$0xff] %vm4045_vm11, %v5937_v5  ;;  %v3429_v32 = vmul.f32 1.442695, %v3358_v19 }
 0x3fd   : > { %3759 = vrot.lane.b32.xlu2 %v3631_v63, %s4725_s22  ;;  %v3313_v63 = vld [vmem:[%s5885_s17 + $0xd0] sm:$0xff] }
 0x3fe   : > { %v3504_v41 = vpop.permute.xlu0 %3503  ;;  %v3736_v54 = vpop.permute.xlu2 %3735  ;;  %4702 = vpow2.f32 %v3429_v32 }
 0x3ff   : > { %v3593_v21 = vmul.f32 %v3504_v41, %v3305_v48  ;;  %3836 = vst.msk [vmem:[%s5499_s8 + $0x40] sm:$0xff] %vm3827_vm9, %v3736_v54  ;;  %v3506_v29 = vpop.permute.xlu1 %3505  ;;  %4704 = vpow2.f32 %v3425_v59 }
 0x400   : > { %4017 = vst.msk [vmem:[%s5499_s8 + $0x40] sm:$0xff] %vm4008_vm10, %v5976_v1  ;;  %v3594_v5 = vmul.f32 %v3506_v29, %v3306_v24  ;;  %4706 = vpow2.f32 %v3427_v2  ;;  %v3312_v24 = vld [vmem:[%s5885_s17 + $0xc8] sm:$0xff] }
 0x401   : > { %v3629_v15 = vadd.f32 %v3593_v21, %v5930_v57  ;;  %4054 = vst.msk [vmem:[%s5499_s8 + $0x40] sm:$0xff] %vm4045_vm11, %v5976_v1 }
 0x402   : > { %v3630_v23 = vadd.f32 %v3594_v5, %v5940_v52  ;;  %v3316_v5 = vld [vmem:[%s5885_s17 + $0xe8] sm:$0xff] }
 0x403   : > { %3755 = vrot.lane.b32.xlu0 %v3629_v15, %s4725_s22 }
 0x404   : > { %3757 = vrot.lane.b32.xlu1 %v3630_v23, %s4725_s22  ;;  %v4703_v33 = vpop.eup %4702 }
 0x405   : > { %3537 = vrot.lane.b32.xlu2 %v4703_v33, %s4724_s12  ;;  %v4705_v28 = vpop.eup %4704 }
 0x406   : > { %v6203_v7 = vpop.permute.xlu0 %3942  ;;  %v3514_v57 = vpop.permute.xlu2 %3513 }
 0x407   : > { %v6205_v1 = vpop.permute.xlu1 %3944  ;;  %v3598_v52 = vmul.f32 %v3514_v57, %v3310_v53  ;;  %v4707_v27 = vpop.eup %4706  ;;  %v3315_v57 = vld [vmem:[%s5885_s17 + $0xe0] sm:$0xff] }
 0x409   : > { %v3634_v12 = vadd.f32 %v3598_v52, %v5988_v46  ;;  %v3308_v46 = vld [vmem:[%s5885_s17 + $0xa8] sm:$0xff] }
 0x40b   : > { %3533 = vrot.lane.b32.xlu0 %v4705_v28, %s4724_s12 }
 0x40c   : > { %3535 = vrot.lane.b32.xlu1 %v4707_v27, %s4724_s12 }
 0x40d   : > { %3765 = vrot.lane.b32.xlu2 %v3634_v12, %s4725_s22 }
 0x40e   : > { %v3732_v38 = vpop.permute.xlu0 %3731  ;;  %v6211_v11 = vpop.permute.xlu2 %3952 }
 0x40f   : > { %3834 = vst.msk [vmem:[%s5499_s8 + $0x30] sm:$0xff] %vm3827_vm9, %v3732_v38  ;;  %v3734_v8 = vpop.permute.xlu1 %3733 }
 0x410   : > { %4015 = vst.msk [vmem:[%s5499_s8 + $0x30] sm:$0xff] %vm4008_vm10, %v5963_v3 }
 0x411   : > { %4052 = vst.msk [vmem:[%s5499_s8 + $0x30] sm:$0xff] %vm4045_vm11, %v5963_v3 }
 0x412   : > { %3835 = vst.msk [vmem:[%s5499_s8 + $0x38] sm:$0xff] %vm3827_vm9, %v3734_v8  ;;  %v3319_v8 = vld [vmem:[%s5885_s17 + $0x100] sm:$0xff] }
 0x413   : > { %4016 = vst.msk [vmem:[%s5499_s8 + $0x38] sm:$0xff] %vm4008_vm10, %v5968_v20 }
 0x414   : > { %4053 = vst.msk [vmem:[%s5499_s8 + $0x38] sm:$0xff] %vm4045_vm11, %v5968_v20 }
 0x416   : > { %v3510_v40 = vpop.permute.xlu0 %3509  ;;  %v3742_v0 = vpop.permute.xlu2 %3741 }
 0x417   : > { %v3596_v55 = vmul.f32 %v3510_v40, %v3308_v46  ;;  %3839 = vst.msk [vmem:[%s5499_s8 + $0x58] sm:$0xff] %vm3827_vm9, %v3742_v0  ;;  %v3512_v37 = vpop.permute.xlu1 %3511 }
 0x418   : > { %4020 = vst.msk [vmem:[%s5499_s8 + $0x58] sm:$0xff] %vm4008_vm10, %v6004_v61  ;;  %v3597_v3 = vmul.f32 %v3512_v37, %v3309_v58 }
 0x419   : > { %v3632_v60 = vadd.f32 %v3596_v55, %v5971_v44  ;;  %4057 = vst.msk [vmem:[%s5499_s8 + $0x58] sm:$0xff] %vm4045_vm11, %v6004_v61 }
 0x41a   : > { %v3633_v20 = vadd.f32 %v3597_v3, %v5974_v56  ;;  %v3322_v3 = vld [vmem:[%s5885_s17 + $0x118] sm:$0xff] }
 0x41b   : > { %3761 = vrot.lane.b32.xlu0 %v3632_v60, %s4725_s22 }
 0x41c   : > { %3763 = vrot.lane.b32.xlu1 %v3633_v20, %s4725_s22 }
 0x41e   : > { %v6244_v19 = vpop.permute.xlu0 %3948  ;;  %v3520_v44 = vpop.permute.xlu2 %3519 }
 0x41f   : > { %v3601_v30 = vmul.f32 %v3520_v44, %v3313_v63  ;;  %v6246_v48 = vpop.permute.xlu1 %3950  ;;  %v3318_v44 = vld [vmem:[%s5885_s17 + $0xf8] sm:$0xff] }
 0x421   : > { %v3637_v61 = vadd.f32 %v3601_v30, %v6024_v43  ;;  %v3311_v43 = vld [vmem:[%s5885_s17 + $0xc0] sm:$0xff] }
 0x423   : > { %3771 = vrot.lane.b32.xlu2 %v3637_v61, %s4725_s22 }
 0x426   : > { %v3738_v56 = vpop.permute.xlu0 %3737  ;;  %v6250_v36 = vpop.permute.xlu2 %3958 }
 0x427   : > { %3837 = vst.msk [vmem:[%s5499_s8 + $0x48] sm:$0xff] %vm3827_vm9, %v3738_v56  ;;  %v3740_v32 = vpop.permute.xlu1 %3739 }
 0x428   : > { %4018 = vst.msk [vmem:[%s5499_s8 + $0x48] sm:$0xff] %vm4008_vm10, %v5999_v16 }
 0x429   : > { %4055 = vst.msk [vmem:[%s5499_s8 + $0x48] sm:$0xff] %vm4045_vm11, %v5999_v16 }
 0x42a   : > { %3838 = vst.msk [vmem:[%s5499_s8 + $0x50] sm:$0xff] %vm3827_vm9, %v3740_v32 }
 0x42b   : > { %4019 = vst.msk [vmem:[%s5499_s8 + $0x50] sm:$0xff] %vm4008_vm10, %v6006_v42 }
 0x42c   : > { %4056 = vst.msk [vmem:[%s5499_s8 + $0x50] sm:$0xff] %vm4045_vm11, %v6006_v42 }
 0x42e   : > { %v3516_v41 = vpop.permute.xlu0 %3515  ;;  %v3748_v54 = vpop.permute.xlu2 %3747 }
 0x42f   : > { %v3599_v21 = vmul.f32 %v3516_v41, %v3311_v43  ;;  %3842 = vst.msk [vmem:[%s5499_s8 + $0x70] sm:$0xff] %vm3827_vm9, %v3748_v54  ;;  %v3518_v29 = vpop.permute.xlu1 %3517 }
 0x430   : > { %4023 = vst.msk [vmem:[%s5499_s8 + $0x70] sm:$0xff] %vm4008_vm10, %v6034_v62  ;;  %v3600_v16 = vmul.f32 %v3518_v29, %v3312_v24 }
 0x431   : > { %v3635_v59 = vadd.f32 %v3599_v21, %v6009_v10  ;;  %4060 = vst.msk [vmem:[%s5499_s8 + $0x70] sm:$0xff] %vm4045_vm11, %v6034_v62 }
 0x432   : > { %v3636_v42 = vadd.f32 %v3600_v16, %v6012_v4 }
 0x433   : > { %3767 = vrot.lane.b32.xlu0 %v3635_v59, %s4725_s22 }
 0x434   : > { %3769 = vrot.lane.b32.xlu1 %v3636_v42, %s4725_s22 }
 0x436   : > { %v6283_v2 = vpop.permute.xlu0 %3954  ;;  %v3526_v10 = vpop.permute.xlu2 %3525 }
 0x437   : > { %v3604_v15 = vmul.f32 %v3526_v10, %v3316_v5  ;;  %v6285_v23 = vpop.permute.xlu1 %3956 }
 0x439   : > { %v3640_v62 = vadd.f32 %v3604_v15, %v6062_v14  ;;  %v3314_v14 = vld [vmem:[%s5885_s17 + $0xd8] sm:$0xff] }
 0x43b   : > { %3777 = vrot.lane.b32.xlu2 %v3640_v62, %s4725_s22 }
 0x43e   : > { %v3744_v4 = vpop.permute.xlu0 %3743  ;;  %v6289_v33 = vpop.permute.xlu2 %3964 }
 0x43f   : > { %3840 = vst.msk [vmem:[%s5499_s8 + $0x60] sm:$0xff] %vm3827_vm9, %v3744_v4  ;;  %v3746_v53 = vpop.permute.xlu1 %3745 }
 0x440   : > { %4021 = vst.msk [vmem:[%s5499_s8 + $0x60] sm:$0xff] %vm4008_vm10, %v6037_v22 }
 0x441   : > { %4058 = vst.msk [vmem:[%s5499_s8 + $0x60] sm:$0xff] %vm4045_vm11, %v6037_v22 }
 0x442   : > { %3841 = vst.msk [vmem:[%s5499_s8 + $0x68] sm:$0xff] %vm3827_vm9, %v3746_v53 }
 0x443   : > { %4022 = vst.msk [vmem:[%s5499_s8 + $0x68] sm:$0xff] %vm4008_vm10, %v6042_v6 }
 0x444   : > { %4059 = vst.msk [vmem:[%s5499_s8 + $0x68] sm:$0xff] %vm4045_vm11, %v6042_v6 }
 0x446   : > { %v3522_v52 = vpop.permute.xlu0 %3521 }
 0x447   : > { %v3602_v28 = vmul.f32 %v3522_v52, %v3314_v14  ;;  %v3754_v27 = vpop.permute.xlu2 %3753  ;;  %v3524_v12 = vpop.permute.xlu1 %3523 }
 0x448   : > { %3845 = vst.msk [vmem:[%s5499_s8 + $0x88] sm:$0xff] %vm3827_vm9, %v3754_v27  ;;  %v3603_v38 = vmul.f32 %v3524_v12, %v3315_v57 }
 0x449   : > { %v3638_v22 = vadd.f32 %v3602_v28, %v6045_v25  ;;  %4026 = vst.msk [vmem:[%s5499_s8 + $0x88] sm:$0xff] %vm4008_vm10, %v6059_v51 }
 0x44a   : > { %4063 = vst.msk [vmem:[%s5499_s8 + $0x88] sm:$0xff] %vm4045_vm11, %v6059_v51  ;;  %v3639_v6 = vadd.f32 %v3603_v38, %v6048_v34 }
 0x44b   : > { %3773 = vrot.lane.b32.xlu0 %v3638_v22, %s4725_s22 }
 0x44c   : > { %3775 = vrot.lane.b32.xlu1 %v3639_v6, %s4725_s22 }
 0x44e   : > { %v6322_v25 = vpop.permute.xlu0 %3960 }
 0x44f   : > { %v3532_v46 = vpop.permute.xlu2 %3531  ;;  %v6326_v34 = vpop.permute.xlu1 %3962 }
 0x450   : > { %v3607_v58 = vmul.f32 %v3532_v46, %v3319_v8 }
 0x452   : > { %v3643_v40 = vadd.f32 %v3607_v58, %v6126_v13  ;;  %v3317_v13 = vld [vmem:[%s5885_s17 + $0xf0] sm:$0xff] }
 0x454   : > { %3783 = vrot.lane.b32.xlu2 %v3643_v40, %s4725_s22 }
 0x456   : > { %v3750_v51 = vpop.permute.xlu0 %3749 }
 0x457   : > { %3843 = vst.msk [vmem:[%s5499_s8 + $0x78] sm:$0xff] %vm3827_vm9, %v3750_v51  ;;  %v3760_v0 = vpop.permute.xlu2 %3759 }
 0x458   : > { %4024 = vst.msk [vmem:[%s5499_s8 + $0x78] sm:$0xff] %vm4008_vm10, %v6072_v31 }
 0x459   : > { %4061 = vst.msk [vmem:[%s5499_s8 + $0x78] sm:$0xff] %vm4045_vm11, %v6072_v31 }
 0x45a   : > { %3848 = vst.msk [vmem:[%s5499_s8 + $0xa0] sm:$0xff] %vm3827_vm9, %v3760_v0 }
 0x45b   : > { %4029 = vst.msk [vmem:[%s5499_s8 + $0xa0] sm:$0xff] %vm4008_vm10, %v6114_v39 }
 0x45c   : > { %4066 = vst.msk [vmem:[%s5499_s8 + $0xa0] sm:$0xff] %vm4045_vm11, %v6114_v39 }
 0x45e   : > { %v3752_v55 = vpop.permute.xlu1 %3751  ;;  %v3528_v37 = vpop.permute.xlu0 %3527 }
 0x45f   : > { %3844 = vst.msk [vmem:[%s5499_s8 + $0x80] sm:$0xff] %vm3827_vm9, %v3752_v55  ;;  %v3605_v60 = vmul.f32 %v3528_v37, %v3317_v13  ;;  %v3538_v31 = vpop.permute.xlu2 %3537 }
 0x460   : > { %4025 = vst.msk [vmem:[%s5499_s8 + $0x80] sm:$0xff] %vm4008_vm10, %v6086_v47  ;;  %v3610_v39 = vmul.f32 %v3538_v31, %v3322_v3 }
 0x461   : > { %4062 = vst.msk [vmem:[%s5499_s8 + $0x80] sm:$0xff] %vm4045_vm11, %v6086_v47  ;;  %v3641_v20 = vadd.f32 %v3605_v60, %v6099_v49 }
 0x462   : > { %v3646_v63 = vadd.f32 %v3610_v39, %v6172_v9 }
 0x463   : > { %3779 = vrot.lane.b32.xlu0 %v3641_v20, %s4725_s22 }
 0x464   : > { %3789 = vrot.lane.b32.xlu2 %v3646_v63, %s4725_s22 }
 0x466   : > { %v3530_v30 = vpop.permute.xlu1 %3529 }
 0x467   : > { %v3606_v61 = vmul.f32 %v3530_v30, %v3318_v44  ;;  %v3766_v47 = vpop.permute.xlu2 %3765 }
 0x468   : > { %3851 = vst.msk [vmem:[%s5499_s8 + $0xb8] sm:$0xff] %vm3827_vm9, %v3766_v47 }
 0x469   : > { %v3642_v49 = vadd.f32 %v3606_v61, %v6105_v50  ;;  %4032 = vst.msk [vmem:[%s5499_s8 + $0xb8] sm:$0xff] %vm4008_vm10, %v6155_v45  ;;  %v3320_v50 = vld [vmem:[%s5885_s17 + $0x108] sm:$0xff] }
 0x46a   : > { %4069 = vst.msk [vmem:[%s5499_s8 + $0xb8] sm:$0xff] %vm4045_vm11, %v6155_v45  ;;  %v3321_v45 = vld [vmem:[%s5885_s17 + $0x110] sm:$0xff] }
 0x46b   : > { %3781 = vrot.lane.b32.xlu1 %v3642_v49, %s4725_s22 }
 0x46c   : > { %3970 = vrot.lane.b32.xlu2 %v6172_v9, %s4723_s11 }
 0x475   : > { %v3756_v56 = vpop.permute.xlu0 %3755 }
 0x476   : > { %3846 = vst.msk [vmem:[%s5499_s8 + $0x90] sm:$0xff] %vm3827_vm9, %v3756_v56  ;;  %v3758_v32 = vpop.permute.xlu1 %3757 }
 0x477   : > { %4027 = vst.msk [vmem:[%s5499_s8 + $0x90] sm:$0xff] %vm4008_vm10, %v6148_v18 }
 0x478   : > { %4064 = vst.msk [vmem:[%s5499_s8 + $0x90] sm:$0xff] %vm4045_vm11, %v6148_v18 }
 0x479   : > { %3847 = vst.msk [vmem:[%s5499_s8 + $0x98] sm:$0xff] %vm3827_vm9, %v3758_v32 }
 0x47a   : > { %4028 = vst.msk [vmem:[%s5499_s8 + $0x98] sm:$0xff] %vm4008_vm10, %v6150_v17 }
 0x47b   : > { %4065 = vst.msk [vmem:[%s5499_s8 + $0x98] sm:$0xff] %vm4045_vm11, %v6150_v17 }
 0x47d   : > { %v3534_v9 = vpop.permute.xlu0 %3533  ;;  %v3772_v43 = vpop.permute.xlu2 %3771 }
 0x47e   : > { %v3608_v24 = vmul.f32 %v3534_v9, %v3320_v50  ;;  %3854 = vst.msk [vmem:[%s5499_s8 + $0xd0] sm:$0xff] %vm3827_vm9, %v3772_v43  ;;  %v3536_v18 = vpop.permute.xlu1 %3535 }
 0x47f   : > { %4035 = vst.msk [vmem:[%s5499_s8 + $0xd0] sm:$0xff] %vm4008_vm10, %v6211_v11  ;;  %v3609_v41 = vmul.f32 %v3536_v18, %v3321_v45 }
 0x480   : > { %v3644_v17 = vadd.f32 %v3608_v24, %v6160_v35  ;;  %4072 = vst.msk [vmem:[%s5499_s8 + $0xd0] sm:$0xff] %vm4045_vm11, %v6211_v11 }
 0x481   : > { %v3645_v54 = vadd.f32 %v3609_v41, %v6166_v26 }
 0x482   : > { %3785 = vrot.lane.b32.xlu0 %v3644_v17, %s4725_s22 }
 0x483   : > { %3787 = vrot.lane.b32.xlu1 %v3645_v54, %s4725_s22 }
 0x48a   : > { %3966 = vrot.lane.b32.xlu0 %v6160_v35, %s4723_s11 }
 0x48b   : > { %3968 = vrot.lane.b32.xlu1 %v6166_v26, %s4723_s11 }
 0x48d   : > { %v3762_v21 = vpop.permute.xlu0 %3761 }
 0x48e   : > { %3849 = vst.msk [vmem:[%s5499_s8 + $0xa8] sm:$0xff] %vm3827_vm9, %v3762_v21  ;;  %v3764_v11 = vpop.permute.xlu1 %3763 }
 0x48f   : > { %4030 = vst.msk [vmem:[%s5499_s8 + $0xa8] sm:$0xff] %vm4008_vm10, %v6203_v7 }
 0x490   : > { %4067 = vst.msk [vmem:[%s5499_s8 + $0xa8] sm:$0xff] %vm4045_vm11, %v6203_v7 }
 0x491   : > { %3850 = vst.msk [vmem:[%s5499_s8 + $0xb0] sm:$0xff] %vm3827_vm9, %v3764_v11 }
 0x492   : > { %4031 = vst.msk [vmem:[%s5499_s8 + $0xb0] sm:$0xff] %vm4008_vm10, %v6205_v1 }
 0x493   : > { %4068 = vst.msk [vmem:[%s5499_s8 + $0xb0] sm:$0xff] %vm4045_vm11, %v6205_v1 }
 0x495   : > { %v3778_v35 = vpop.permute.xlu2 %3777 }
 0x496   : > { %3857 = vst.msk [vmem:[%s5499_s8 + $0xe8] sm:$0xff] %vm3827_vm9, %v3778_v35 }
 0x497   : > { %4038 = vst.msk [vmem:[%s5499_s8 + $0xe8] sm:$0xff] %vm4008_vm10, %v6250_v36 }
 0x498   : > { %4075 = vst.msk [vmem:[%s5499_s8 + $0xe8] sm:$0xff] %vm4045_vm11, %v6250_v36 }
 0x4a5   : > { %v3768_v26 = vpop.permute.xlu0 %3767 }
 0x4a6   : > { %3852 = vst.msk [vmem:[%s5499_s8 + $0xc0] sm:$0xff] %vm3827_vm9, %v3768_v26  ;;  %v3770_v7 = vpop.permute.xlu1 %3769 }
 0x4a7   : > { %4033 = vst.msk [vmem:[%s5499_s8 + $0xc0] sm:$0xff] %vm4008_vm10, %v6244_v19 }
 0x4a8   : > { %4070 = vst.msk [vmem:[%s5499_s8 + $0xc0] sm:$0xff] %vm4045_vm11, %v6244_v19 }
 0x4a9   : > { %3853 = vst.msk [vmem:[%s5499_s8 + $0xc8] sm:$0xff] %vm3827_vm9, %v3770_v7 }
 0x4aa   : > { %4034 = vst.msk [vmem:[%s5499_s8 + $0xc8] sm:$0xff] %vm4008_vm10, %v6246_v48 }
 0x4ab   : > { %4071 = vst.msk [vmem:[%s5499_s8 + $0xc8] sm:$0xff] %vm4045_vm11, %v6246_v48 }
 0x4ae   : > { %v3784_v1 = vpop.permute.xlu2 %3783 }
 0x4af   : > { %3860 = vst.msk [vmem:[%s5499_s8 + $0x100] sm:$0xff] %vm3827_vm9, %v3784_v1 }
 0x4b0   : > { %4041 = vst.msk [vmem:[%s5499_s8 + $0x100] sm:$0xff] %vm4008_vm10, %v6289_v33 }
 0x4b1   : > { %4078 = vst.msk [vmem:[%s5499_s8 + $0x100] sm:$0xff] %vm4045_vm11, %v6289_v33 }
 0x4bd   : > { %v3774_v19 = vpop.permute.xlu0 %3773 }
 0x4be   : > { %3855 = vst.msk [vmem:[%s5499_s8 + $0xd8] sm:$0xff] %vm3827_vm9, %v3774_v19  ;;  %v3776_v36 = vpop.permute.xlu1 %3775  ;;  %v3790_v48 = vpop.permute.xlu2 %3789 }
 0x4bf   : > { %4036 = vst.msk [vmem:[%s5499_s8 + $0xd8] sm:$0xff] %vm4008_vm10, %v6283_v2 }
 0x4c0   : > { %4073 = vst.msk [vmem:[%s5499_s8 + $0xd8] sm:$0xff] %vm4045_vm11, %v6283_v2 }
 0x4c1   : > { %3856 = vst.msk [vmem:[%s5499_s8 + $0xe0] sm:$0xff] %vm3827_vm9, %v3776_v36 }
 0x4c2   : > { %4037 = vst.msk [vmem:[%s5499_s8 + $0xe0] sm:$0xff] %vm4008_vm10, %v6285_v23 }
 0x4c3   : > { %4074 = vst.msk [vmem:[%s5499_s8 + $0xe0] sm:$0xff] %vm4045_vm11, %v6285_v23 }
 0x4c4   : > { %3863 = vst.msk [vmem:[%s5499_s8 + $0x118] sm:$0xff] %vm3827_vm9, %v3790_v48 }
 0x4c6   : > { %v3971_v29 = vpop.permute.xlu2 %3970 }
 0x4c7   : > { %4044 = vst.msk [vmem:[%s5499_s8 + $0x118] sm:$0xff] %vm4008_vm10, %v3971_v29 }
 0x4c8   : > { %4081 = vst.msk [vmem:[%s5499_s8 + $0x118] sm:$0xff] %vm4045_vm11, %v3971_v29 }
 0x4d5   : > { %v3780_v16 = vpop.permute.xlu0 %3779 }
 0x4d6   : > { %3858 = vst.msk [vmem:[%s5499_s8 + $0xf0] sm:$0xff] %vm3827_vm9, %v3780_v16 }
 0x4d7   : > { %4039 = vst.msk [vmem:[%s5499_s8 + $0xf0] sm:$0xff] %vm4008_vm10, %v6322_v25 }
 0x4d8   : > { %4076 = vst.msk [vmem:[%s5499_s8 + $0xf0] sm:$0xff] %vm4045_vm11, %v6322_v25 }
 0x4dd   : > { %v3782_v59 = vpop.permute.xlu1 %3781 }
 0x4de   : > { %3859 = vst.msk [vmem:[%s5499_s8 + $0xf8] sm:$0xff] %vm3827_vm9, %v3782_v59 }
 0x4df   : > { %4040 = vst.msk [vmem:[%s5499_s8 + $0xf8] sm:$0xff] %vm4008_vm10, %v6326_v34 }
 0x4e0   : > { %4077 = vst.msk [vmem:[%s5499_s8 + $0xf8] sm:$0xff] %vm4045_vm11, %v6326_v34 }
 0x4f4   : > { %v3786_v42 = vpop.permute.xlu0 %3785 }
 0x4f5   : > { %3861 = vst.msk [vmem:[%s5499_s8 + $0x108] sm:$0xff] %vm3827_vm9, %v3786_v42  ;;  %v3788_v5 = vpop.permute.xlu1 %3787 }
 0x4f6   : > { %3862 = vst.msk [vmem:[%s5499_s8 + $0x110] sm:$0xff] %vm3827_vm9, %v3788_v5 }
 0x4fc   : > { %v3967_v2 = vpop.permute.xlu0 %3966 }
 0x4fd   : > { %4042 = vst.msk [vmem:[%s5499_s8 + $0x108] sm:$0xff] %vm4008_vm10, %v3967_v2  ;;  %v3969_v10 = vpop.permute.xlu1 %3968 }
 0x4fe   : > { %4079 = vst.msk [vmem:[%s5499_s8 + $0x108] sm:$0xff] %vm4045_vm11, %v3967_v2 }
 0x4ff   : > { %4043 = vst.msk [vmem:[%s5499_s8 + $0x110] sm:$0xff] %vm4008_vm10, %v3969_v10 }
 0x500   : > { %4080 = vst.msk [vmem:[%s5499_s8 + $0x110] sm:$0xff] %vm4045_vm11, %v3969_v10 }
 0x501 PF: > { %s16_s21 = sadd.s32 1, %s4721_s21  }
 0x502   : > { %p13_p4 = scmp.ge.s32.totalorder %s16_s21, 4  }
 0x504   :  { %15 = sbr.rel (!%p13_p4) target bundleno = 1 (0x1), region = 85 }

</bundles_post_ra>
